<compile_context>
chip_gen: v5e
topology: v5e:2x2
jax: 0.10.0
libtpu: 0.0.40
codegen_flags: <defaults>
</compile_context>

<pallas_src>
import functools

import jax
import jax.numpy as jnp
from jax.experimental import pallas as pl
from jax.experimental.pallas import tpu as pltpu

D_IN, H1, H2, H3, H4, D_OUT = 768, 1024, 128, 64, 16, 1
_TARGET_GRID_STEPS = 4   # >= 2 grid steps per TensorCore on v7x megacore
_SUBLANE = 8             # x tile stays f32 in HBM -> 8-row sublane alignment


def _round_up(n, m):
    return ((n + m - 1) // m) * m


def _mlp_kernel(x_ref,
                w1_ref, b1_ref,
                w2_ref, b2_ref,
                w3_ref, b3_ref,
                w45_ref, b45_ref,
                o_ref):
    # Whole forward fused: all weights + one batch tile resident in VMEM.
    # Matmuls -> MXU (f32 accumulate), bias/ReLU -> VPU (kept f32), fused
    # 64->1 head -> VPU multiply + XLU cross-lane reduce.
    def layer(h, w_ref, b_ref):
        h = h.astype(w_ref.dtype)  # bf16 for layer 1, no-op f32 for layers 2-3
        h = jnp.dot(h, w_ref[...], preferred_element_type=jnp.float32) + b_ref[...]
        return jnp.maximum(h, 0.0)

    h = layer(x_ref[...], w1_ref, b1_ref)   # 768 -> 1024, ReLU
    h = layer(h, w2_ref, b2_ref)            # 1024 -> 128, ReLU
    h = layer(h, w3_ref, b3_ref)            # 128 -> 64,  ReLU
    # Fused Linear(64,16) @ Linear(16,1): single 64 -> 1 projection.
    out = jnp.sum(h * w45_ref[...], axis=-1, keepdims=True) + b45_ref[...]
    # NOTE: D_OUT=1 -> masked 1-of-128-lane store; bytes are tiny, so a lane-dense
    # transposed output layout is not worth the extra in-kernel transpose here.
    o_ref[...] = out.astype(o_ref.dtype)


def prepare_params(params, *, layer1_dtype=jnp.bfloat16):
    """One-time weight prep: fuse the activation-free 64->16->1 tail into a single
    64->1 head and cast W1 to the layer-1 MXU dtype.  Call once, reuse per call."""
    w45 = (params["w4"] @ params["w5"]).T.astype(jnp.float32)               # (1, 64)
    b45 = (params["b4"] @ params["w5"] + params["b5"]).astype(jnp.float32)  # (1, 1)
    f32 = jnp.float32
    return dict(
        w1=params["w1"].astype(layer1_dtype), b1=params["b1"].astype(f32),
        w2=params["w2"].astype(f32),          b2=params["b2"].astype(f32),
        w3=params["w3"].astype(f32),          b3=params["b3"].astype(f32),
        w45=w45, b45=b45)


@functools.lru_cache(maxsize=None)
def _build_forward(B, bm_req, w1_itemsize):
    # Tile no larger than needed for _TARGET_GRID_STEPS steps: lets the parallel
    # grid shard across v7x's 2 TCs while each core still pipelines its x tiles.
    bm = max(_SUBLANE, min(int(bm_req),
                           _round_up(-(-B // _TARGET_GRID_STEPS), _SUBLANE)))
    B_pad = _round_up(B, bm)
    grid = (B_pad // bm,)

    flops = 2 * B_pad * (D_IN * H1 + H1 * H2 + H2 * H3 + H3 * D_OUT)
    weight_bytes = (D_IN * H1 * w1_itemsize
                    + (H1 * H2 + H2 * H3 + H1 + H2 + 2 * H3 + 1) * 4)
    bytes_accessed = weight_bytes + B_pad * D_IN * 4 + B_pad * D_OUT * 4
    cost = pl.CostEstimate(flops=flops, transcendentals=0,
                           bytes_accessed=bytes_accessed)

    def resident(shape):
        # Grid-invariant operand: constant index_map -> fetched once, stays in VMEM.
        return pl.BlockSpec(shape, lambda i: (0, 0))

    call = pl.pallas_call(
        _mlp_kernel,
        out_shape=jax.ShapeDtypeStruct((B_pad, D_OUT), jnp.float32),
        grid_spec=pltpu.PrefetchScalarGridSpec(
            num_scalar_prefetch=0,
            grid=grid,
            in_specs=[
                pl.BlockSpec((bm, D_IN), lambda i: (i, 0)),   # x batch tile
                resident((D_IN, H1)), resident((1, H1)),
                resident((H1, H2)),   resident((1, H2)),
                resident((H2, H3)),   resident((1, H3)),
                resident((1, H3)),    resident((1, 1)),       # fused 64->1 head
            ],
            out_specs=pl.BlockSpec((bm, D_OUT), lambda i: (i, 0)),
        ),
        compiler_params=pltpu.CompilerParams(
            dimension_semantics=("parallel",),
            vmem_limit_bytes=32 * 1024 * 1024),
        cost_estimate=cost,
    )

    def fwd(x, w1, b1, w2, b2, w3, b3, w45, b45):
        x = x.astype(jnp.float32)                    # f32 tile; layer-1 cast in-kernel
        if B_pad != B:
            x = jnp.pad(x, ((0, B_pad - B), (0, 0)))
        out = call(x, w1, b1, w2, b2, w3, b3, w45, b45)
        return out[:B]

    return jax.jit(fwd)


def aesthetic_predictor(x, prepared, *, bm=512):
    """x: (B, 768). prepared: output of prepare_params. Returns (B, 1) float32."""
    B, d = x.shape
    assert d == D_IN
    fwd = _build_forward(B, int(bm), int(jnp.dtype(prepared["w1"].dtype).itemsize))
    return fwd(x, prepared["w1"], prepared["b1"], prepared["w2"], prepared["b2"],
               prepared["w3"], prepared["b3"], prepared["w45"], prepared["b45"])


def init_params(key):
    """nn.Linear default init U(-1/sqrt(in), 1/sqrt(in)); weights stored (in, out)."""
    dims = [(D_IN, H1), (H1, H2), (H2, H3), (H3, H4), (H4, D_OUT)]
    params = {}
    keys = jax.random.split(key, 2 * len(dims))
    for n, (din, dout) in enumerate(dims):
        bound = 1.0 / (din ** 0.5)
        params[f"w{n+1}"] = jax.random.uniform(keys[2 * n], (din, dout),
                                               jnp.float32, -bound, bound)
        params[f"b{n+1}"] = jax.random.uniform(keys[2 * n + 1], (1, dout),
                                               jnp.float32, -bound, bound)
    return params


def reference_forward(x, params):
    h = jnp.maximum(x @ params["w1"] + params["b1"], 0.0)
    h = jnp.maximum(h @ params["w2"] + params["b2"], 0.0)
    h = jnp.maximum(h @ params["w3"] + params["b3"], 0.0)
    h = h @ params["w4"] + params["b4"]          # no activation
    return h @ params["w5"] + params["b5"]


if __name__ == "__main__":
    key = jax.random.PRNGKey(0)
    pkey, xkey, xkey2 = jax.random.split(key, 3)
    params = init_params(pkey)

    # B=20 (not a multiple of 8) exercises the zero-padding path; B=96 exercises
    # multi-step grids at two different batch tiles.
    x_small = jax.random.normal(xkey, (20, D_IN), dtype=jnp.float32)
    x_big = jax.random.normal(xkey2, (96, D_IN), dtype=jnp.float32)
    ref_small = reference_forward(x_small, params)
    ref_big = reference_forward(x_big, params)

    # Bit-faithful f32 path (layer 1 kept f32): tight tolerance vs the reference.
    prep_f32 = prepare_params(params, layer1_dtype=jnp.float32)
    out_f32 = jax.block_until_ready(aesthetic_predictor(x_small, prep_f32))
    assert out_f32.shape == (20, 1)
    err_f32 = float(jnp.max(jnp.abs(out_f32 - ref_small)))
    assert jnp.allclose(out_f32, ref_small, atol=1e-4, rtol=1e-4), f"f32 err {err_f32}"

    # Default path: bf16 layer-1 operands, f32 accumulation -> looser tolerance.
    prep = prepare_params(params)
    out_small = jax.block_until_ready(aesthetic_predictor(x_small, prep))
    out_big = jax.block_until_ready(aesthetic_predictor(x_big, prep))         # bm=24, 4 steps
    out_big8 = jax.block_until_ready(aesthetic_predictor(x_big, prep, bm=8))  # 12 steps
    assert out_small.shape == (20, 1) and out_big.shape == (96, 1)
    err_s = float(jnp.max(jnp.abs(out_small - ref_small)))
    err_b = float(jnp.max(jnp.abs(out_big - ref_big)))
    assert jnp.allclose(out_small, ref_small, atol=3e-2, rtol=3e-2), f"bf16 err {err_s}"
    assert jnp.allclose(out_big, ref_big, atol=3e-2, rtol=3e-2), f"bf16 err {err_b}"
    # Batch-tiling must not change per-row math.
    assert jnp.allclose(out_big8, out_big, atol=1e-5, rtol=1e-5)

    print("KERNEL_OK")
</pallas_src>

<mosaic_0001>
module attributes {stable_mosaic.version = 11 : i64} {
  func.func @_mlp_kernel(%arg0: i32, %arg1: memref<8x768xf32, #tpu.memory_space<vmem>>, %arg2: memref<768x1024xf32, #tpu.memory_space<vmem>>, %arg3: memref<1x1024xf32, #tpu.memory_space<vmem>>, %arg4: memref<1024x128xf32, #tpu.memory_space<vmem>>, %arg5: memref<1x128xf32, #tpu.memory_space<vmem>>, %arg6: memref<128x64xf32, #tpu.memory_space<vmem>>, %arg7: memref<1x64xf32, #tpu.memory_space<vmem>>, %arg8: memref<1x64xf32, #tpu.memory_space<vmem>>, %arg9: memref<1x1xf32, #tpu.memory_space<vmem>>, %arg10: memref<8x1xf32, #tpu.memory_space<vmem>>) attributes {dimension_semantics = [#tpu.dimension_semantics<parallel>], iteration_bounds = array<i64: 3>, scalar_prefetch = 0 : i64, scratch_operands = 0 : i64, tpu.core_type = #tpu.core_type<tc>, window_params = [{transform_indices = @transform_0, window_bounds = array<i64: 8, 768>}, {pipeline_mode = #tpu.pipeline_mode<synchronous>, transform_indices = @transform_1, window_bounds = array<i64: 768, 1024>}, {pipeline_mode = #tpu.pipeline_mode<synchronous>, transform_indices = @transform_2, window_bounds = array<i64: 1, 1024>}, {pipeline_mode = #tpu.pipeline_mode<synchronous>, transform_indices = @transform_3, window_bounds = array<i64: 1024, 128>}, {pipeline_mode = #tpu.pipeline_mode<synchronous>, transform_indices = @transform_4, window_bounds = array<i64: 1, 128>}, {pipeline_mode = #tpu.pipeline_mode<synchronous>, transform_indices = @transform_5, window_bounds = array<i64: 128, 64>}, {pipeline_mode = #tpu.pipeline_mode<synchronous>, transform_indices = @transform_6, window_bounds = array<i64: 1, 64>}, {pipeline_mode = #tpu.pipeline_mode<synchronous>, transform_indices = @transform_7, window_bounds = array<i64: 1, 64>}, {pipeline_mode = #tpu.pipeline_mode<synchronous>, transform_indices = @transform_8, window_bounds = array<i64: 1, 1>}, {transform_indices = @transform_9, window_bounds = array<i64: 8, 1>}]} {
    %c0 = arith.constant 0 : index
    %c0_0 = arith.constant 0 : index
    %0 = vector.load %arg1[%c0, %c0_0] : memref<8x768xf32, #tpu.memory_space<vmem>>, vector<8x768xf32>
    %c0_1 = arith.constant 0 : index
    %c0_2 = arith.constant 0 : index
    %1 = vector.load %arg2[%c0_1, %c0_2] : memref<768x1024xf32, #tpu.memory_space<vmem>>, vector<768x1024xf32>
    %cst = arith.constant dense<0.000000e+00> : vector<8x1024xf32>
    %2 = tpu.matmul %0, %1, %cst {dimension_numbers = #tpu.dot_dimension_numbers<[1], [0], [0], [1], [0, 0, 1, 1], [], []>} : vector<8x768xf32>, vector<768x1024xf32>, vector<8x1024xf32> -> vector<8x1024xf32>
    %c0_3 = arith.constant 0 : index
    %c0_4 = arith.constant 0 : index
    %3 = vector.load %arg3[%c0_3, %c0_4] : memref<1x1024xf32, #tpu.memory_space<vmem>>, vector<1x1024xf32>
    %4 = vector.broadcast %3 : vector<1x1024xf32> to vector<8x1024xf32>
    %5 = arith.addf %2, %4 : vector<8x1024xf32>
    %cst_5 = arith.constant 0.000000e+00 : f32
    %6 = vector.broadcast %cst_5 : f32 to vector<8x1024xf32>
    %7 = arith.maximumf %5, %6 : vector<8x1024xf32>
    %c0_6 = arith.constant 0 : index
    %c0_7 = arith.constant 0 : index
    %8 = vector.load %arg4[%c0_6, %c0_7] : memref<1024x128xf32, #tpu.memory_space<vmem>>, vector<1024x128xf32>
    %cst_8 = arith.constant dense<0.000000e+00> : vector<8x128xf32>
    %9 = tpu.matmul %7, %8, %cst_8 {dimension_numbers = #tpu.dot_dimension_numbers<[1], [0], [0], [1], [0, 0, 1, 1], [], []>} : vector<8x1024xf32>, vector<1024x128xf32>, vector<8x128xf32> -> vector<8x128xf32>
    %c0_9 = arith.constant 0 : index
    %c0_10 = arith.constant 0 : index
    %10 = vector.load %arg5[%c0_9, %c0_10] : memref<1x128xf32, #tpu.memory_space<vmem>>, vector<1x128xf32>
    %11 = vector.broadcast %10 : vector<1x128xf32> to vector<8x128xf32>
    %12 = arith.addf %9, %11 : vector<8x128xf32>
    %cst_11 = arith.constant 0.000000e+00 : f32
    %13 = vector.broadcast %cst_11 : f32 to vector<8x128xf32>
    %14 = arith.maximumf %12, %13 : vector<8x128xf32>
    %c0_12 = arith.constant 0 : index
    %c0_13 = arith.constant 0 : index
    %15 = vector.load %arg6[%c0_12, %c0_13] : memref<128x64xf32, #tpu.memory_space<vmem>>, vector<128x64xf32>
    %cst_14 = arith.constant dense<0.000000e+00> : vector<8x64xf32>
    %16 = tpu.matmul %14, %15, %cst_14 {dimension_numbers = #tpu.dot_dimension_numbers<[1], [0], [0], [1], [0, 0, 1, 1], [], []>} : vector<8x128xf32>, vector<128x64xf32>, vector<8x64xf32> -> vector<8x64xf32>
    %c0_15 = arith.constant 0 : index
    %c0_16 = arith.constant 0 : index
    %17 = vector.load %arg7[%c0_15, %c0_16] : memref<1x64xf32, #tpu.memory_space<vmem>>, vector<1x64xf32>
    %18 = vector.broadcast %17 : vector<1x64xf32> to vector<8x64xf32>
    %19 = arith.addf %16, %18 : vector<8x64xf32>
    %cst_17 = arith.constant 0.000000e+00 : f32
    %20 = vector.broadcast %cst_17 : f32 to vector<8x64xf32>
    %21 = arith.maximumf %19, %20 : vector<8x64xf32>
    %c0_18 = arith.constant 0 : index
    %c0_19 = arith.constant 0 : index
    %22 = vector.load %arg8[%c0_18, %c0_19] : memref<1x64xf32, #tpu.memory_space<vmem>>, vector<1x64xf32>
    %23 = vector.broadcast %22 : vector<1x64xf32> to vector<8x64xf32>
    %24 = arith.mulf %21, %23 : vector<8x64xf32>
    %cst_20 = arith.constant dense<0.000000e+00> : vector<8xf32>
    %25 = vector.multi_reduction <add>, %24, %cst_20 [1] : vector<8x64xf32> to vector<8xf32>
    %26 = vector.shape_cast %25 : vector<8xf32> to vector<8x1xf32>
    %c0_21 = arith.constant 0 : index
    %c0_22 = arith.constant 0 : index
    %27 = vector.load %arg9[%c0_21, %c0_22] : memref<1x1xf32, #tpu.memory_space<vmem>>, vector<1x1xf32>
    %28 = vector.broadcast %27 : vector<1x1xf32> to vector<8x1xf32>
    %29 = arith.addf %26, %28 : vector<8x1xf32>
    %c0_23 = arith.constant 0 : index
    %c0_24 = arith.constant 0 : index
    %30 = vector.load %arg10[%c0_23, %c0_24] : memref<8x1xf32, #tpu.memory_space<vmem>>, vector<8x1xf32>
    tpu.vector_store %arg10[%c0_23, %c0_24], %29 {strides = array<i32>} : memref<8x1xf32, #tpu.memory_space<vmem>>, vector<8x1xf32>,
    return
  }
  func.func @transform_0(%arg0: i32) -> (i32, i32) {
    %c0_i32 = arith.constant 0 : i32
    %c0_i32_0 = arith.constant 0 : i32
    return %arg0, %c0_i32 : i32, i32
  }
  func.func @transform_1(%arg0: i32) -> (i32, i32) {
    %c0_i32 = arith.constant 0 : i32
    %c0_i32_0 = arith.constant 0 : i32
    %c0_i32_1 = arith.constant 0 : i32
    return %c0_i32, %c0_i32_0 : i32, i32
  }
  func.func @transform_2(%arg0: i32) -> (i32, i32) {
    %c0_i32 = arith.constant 0 : i32
    %c0_i32_0 = arith.constant 0 : i32
    %c0_i32_1 = arith.constant 0 : i32
    return %c0_i32, %c0_i32_0 : i32, i32
  }
  func.func @transform_3(%arg0: i32) -> (i32, i32) {
    %c0_i32 = arith.constant 0 : i32
    %c0_i32_0 = arith.constant 0 : i32
    %c0_i32_1 = arith.constant 0 : i32
    return %c0_i32, %c0_i32_0 : i32, i32
  }
  func.func @transform_4(%arg0: i32) -> (i32, i32) {
    %c0_i32 = arith.constant 0 : i32
    %c0_i32_0 = arith.constant 0 : i32
    %c0_i32_1 = arith.constant 0 : i32
    return %c0_i32, %c0_i32_0 : i32, i32
  }
  func.func @transform_5(%arg0: i32) -> (i32, i32) {
    %c0_i32 = arith.constant 0 : i32
    %c0_i32_0 = arith.constant 0 : i32
    %c0_i32_1 = arith.constant 0 : i32
    return %c0_i32, %c0_i32_0 : i32, i32
  }
  func.func @transform_6(%arg0: i32) -> (i32, i32) {
    %c0_i32 = arith.constant 0 : i32
    %c0_i32_0 = arith.constant 0 : i32
    %c0_i32_1 = arith.constant 0 : i32
    return %c0_i32, %c0_i32_0 : i32, i32
  }
  func.func @transform_7(%arg0: i32) -> (i32, i32) {
    %c0_i32 = arith.constant 0 : i32
    %c0_i32_0 = arith.constant 0 : i32
    %c0_i32_1 = arith.constant 0 : i32
    return %c0_i32, %c0_i32_0 : i32, i32
  }
  func.func @transform_8(%arg0: i32) -> (i32, i32) {
    %c0_i32 = arith.constant 0 : i32
    %c0_i32_0 = arith.constant 0 : i32
    %c0_i32_1 = arith.constant 0 : i32
    return %c0_i32, %c0_i32_0 : i32, i32
  }
  func.func @transform_9(%arg0: i32) -> (i32, i32) {
    %c0_i32 = arith.constant 0 : i32
    %c0_i32_0 = arith.constant 0 : i32
    return %arg0, %c0_i32 : i32, i32
  }
}

</mosaic_0001>

<bundles_post_ra>
// kernel: fwd.1
= control target key start
LH: loop header
LB: loop body
LE: loop exit
PB: predicated region body
PF: predicated region fallthrough
CT: control target
= control target key end

     0   :  { %s3339_s0 = inlined_call_operand.vmem [shape: f32[24,768], index: 0, kind: input, shape index: {}]   ;;  %s3340_s1 = inlined_call_operand.hbm [shape: f32[768,1024], index: 1, kind: input, shape index: {}]   ;;  %s3341_s2 = inlined_call_operand.hbm [shape: f32[1,1024], index: 2, kind: input, shape index: {}]   ;;  %s3342_s3 = inlined_call_operand.hbm [shape: f32[1024,128], index: 3, kind: input, shape index: {}]   ;;  %s3343_s4 = inlined_call_operand.hbm [shape: f32[1,128], index: 4, kind: input, shape index: {}]   ;;  %s3344_s5 = inlined_call_operand.vmem [shape: f32[128,64], index: 5, kind: input, shape index: {}]   ;;  %s3345_s6 = inlined_call_operand.hbm [shape: f32[1,64], index: 6, kind: input, shape index: {}]   ;;  %s3346_s7 = inlined_call_operand.hbm [shape: f32[1,64], index: 7, kind: input, shape index: {}]   ;;  %s3347_s8 = inlined_call_operand.<no memory space> [shape: f32[1,1], index: 8, kind: input, shape index: {}]   ;;  %s3348_s9 = inlined_call_operand.vmem [shape: f32[24,1], index: 9, kind: output, shape index: {}]  }
   0x1   :  { %v14_v0 = vstv %s3347_s8 }
   0x2   :  { %15 = vst [vmem:[#allocation2] sm:$0x1] %v14_v0 }
   0x3   :  { %16 = vsyncpa [#allocation4], 0 }
   0x4   :  { %17 = vsyncpa [#allocation6], 0 }
   0x5   :  { %18 = vsyncpa [#allocation9], 0 }
   0x6   :  { %19 = vsyncpa [#allocation12], 0  ;;  %s3026_s11 = smov 0  }
   0x7 LB: > { %s276_s14 = sshll.u32 %s3341_s2, 4  ;;  %s3035_s8 = sadd.s32 4294967295, %s2961_s11   ;;  %s2961_s11 = sphi %s3026_s11, %s25_s11   ;;  %s277_s14 = int_to_ptr.hbm [resolvable:$true] %s276_s14 }
   0x8   : > { %p2650_p0 = scmp.ge.s32.totalorder %s2961_s11, 1  ;;  %p250_p1 = scmp.lt.s32.totalorder %s2961_s11, 4 }
   0x9   : > { %p2713_p2 = scmp.eq.s32.totalorder %s3035_s8, 0  ;;  %s2963_s16 = smov [#allocation5]  }
   0xa   : > { %p3040_p3 = pnand %p2650_p0, %p250_p1  ;;  %s278_s17 = sshll.u32 %s2963_s16, 4  ;;  %s279_s17 = int_to_ptr.vmem [resolvable:$true] %s278_s17 }
   0xb   : > { %s302_s20 = sshll.u32 %s3343_s4, 4  ;;  %s261_s23 = sshll.u32 %s3340_s1, 4  ;;  %s303_s20 = int_to_ptr.hbm [resolvable:$true] %s302_s20  ;;  %s262_s23 = int_to_ptr.hbm [resolvable:$true] %s261_s23 }
   0xc   : > { %p2694_p4 = pneg %p3040_p3  ;;  %s2964_s25 = smov [#allocation8]  }
   0xd   : > { %s304_s26 = sshll.u32 %s2964_s25, 4  ;;  %s2965_s27 = smov [#allocation3]   ;;  %s305_s26 = int_to_ptr.vmem [resolvable:$true] %s304_s26 }
   0xe   : > { %p3054_p5 = pnand %p2713_p2, %p2694_p4  ;;  %s263_s28 = sshll.u32 %s2965_s27, 4  ;;  %s264_s28 = int_to_ptr.vmem [resolvable:$true] %s263_s28 }
   0xf   : > { %s2966_s29 = smov 1024   ;;  %s2967_s30 = smov 64  }
  0x10   : > { %2700 = dma.hbm_to_vmem [thread:$0]  (!%p3054_p5), %s277_s14, 128, %s279_s17, [#allocation6]  }
  0x11   : > { %2706 = dma.hbm_to_vmem [thread:$0]  (!%p3054_p5), %s303_s20, 16, %s305_s26, [#allocation9]  }
  0x12   : > { %2697 = dma.hbm_to_vmem [thread:$0]  (!%p3054_p5), %s262_s23, 98304, %s264_s28, [#allocation4], %s2966_s29, %s2966_s29, %s2967_s30  }
  0x13   : > { %s287_s13 = sshll.u32 %s3342_s3, 4  ;;  %s2968_s16 = smov [#allocation7]   ;;  %s288_s13 = int_to_ptr.hbm [resolvable:$true] %s287_s13 }
  0x14   : > { %s289_s18 = sshll.u32 %s2968_s16, 4  ;;  %s317_s19 = sshll.u32 %s3345_s6, 4  ;;  %s290_s18 = int_to_ptr.vmem [resolvable:$true] %s289_s18  ;;  %s318_s19 = int_to_ptr.hbm [resolvable:$true] %s317_s19 }
  0x15   : > { %s2969_s20 = smov 128   ;;  %s2970_s21 = smov 8  }
  0x16   : > { %2703 = dma.hbm_to_vmem [thread:$0]  (!%p3054_p5), %s288_s13, 16384, %s290_s18, [#allocation6], %s2969_s20, %s2969_s20, %s2970_s21  }
  0x17   : > { %s2971_s22 = smov [#allocation10]   ;;  %s329_s27 = sshll.u32 %s3346_s7, 4  ;;  %s330_s27 = int_to_ptr.hbm [resolvable:$true] %s329_s27 }
  0x18   : > { %s319_s23 = sshll.u32 %s2971_s22, 4  ;;  %s2972_s28 = smov [#allocation11]   ;;  %s320_s23 = int_to_ptr.vmem [resolvable:$true] %s319_s23 }
  0x19   : > { %2709 = dma.hbm_to_vmem [thread:$0]  (!%p3054_p5), %s318_s19, 16, %s320_s23, [#allocation9]  }
  0x1a   : > { %s331_s29 = sshll.u32 %s2972_s28, 4  ;;  %355 = sbr.rel (%p3040_p3) target bundleno = 1005 (0x3ed), region = 56  ;;  %s332_s29 = int_to_ptr.vmem [resolvable:$true] %s331_s29 }
  0x1b   : > { %2712 = dma.hbm_to_vmem [thread:$0]  (!%p3054_p5), %s330_s27, 16, %s332_s29, [#allocation12]  }
  0x1f   : > { %2944 = dma.done.wait (%p2713_p2), [#allocation4], 98304  }
  0x20   : > { %2946 = vsyncadd (%p2713_p2), [#allocation4], 4294868992 }
  0x21   : > { %2948 = dma.done.wait (%p2713_p2), [#allocation6], 16512  }
  0x22   : > { %2950 = vsyncadd (%p2713_p2), [#allocation6], 4294950784 }
  0x23   : > { %2952 = dma.done.wait (%p2713_p2), [#allocation9], 32  }
  0x24   : > { %2954 = vsyncadd (%p2713_p2), [#allocation9], 4294967264 }
  0x25   : > { %2956 = dma.done.wait (%p2713_p2), [#allocation12], 16  }
  0x26   : > { %2958 = vsyncadd (%p2713_p2), [#allocation12], 4294967280  ;;  %v551_v1 = vld [vmem:[#allocation3 + $0x3c0] sm:$0xff]  ;;  %p416_p6 = scmp.lt.s32.totalorder %s3035_s8, 2  ;;  %vm2524_vm0 = vcmask 523264   ;;  %vm2533_vm1 = vcmask 7168  }
  0x27   : > { %v679_v2 = vld [vmem:[#allocation3 + $0x7c0] sm:$0xff]  ;;  %1217 = vmatpush.msra.mxu0 %v551_v1 }
  0x28   : > { %v807_v3 = vld [vmem:[#allocation3 + $0xbc0] sm:$0xff]  ;;  %1237 = vmatpush.msra.mxu1 %v679_v2  ;;  %s3352_s8 = smov (!%p416_p6, %s3035_s8), 2 }
  0x29   : > { %v935_v4 = vld [vmem:[#allocation3 + $0xfc0] sm:$0xff]  ;;  %1257 = vmatpush.msra.mxu2 %v807_v3  ;;  %v552_v3 = vld [vmem:[#allocation3 + $0x3c8] sm:$0xff]  ;;  %s2669_s15 = smul.u32 48, %s3352_s8  ;;  %s2666_s26 = sshll.u32 %s3352_s8, 3 }
  0x2a   : > { %v543_v5 = vld [vmem:[#allocation3 + $0x380] sm:$0xff]  ;;  %1277 = vmatpush.msra.mxu3 %v935_v4  ;;  %v680_v4 = vld [vmem:[#allocation3 + $0x7c8] sm:$0xff]  ;;  %s424_s29 = scalar_lea.vmem %s3348_s9, %s2666_s26 }
  0x2b   : > { %v671_v6 = vld [vmem:[#allocation3 + $0x780] sm:$0xff]  ;;  %1218 = vmatpush.msra.mxu0 %v543_v5  ;;  %s3107_s10 = scalar_lea.vmem %s3339_s0, %s2669_s15 }
  0x2c   : > { %v799_v7 = vld [vmem:[#allocation3 + $0xb80] sm:$0xff]  ;;  %1238 = vmatpush.msra.mxu1 %v671_v6 }
  0x2d   : > { %v927_v8 = vld [vmem:[#allocation3 + $0xf80] sm:$0xff]  ;;  %1258 = vmatpush.msra.mxu2 %v799_v7  ;;  %v544_v7 = vld [vmem:[#allocation3 + $0x388] sm:$0xff] }
  0x2e   : > { %v535_v9 = vld [vmem:[#allocation3 + $0x340] sm:$0xff]  ;;  %1278 = vmatpush.msra.mxu3 %v927_v8  ;;  %v672_v8 = vld [vmem:[#allocation3 + $0x788] sm:$0xff] }
  0x2f   : > { %v663_v10 = vld [vmem:[#allocation3 + $0x740] sm:$0xff]  ;;  %1219 = vmatpush.msra.mxu0 %v535_v9 }
  0x30   : > { %v791_v11 = vld [vmem:[#allocation3 + $0xb40] sm:$0xff]  ;;  %1239 = vmatpush.msra.mxu1 %v663_v10 }
  0x31   : > { %v919_v12 = vld [vmem:[#allocation3 + $0xf40] sm:$0xff]  ;;  %1259 = vmatpush.msra.mxu2 %v791_v11  ;;  %v536_v11 = vld [vmem:[#allocation3 + $0x348] sm:$0xff] }
  0x32   : > { %v527_v13 = vld [vmem:[#allocation3 + $0x300] sm:$0xff]  ;;  %1279 = vmatpush.msra.mxu3 %v919_v12  ;;  %v664_v12 = vld [vmem:[#allocation3 + $0x748] sm:$0xff] }
  0x33   : > { %v655_v14 = vld [vmem:[#allocation3 + $0x700] sm:$0xff]  ;;  %1220 = vmatpush.msra.mxu0 %v527_v13 }
  0x34   : > { %v783_v15 = vld [vmem:[#allocation3 + $0xb00] sm:$0xff]  ;;  %1240 = vmatpush.msra.mxu1 %v655_v14 }
  0x35   : > { %v911_v16 = vld [vmem:[#allocation3 + $0xf00] sm:$0xff]  ;;  %1260 = vmatpush.msra.mxu2 %v783_v15  ;;  %v528_v15 = vld [vmem:[#allocation3 + $0x308] sm:$0xff] }
  0x36   : > { %v519_v17 = vld [vmem:[#allocation3 + $0x2c0] sm:$0xff]  ;;  %1280 = vmatpush.msra.mxu3 %v911_v16  ;;  %v656_v16 = vld [vmem:[#allocation3 + $0x708] sm:$0xff] }
  0x37   : > { %v647_v18 = vld [vmem:[#allocation3 + $0x6c0] sm:$0xff]  ;;  %1221 = vmatpush.msra.mxu0 %v519_v17 }
  0x38   : > { %v775_v19 = vld [vmem:[#allocation3 + $0xac0] sm:$0xff]  ;;  %1241 = vmatpush.msra.mxu1 %v647_v18 }
  0x39   : > { %v903_v20 = vld [vmem:[#allocation3 + $0xec0] sm:$0xff]  ;;  %1261 = vmatpush.msra.mxu2 %v775_v19  ;;  %v520_v19 = vld [vmem:[#allocation3 + $0x2c8] sm:$0xff] }
  0x3a   : > { %v511_v21 = vld [vmem:[#allocation3 + $0x280] sm:$0xff]  ;;  %1281 = vmatpush.msra.mxu3 %v903_v20  ;;  %v648_v20 = vld [vmem:[#allocation3 + $0x6c8] sm:$0xff] }
  0x3b   : > { %v639_v22 = vld [vmem:[#allocation3 + $0x680] sm:$0xff]  ;;  %1222 = vmatpush.msra.mxu0 %v511_v21 }
  0x3c   : > { %v767_v23 = vld [vmem:[#allocation3 + $0xa80] sm:$0xff]  ;;  %1242 = vmatpush.msra.mxu1 %v639_v22 }
  0x3d   : > { %v895_v24 = vld [vmem:[#allocation3 + $0xe80] sm:$0xff]  ;;  %1262 = vmatpush.msra.mxu2 %v767_v23  ;;  %v512_v23 = vld [vmem:[#allocation3 + $0x288] sm:$0xff] }
  0x3e   : > { %v503_v25 = vld [vmem:[#allocation3 + $0x240] sm:$0xff]  ;;  %1282 = vmatpush.msra.mxu3 %v895_v24  ;;  %v640_v24 = vld [vmem:[#allocation3 + $0x688] sm:$0xff] }
  0x3f   : > { %v631_v26 = vld [vmem:[#allocation3 + $0x640] sm:$0xff]  ;;  %1223 = vmatpush.msra.mxu0 %v503_v25 }
  0x40   : > { %v759_v27 = vld [vmem:[#allocation3 + $0xa40] sm:$0xff]  ;;  %1243 = vmatpush.msra.mxu1 %v631_v26 }
  0x41   : > { %v887_v28 = vld [vmem:[#allocation3 + $0xe40] sm:$0xff]  ;;  %1263 = vmatpush.msra.mxu2 %v759_v27  ;;  %v504_v27 = vld [vmem:[#allocation3 + $0x248] sm:$0xff] }
  0x42   : > { %v495_v29 = vld [vmem:[#allocation3 + $0x200] sm:$0xff]  ;;  %1283 = vmatpush.msra.mxu3 %v887_v28  ;;  %v632_v28 = vld [vmem:[#allocation3 + $0x648] sm:$0xff] }
  0x43   : > { %v623_v30 = vld [vmem:[#allocation3 + $0x600] sm:$0xff]  ;;  %1224 = vmatpush.msra.mxu0 %v495_v29 }
  0x44   : > { %v751_v31 = vld [vmem:[#allocation3 + $0xa00] sm:$0xff]  ;;  %1244 = vmatpush.msra.mxu1 %v623_v30 }
  0x45   : > { %v879_v32 = vld [vmem:[#allocation3 + $0xe00] sm:$0xff]  ;;  %1264 = vmatpush.msra.mxu2 %v751_v31  ;;  %v496_v31 = vld [vmem:[#allocation3 + $0x208] sm:$0xff] }
  0x46   : > { %v487_v33 = vld [vmem:[#allocation3 + $0x1c0] sm:$0xff]  ;;  %1284 = vmatpush.msra.mxu3 %v879_v32  ;;  %v624_v32 = vld [vmem:[#allocation3 + $0x608] sm:$0xff] }
  0x47   : > { %v615_v34 = vld [vmem:[#allocation3 + $0x5c0] sm:$0xff]  ;;  %1225 = vmatpush.msra.mxu0 %v487_v33 }
  0x48   : > { %v743_v35 = vld [vmem:[#allocation3 + $0x9c0] sm:$0xff]  ;;  %1245 = vmatpush.msra.mxu1 %v615_v34 }
  0x49   : > { %v871_v36 = vld [vmem:[#allocation3 + $0xdc0] sm:$0xff]  ;;  %1265 = vmatpush.msra.mxu2 %v743_v35  ;;  %v488_v35 = vld [vmem:[#allocation3 + $0x1c8] sm:$0xff] }
  0x4a   : > { %v479_v37 = vld [vmem:[#allocation3 + $0x180] sm:$0xff]  ;;  %1285 = vmatpush.msra.mxu3 %v871_v36  ;;  %v616_v36 = vld [vmem:[#allocation3 + $0x5c8] sm:$0xff] }
  0x4b   : > { %v607_v38 = vld [vmem:[#allocation3 + $0x580] sm:$0xff]  ;;  %1226 = vmatpush.msra.mxu0 %v479_v37 }
  0x4c   : > { %v735_v39 = vld [vmem:[#allocation3 + $0x980] sm:$0xff]  ;;  %1246 = vmatpush.msra.mxu1 %v607_v38 }
  0x4d   : > { %v863_v40 = vld [vmem:[#allocation3 + $0xd80] sm:$0xff]  ;;  %1266 = vmatpush.msra.mxu2 %v735_v39  ;;  %v480_v39 = vld [vmem:[#allocation3 + $0x188] sm:$0xff] }
  0x4e   : > { %v471_v41 = vld [vmem:[#allocation3 + $0x140] sm:$0xff]  ;;  %1286 = vmatpush.msra.mxu3 %v863_v40  ;;  %v608_v40 = vld [vmem:[#allocation3 + $0x588] sm:$0xff] }
  0x4f   : > { %v599_v42 = vld [vmem:[#allocation3 + $0x540] sm:$0xff]  ;;  %1227 = vmatpush.msra.mxu0 %v471_v41 }
  0x50   : > { %v727_v43 = vld [vmem:[#allocation3 + $0x940] sm:$0xff]  ;;  %1247 = vmatpush.msra.mxu1 %v599_v42 }
  0x51   : > { %v855_v44 = vld [vmem:[#allocation3 + $0xd40] sm:$0xff]  ;;  %1267 = vmatpush.msra.mxu2 %v727_v43  ;;  %v472_v43 = vld [vmem:[#allocation3 + $0x148] sm:$0xff] }
  0x52   : > { %v463_v45 = vld [vmem:[#allocation3 + $0x100] sm:$0xff]  ;;  %1287 = vmatpush.msra.mxu3 %v855_v44  ;;  %v600_v44 = vld [vmem:[#allocation3 + $0x548] sm:$0xff] }
  0x53   : > { %v591_v46 = vld [vmem:[#allocation3 + $0x500] sm:$0xff]  ;;  %1228 = vmatpush.msra.mxu0 %v463_v45 }
  0x54   : > { %v719_v47 = vld [vmem:[#allocation3 + $0x900] sm:$0xff]  ;;  %1248 = vmatpush.msra.mxu1 %v591_v46 }
  0x55   : > { %v847_v48 = vld [vmem:[#allocation3 + $0xd00] sm:$0xff]  ;;  %1268 = vmatpush.msra.mxu2 %v719_v47  ;;  %v464_v47 = vld [vmem:[#allocation3 + $0x108] sm:$0xff] }
  0x56   : > { %v455_v49 = vld [vmem:[#allocation3 + $0xc0] sm:$0xff]  ;;  %1288 = vmatpush.msra.mxu3 %v847_v48  ;;  %v592_v48 = vld [vmem:[#allocation3 + $0x508] sm:$0xff] }
  0x57   : > { %v583_v50 = vld [vmem:[#allocation3 + $0x4c0] sm:$0xff]  ;;  %1229 = vmatpush.msra.mxu0 %v455_v49 }
  0x58   : > { %v711_v51 = vld [vmem:[#allocation3 + $0x8c0] sm:$0xff]  ;;  %1249 = vmatpush.msra.mxu1 %v583_v50 }
  0x59   : > { %v839_v52 = vld [vmem:[#allocation3 + $0xcc0] sm:$0xff]  ;;  %1269 = vmatpush.msra.mxu2 %v711_v51  ;;  %v456_v51 = vld [vmem:[#allocation3 + $0xc8] sm:$0xff] }
  0x5a   : > { %v447_v53 = vld [vmem:[#allocation3 + $0x80] sm:$0xff]  ;;  %1289 = vmatpush.msra.mxu3 %v839_v52  ;;  %v584_v52 = vld [vmem:[#allocation3 + $0x4c8] sm:$0xff] }
  0x5b   : > { %v575_v54 = vld [vmem:[#allocation3 + $0x480] sm:$0xff]  ;;  %1230 = vmatpush.msra.mxu0 %v447_v53 }
  0x5c   : > { %v703_v55 = vld [vmem:[#allocation3 + $0x880] sm:$0xff]  ;;  %1250 = vmatpush.msra.mxu1 %v575_v54 }
  0x5d   : > { %v831_v56 = vld [vmem:[#allocation3 + $0xc80] sm:$0xff]  ;;  %1270 = vmatpush.msra.mxu2 %v703_v55  ;;  %v448_v55 = vld [vmem:[#allocation3 + $0x88] sm:$0xff] }
  0x5e   : > { %v439_v57 = vld [vmem:[#allocation3 + $0x40] sm:$0xff]  ;;  %1290 = vmatpush.msra.mxu3 %v831_v56  ;;  %v576_v56 = vld [vmem:[#allocation3 + $0x488] sm:$0xff] }
  0x5f   : > { %v567_v58 = vld [vmem:[#allocation3 + $0x440] sm:$0xff]  ;;  %1231 = vmatpush.msra.mxu0 %v439_v57 }
  0x60   : > { %v695_v59 = vld [vmem:[#allocation3 + $0x840] sm:$0xff]  ;;  %1251 = vmatpush.msra.mxu1 %v567_v58 }
  0x61   : > { %v823_v60 = vld [vmem:[#allocation3 + $0xc40] sm:$0xff]  ;;  %1271 = vmatpush.msra.mxu2 %v695_v59  ;;  %v440_v59 = vld [vmem:[#allocation3 + $0x48] sm:$0xff] }
  0x62   : > { %v431_v61 = vld [vmem:[#allocation3] sm:$0xff]  ;;  %1291 = vmatpush.msra.mxu3 %v823_v60  ;;  %v568_v60 = vld [vmem:[#allocation3 + $0x448] sm:$0xff] }
  0x63   : > { %v559_v62 = vld [vmem:[#allocation3 + $0x400] sm:$0xff]  ;;  %1232 = vmatpush.msra.mxu0 %v431_v61 }
  0x64   : > { %v687_v63 = vld [vmem:[#allocation3 + $0x800] sm:$0xff]  ;;  %1252 = vmatpush.msra.mxu1 %v559_v62 }
  0x65   : > { %v815_v0 = vld [vmem:[#allocation3 + $0xc00] sm:$0xff]  ;;  %1272 = vmatpush.msra.mxu2 %v687_v63  ;;  %v432_v63 = vld [vmem:[#allocation3 + $0x8] sm:$0xff] }
  0x66   : > { %v1063_v1 = vld [vmem:[#allocation3 + $0x13c0] sm:$0xff]  ;;  %1292 = vmatpush.msra.mxu3 %v815_v0  ;;  %v560_v0 = vld [vmem:[#allocation3 + $0x408] sm:$0xff] }
  0x67   : > { %v1191_v2 = vld [vmem:[#allocation3 + $0x17c0] sm:$0xff]  ;;  %1297 = vmatpush.msrb.mxu0 %v1063_v1  ;;  %1337 = vmatpush.msrb.mxu2 %v552_v3  ;;  %v3116_v3 = vld [vmem:[%s3107_s10 + $0x10] sm:$0xff] }
  0x68   : > { %v1055_v5 = vld [vmem:[#allocation3 + $0x1380] sm:$0xff]  ;;  %1317 = vmatpush.msrb.mxu1 %v1191_v2  ;;  %1357 = vmatpush.msrb.mxu3 %v680_v4  ;;  %v3119_v4 = vld [vmem:[%s3107_s10 + $0x18] sm:$0xff] }
  0x69   : > { %v1183_v6 = vld [vmem:[#allocation3 + $0x1780] sm:$0xff]  ;;  %1298 = vmatpush.msrb.mxu0 %v1055_v5  ;;  %1338 = vmatpush.msrb.mxu2 %v544_v7  ;;  %v808_v5 = vld [vmem:[#allocation3 + $0xbc8] sm:$0xff] }
  0x6a   : > { %v1047_v9 = vld [vmem:[#allocation3 + $0x1340] sm:$0xff]  ;;  %1318 = vmatpush.msrb.mxu1 %v1183_v6  ;;  %1358 = vmatpush.msrb.mxu3 %v672_v8  ;;  %v936_v6 = vld [vmem:[#allocation3 + $0xfc8] sm:$0xff] }
  0x6b   : > { %v1175_v10 = vld [vmem:[#allocation3 + $0x1740] sm:$0xff]  ;;  %1299 = vmatpush.msrb.mxu0 %v1047_v9  ;;  %1339 = vmatpush.msrb.mxu2 %v536_v11  ;;  %v1064_v7 = vld [vmem:[#allocation3 + $0x13c8] sm:$0xff] }
  0x6c   : > { %v1039_v13 = vld [vmem:[#allocation3 + $0x1300] sm:$0xff]  ;;  %1319 = vmatpush.msrb.mxu1 %v1175_v10  ;;  %1359 = vmatpush.msrb.mxu3 %v664_v12  ;;  %v1192_v8 = vld [vmem:[#allocation3 + $0x17c8] sm:$0xff] }
  0x6d   : > { %v1167_v14 = vld [vmem:[#allocation3 + $0x1700] sm:$0xff]  ;;  %1300 = vmatpush.msrb.mxu0 %v1039_v13  ;;  %1340 = vmatpush.msrb.mxu2 %v528_v15  ;;  %v800_v9 = vld [vmem:[#allocation3 + $0xb88] sm:$0xff] }
  0x6e   : > { %v1031_v17 = vld [vmem:[#allocation3 + $0x12c0] sm:$0xff]  ;;  %1320 = vmatpush.msrb.mxu1 %v1167_v14  ;;  %1360 = vmatpush.msrb.mxu3 %v656_v16  ;;  %v928_v10 = vld [vmem:[#allocation3 + $0xf88] sm:$0xff] }
  0x6f   : > { %v1159_v18 = vld [vmem:[#allocation3 + $0x16c0] sm:$0xff]  ;;  %1301 = vmatpush.msrb.mxu0 %v1031_v17  ;;  %1341 = vmatpush.msrb.mxu2 %v520_v19  ;;  %v1056_v11 = vld [vmem:[#allocation3 + $0x1388] sm:$0xff] }
  0x70   : > { %v1023_v21 = vld [vmem:[#allocation3 + $0x1280] sm:$0xff]  ;;  %1321 = vmatpush.msrb.mxu1 %v1159_v18  ;;  %1361 = vmatpush.msrb.mxu3 %v648_v20  ;;  %v1184_v12 = vld [vmem:[#allocation3 + $0x1788] sm:$0xff] }
  0x71   : > { %v1151_v22 = vld [vmem:[#allocation3 + $0x1680] sm:$0xff]  ;;  %1302 = vmatpush.msrb.mxu0 %v1023_v21  ;;  %1342 = vmatpush.msrb.mxu2 %v512_v23  ;;  %v792_v13 = vld [vmem:[#allocation3 + $0xb48] sm:$0xff] }
  0x72   : > { %v1015_v25 = vld [vmem:[#allocation3 + $0x1240] sm:$0xff]  ;;  %1322 = vmatpush.msrb.mxu1 %v1151_v22  ;;  %1362 = vmatpush.msrb.mxu3 %v640_v24  ;;  %v920_v14 = vld [vmem:[#allocation3 + $0xf48] sm:$0xff] }
  0x73   : > { %v1143_v26 = vld [vmem:[#allocation3 + $0x1640] sm:$0xff]  ;;  %1303 = vmatpush.msrb.mxu0 %v1015_v25  ;;  %1343 = vmatpush.msrb.mxu2 %v504_v27  ;;  %v1048_v15 = vld [vmem:[#allocation3 + $0x1348] sm:$0xff] }
  0x74   : > { %v1007_v29 = vld [vmem:[#allocation3 + $0x1200] sm:$0xff]  ;;  %1323 = vmatpush.msrb.mxu1 %v1143_v26  ;;  %1363 = vmatpush.msrb.mxu3 %v632_v28  ;;  %v1176_v16 = vld [vmem:[#allocation3 + $0x1748] sm:$0xff] }
  0x75   : > { %v1135_v30 = vld [vmem:[#allocation3 + $0x1600] sm:$0xff]  ;;  %1304 = vmatpush.msrb.mxu0 %v1007_v29  ;;  %1344 = vmatpush.msrb.mxu2 %v496_v31  ;;  %v784_v17 = vld [vmem:[#allocation3 + $0xb08] sm:$0xff] }
  0x76   : > { %v999_v33 = vld [vmem:[#allocation3 + $0x11c0] sm:$0xff]  ;;  %1324 = vmatpush.msrb.mxu1 %v1135_v30  ;;  %1364 = vmatpush.msrb.mxu3 %v624_v32  ;;  %v912_v18 = vld [vmem:[#allocation3 + $0xf08] sm:$0xff] }
  0x77   : > { %v1127_v34 = vld [vmem:[#allocation3 + $0x15c0] sm:$0xff]  ;;  %1305 = vmatpush.msrb.mxu0 %v999_v33  ;;  %1345 = vmatpush.msrb.mxu2 %v488_v35  ;;  %v1040_v19 = vld [vmem:[#allocation3 + $0x1308] sm:$0xff] }
  0x78   : > { %v991_v37 = vld [vmem:[#allocation3 + $0x1180] sm:$0xff]  ;;  %1325 = vmatpush.msrb.mxu1 %v1127_v34  ;;  %1365 = vmatpush.msrb.mxu3 %v616_v36  ;;  %v1168_v20 = vld [vmem:[#allocation3 + $0x1708] sm:$0xff] }
  0x79   : > { %v1119_v38 = vld [vmem:[#allocation3 + $0x1580] sm:$0xff]  ;;  %1306 = vmatpush.msrb.mxu0 %v991_v37  ;;  %1346 = vmatpush.msrb.mxu2 %v480_v39  ;;  %v776_v21 = vld [vmem:[#allocation3 + $0xac8] sm:$0xff] }
  0x7a   : > { %v983_v41 = vld [vmem:[#allocation3 + $0x1140] sm:$0xff]  ;;  %1326 = vmatpush.msrb.mxu1 %v1119_v38  ;;  %1366 = vmatpush.msrb.mxu3 %v608_v40  ;;  %v904_v22 = vld [vmem:[#allocation3 + $0xec8] sm:$0xff] }
  0x7b   : > { %v1111_v42 = vld [vmem:[#allocation3 + $0x1540] sm:$0xff]  ;;  %1307 = vmatpush.msrb.mxu0 %v983_v41  ;;  %1347 = vmatpush.msrb.mxu2 %v472_v43  ;;  %v1032_v23 = vld [vmem:[#allocation3 + $0x12c8] sm:$0xff] }
  0x7c   : > { %v975_v45 = vld [vmem:[#allocation3 + $0x1100] sm:$0xff]  ;;  %1327 = vmatpush.msrb.mxu1 %v1111_v42  ;;  %1367 = vmatpush.msrb.mxu3 %v600_v44  ;;  %v1160_v24 = vld [vmem:[#allocation3 + $0x16c8] sm:$0xff] }
  0x7d   : > { %v1103_v46 = vld [vmem:[#allocation3 + $0x1500] sm:$0xff]  ;;  %1308 = vmatpush.msrb.mxu0 %v975_v45  ;;  %1348 = vmatpush.msrb.mxu2 %v464_v47  ;;  %v896_v26 = vld [vmem:[#allocation3 + $0xe88] sm:$0xff] }
  0x7e   : > { %v967_v49 = vld [vmem:[#allocation3 + $0x10c0] sm:$0xff]  ;;  %1328 = vmatpush.msrb.mxu1 %v1103_v46  ;;  %1368 = vmatpush.msrb.mxu3 %v592_v48  ;;  %v768_v27 = vld [vmem:[#allocation3 + $0xa88] sm:$0xff] }
  0x7f   : > { %v1095_v50 = vld [vmem:[#allocation3 + $0x14c0] sm:$0xff]  ;;  %1309 = vmatpush.msrb.mxu0 %v967_v49  ;;  %1349 = vmatpush.msrb.mxu2 %v456_v51  ;;  %v1024_v28 = vld [vmem:[#allocation3 + $0x1288] sm:$0xff] }
  0x80   : > { %v959_v53 = vld [vmem:[#allocation3 + $0x1080] sm:$0xff]  ;;  %1329 = vmatpush.msrb.mxu1 %v1095_v50  ;;  %1369 = vmatpush.msrb.mxu3 %v584_v52  ;;  %v1152_v29 = vld [vmem:[#allocation3 + $0x1688] sm:$0xff] }
  0x81   : > { %v1087_v54 = vld [vmem:[#allocation3 + $0x1480] sm:$0xff]  ;;  %1310 = vmatpush.msrb.mxu0 %v959_v53  ;;  %1350 = vmatpush.msrb.mxu2 %v448_v55  ;;  %v760_v31 = vld [vmem:[#allocation3 + $0xa48] sm:$0xff] }
  0x82   : > { %v951_v57 = vld [vmem:[#allocation3 + $0x1040] sm:$0xff]  ;;  %1330 = vmatpush.msrb.mxu1 %v1087_v54  ;;  %1370 = vmatpush.msrb.mxu3 %v576_v56  ;;  %v888_v32 = vld [vmem:[#allocation3 + $0xe48] sm:$0xff] }
  0x83   : > { %v1079_v58 = vld [vmem:[#allocation3 + $0x1440] sm:$0xff]  ;;  %1311 = vmatpush.msrb.mxu0 %v951_v57  ;;  %1351 = vmatpush.msrb.mxu2 %v440_v59  ;;  %v1016_v33 = vld [vmem:[#allocation3 + $0x1248] sm:$0xff] }
  0x84   : > { %v943_v61 = vld [vmem:[#allocation3 + $0x1000] sm:$0xff]  ;;  %1331 = vmatpush.msrb.mxu1 %v1079_v58  ;;  %1371 = vmatpush.msrb.mxu3 %v568_v60  ;;  %v1144_v34 = vld [vmem:[#allocation3 + $0x1648] sm:$0xff] }
  0x85   : > { %v1071_v62 = vld [vmem:[#allocation3 + $0x1400] sm:$0xff]  ;;  %1312 = vmatpush.msrb.mxu0 %v943_v61  ;;  %1352 = vmatpush.msrb.mxu2 %v432_v63  ;;  %v752_v35 = vld [vmem:[#allocation3 + $0xa08] sm:$0xff] }
  0x86   : > { %v3110_v1 = vld [vmem:[%s3107_s10] sm:$0xff]  ;;  %v3113_v2 = vld [vmem:[%s3107_s10 + $0x8] sm:$0xff]  ;;  %1332 = vmatpush.msrb.mxu1 %v1071_v62  ;;  %1372 = vmatpush.msrb.mxu3 %v560_v0 }
  0x87   : > { %1233 = vmatmul.f32.vlgmr.msra.gmra.mxu0 %v3110_v1  ;;  %1253 = vmatmul.f32.vlgmr.msra.gmra.mxu1 %v3113_v2  ;;  %v3126_v25 = vld [vmem:[%s3107_s10 + $0x20] sm:$0xff]  ;;  %v3129_v30 = vld [vmem:[%s3107_s10 + $0x28] sm:$0xff] }
  0x88   : > { %1273 = vmatmul.f32.vlgmr.msra.gmra.mxu2 %v3116_v3  ;;  %1293 = vmatmul.f32.vlgmr.msra.gmra.mxu3 %v3119_v4  ;;  %v880_v36 = vld [vmem:[#allocation3 + $0xe08] sm:$0xff] }
  0x89   : > { %1377 = vmatpush.msra.mxu0 %v808_v5  ;;  %1397 = vmatpush.msra.mxu1 %v936_v6  ;;  %v1008_v37 = vld [vmem:[#allocation3 + $0x1208] sm:$0xff] }
  0x8a   : > { %1417 = vmatpush.msra.mxu2 %v1064_v7  ;;  %1437 = vmatpush.msra.mxu3 %v1192_v8  ;;  %v1136_v38 = vld [vmem:[#allocation3 + $0x1608] sm:$0xff] }
  0x8b   : > { %1378 = vmatpush.msra.mxu0 %v800_v9  ;;  %1398 = vmatpush.msra.mxu1 %v928_v10  ;;  %v744_v39 = vld [vmem:[#allocation3 + $0x9c8] sm:$0xff] }
  0x8c   : > { %1418 = vmatpush.msra.mxu2 %v1056_v11  ;;  %1438 = vmatpush.msra.mxu3 %v1184_v12  ;;  %v872_v40 = vld [vmem:[#allocation3 + $0xdc8] sm:$0xff]  ;;  %v553_v11 = vld [vmem:[#allocation3 + $0x3d0] sm:$0xff] }
  0x8d   : > { %1379 = vmatpush.msra.mxu0 %v792_v13  ;;  %1399 = vmatpush.msra.mxu1 %v920_v14  ;;  %v1000_v41 = vld [vmem:[#allocation3 + $0x11c8] sm:$0xff]  ;;  %v681_v12 = vld [vmem:[#allocation3 + $0x7d0] sm:$0xff] }
  0x8e   : > { %1419 = vmatpush.msra.mxu2 %v1048_v15  ;;  %1439 = vmatpush.msra.mxu3 %v1176_v16  ;;  %v1128_v42 = vld [vmem:[#allocation3 + $0x15c8] sm:$0xff]  ;;  %v809_v13 = vld [vmem:[#allocation3 + $0xbd0] sm:$0xff] }
  0x8f   : > { %1380 = vmatpush.msra.mxu0 %v784_v17  ;;  %1400 = vmatpush.msra.mxu1 %v912_v18  ;;  %v736_v43 = vld [vmem:[#allocation3 + $0x988] sm:$0xff]  ;;  %v937_v14 = vld [vmem:[#allocation3 + $0xfd0] sm:$0xff] }
  0x90   : > { %1420 = vmatpush.msra.mxu2 %v1040_v19  ;;  %1440 = vmatpush.msra.mxu3 %v1168_v20  ;;  %v864_v44 = vld [vmem:[#allocation3 + $0xd88] sm:$0xff]  ;;  %v545_v15 = vld [vmem:[#allocation3 + $0x390] sm:$0xff] }
  0x91   : > { %1381 = vmatpush.msra.mxu0 %v776_v21  ;;  %1401 = vmatpush.msra.mxu1 %v904_v22  ;;  %v992_v45 = vld [vmem:[#allocation3 + $0x1188] sm:$0xff]  ;;  %v673_v16 = vld [vmem:[#allocation3 + $0x790] sm:$0xff] }
  0x92   : > { %1421 = vmatpush.msra.mxu2 %v1032_v23  ;;  %1441 = vmatpush.msra.mxu3 %v1160_v24  ;;  %v1120_v46 = vld [vmem:[#allocation3 + $0x1588] sm:$0xff]  ;;  %v801_v17 = vld [vmem:[#allocation3 + $0xb90] sm:$0xff] }
  0x93   : > { %1313 = vmatmul.f32.vlgmr.msrb.gmra.mxu0 %v3126_v25  ;;  %1402 = vmatpush.msra.mxu1 %v896_v26  ;;  %v728_v47 = vld [vmem:[#allocation3 + $0x948] sm:$0xff]  ;;  %v929_v18 = vld [vmem:[#allocation3 + $0xf90] sm:$0xff] }
  0x94   : > { %1382 = vmatpush.msra.mxu0 %v768_v27  ;;  %1422 = vmatpush.msra.mxu2 %v1024_v28  ;;  %v856_v48 = vld [vmem:[#allocation3 + $0xd48] sm:$0xff]  ;;  %v537_v19 = vld [vmem:[#allocation3 + $0x350] sm:$0xff] }
  0x95   : > { %1442 = vmatpush.msra.mxu3 %v1152_v29  ;;  %1333 = vmatmul.f32.vlgmr.msrb.gmra.mxu1 %v3129_v30  ;;  %v984_v49 = vld [vmem:[#allocation3 + $0x1148] sm:$0xff]  ;;  %v665_v20 = vld [vmem:[#allocation3 + $0x750] sm:$0xff] }
  0x96   : > { %1383 = vmatpush.msra.mxu0 %v760_v31  ;;  %1403 = vmatpush.msra.mxu1 %v888_v32  ;;  %v1112_v50 = vld [vmem:[#allocation3 + $0x1548] sm:$0xff]  ;;  %v793_v21 = vld [vmem:[#allocation3 + $0xb50] sm:$0xff] }
  0x97   : > { %1423 = vmatpush.msra.mxu2 %v1016_v33  ;;  %1443 = vmatpush.msra.mxu3 %v1144_v34  ;;  %v720_v51 = vld [vmem:[#allocation3 + $0x908] sm:$0xff]  ;;  %v921_v22 = vld [vmem:[#allocation3 + $0xf50] sm:$0xff] }
  0x98   : > { %1384 = vmatpush.msra.mxu0 %v752_v35  ;;  %1404 = vmatpush.msra.mxu1 %v880_v36  ;;  %v848_v52 = vld [vmem:[#allocation3 + $0xd08] sm:$0xff]  ;;  %v529_v23 = vld [vmem:[#allocation3 + $0x310] sm:$0xff] }
  0x99   : > { %1424 = vmatpush.msra.mxu2 %v1008_v37  ;;  %1444 = vmatpush.msra.mxu3 %v1136_v38  ;;  %v976_v53 = vld [vmem:[#allocation3 + $0x1108] sm:$0xff]  ;;  %v657_v24 = vld [vmem:[#allocation3 + $0x710] sm:$0xff] }
  0x9a   : > { %1385 = vmatpush.msra.mxu0 %v744_v39  ;;  %1405 = vmatpush.msra.mxu1 %v872_v40  ;;  %v1104_v54 = vld [vmem:[#allocation3 + $0x1508] sm:$0xff]  ;;  %v785_v26 = vld [vmem:[#allocation3 + $0xb10] sm:$0xff] }
  0x9b   : > { %1425 = vmatpush.msra.mxu2 %v1000_v41  ;;  %1445 = vmatpush.msra.mxu3 %v1128_v42  ;;  %v712_v55 = vld [vmem:[#allocation3 + $0x8c8] sm:$0xff]  ;;  %v913_v27 = vld [vmem:[#allocation3 + $0xf10] sm:$0xff] }
  0x9c   : > { %1386 = vmatpush.msra.mxu0 %v736_v43  ;;  %1406 = vmatpush.msra.mxu1 %v864_v44  ;;  %v840_v56 = vld [vmem:[#allocation3 + $0xcc8] sm:$0xff]  ;;  %v521_v28 = vld [vmem:[#allocation3 + $0x2d0] sm:$0xff] }
  0x9d   : > { %1426 = vmatpush.msra.mxu2 %v992_v45  ;;  %1446 = vmatpush.msra.mxu3 %v1120_v46  ;;  %v968_v57 = vld [vmem:[#allocation3 + $0x10c8] sm:$0xff]  ;;  %v649_v29 = vld [vmem:[#allocation3 + $0x6d0] sm:$0xff] }
  0x9e   : > { %1387 = vmatpush.msra.mxu0 %v728_v47  ;;  %1407 = vmatpush.msra.mxu1 %v856_v48  ;;  %v1096_v58 = vld [vmem:[#allocation3 + $0x14c8] sm:$0xff]  ;;  %v777_v31 = vld [vmem:[#allocation3 + $0xad0] sm:$0xff] }
  0x9f   : > { %1427 = vmatpush.msra.mxu2 %v984_v49  ;;  %1447 = vmatpush.msra.mxu3 %v1112_v50  ;;  %v704_v59 = vld [vmem:[#allocation3 + $0x888] sm:$0xff]  ;;  %v905_v32 = vld [vmem:[#allocation3 + $0xed0] sm:$0xff] }
  0xa0   : > { %1388 = vmatpush.msra.mxu0 %v720_v51  ;;  %1408 = vmatpush.msra.mxu1 %v848_v52  ;;  %v832_v60 = vld [vmem:[#allocation3 + $0xc88] sm:$0xff]  ;;  %v513_v33 = vld [vmem:[#allocation3 + $0x290] sm:$0xff] }
  0xa1   : > { %1428 = vmatpush.msra.mxu2 %v976_v53  ;;  %1448 = vmatpush.msra.mxu3 %v1104_v54  ;;  %v960_v61 = vld [vmem:[#allocation3 + $0x1088] sm:$0xff]  ;;  %v641_v34 = vld [vmem:[#allocation3 + $0x690] sm:$0xff] }
  0xa2   : > { %1389 = vmatpush.msra.mxu0 %v712_v55  ;;  %1409 = vmatpush.msra.mxu1 %v840_v56  ;;  %v1088_v62 = vld [vmem:[#allocation3 + $0x1488] sm:$0xff]  ;;  %v769_v35 = vld [vmem:[#allocation3 + $0xa90] sm:$0xff] }
  0xa3   : > { %1429 = vmatpush.msra.mxu2 %v968_v57  ;;  %1449 = vmatpush.msra.mxu3 %v1096_v58  ;;  %v696_v63 = vld [vmem:[#allocation3 + $0x848] sm:$0xff]  ;;  %v897_v36 = vld [vmem:[#allocation3 + $0xe90] sm:$0xff] }
  0xa4   : > { %v824_v0 = vld [vmem:[#allocation3 + $0xc48] sm:$0xff]  ;;  %1390 = vmatpush.msra.mxu0 %v704_v59  ;;  %1410 = vmatpush.msra.mxu1 %v832_v60  ;;  %v505_v37 = vld [vmem:[#allocation3 + $0x250] sm:$0xff] }
  0xa5   : > { %v952_v5 = vld [vmem:[#allocation3 + $0x1048] sm:$0xff]  ;;  %1430 = vmatpush.msra.mxu2 %v960_v61  ;;  %1450 = vmatpush.msra.mxu3 %v1088_v62  ;;  %v633_v38 = vld [vmem:[#allocation3 + $0x650] sm:$0xff] }
  0xa6   : > { %v1080_v6 = vld [vmem:[#allocation3 + $0x1448] sm:$0xff]  ;;  %1391 = vmatpush.msra.mxu0 %v696_v63  ;;  %1411 = vmatpush.msra.mxu1 %v824_v0  ;;  %v761_v39 = vld [vmem:[#allocation3 + $0xa50] sm:$0xff] }
  0xa7   : > { %v688_v7 = vld [vmem:[#allocation3 + $0x808] sm:$0xff]  ;;  %1431 = vmatpush.msra.mxu2 %v952_v5  ;;  %1451 = vmatpush.msra.mxu3 %v1080_v6  ;;  %v889_v40 = vld [vmem:[#allocation3 + $0xe50] sm:$0xff] }
  0xa8   : > { %v816_v8 = vld [vmem:[#allocation3 + $0xc08] sm:$0xff]  ;;  %1392 = vmatpush.msra.mxu0 %v688_v7  ;;  %1353 = vmatmul.f32.vlgmr.msrb.gmra.mxu2 %v3110_v1  ;;  %v497_v41 = vld [vmem:[#allocation3 + $0x210] sm:$0xff] }
  0xa9   : > { %v944_v9 = vld [vmem:[#allocation3 + $0x1008] sm:$0xff]  ;;  %1412 = vmatpush.msra.mxu1 %v816_v8  ;;  %1373 = vmatmul.f32.vlgmr.msrb.gmra.mxu3 %v3113_v2  ;;  %v625_v42 = vld [vmem:[#allocation3 + $0x610] sm:$0xff] }
  0xaa   : > { %v1072_v10 = vld [vmem:[#allocation3 + $0x1408] sm:$0xff]  ;;  %1432 = vmatpush.msra.mxu2 %v944_v9  ;;  %1457 = vmatpush.msrb.mxu0 %v553_v11  ;;  %v753_v43 = vld [vmem:[#allocation3 + $0xa10] sm:$0xff] }
  0xab   : > { %1452 = vmatpush.msra.mxu3 %v1072_v10  ;;  %1477 = vmatpush.msrb.mxu1 %v681_v12  ;;  %v881_v44 = vld [vmem:[#allocation3 + $0xe10] sm:$0xff] }
  0xac   : > { %1497 = vmatpush.msrb.mxu2 %v809_v13  ;;  %1458 = vmatpush.msrb.mxu0 %v545_v15  ;;  %v489_v45 = vld [vmem:[#allocation3 + $0x1d0] sm:$0xff] }
  0xad   : > { %1517 = vmatpush.msrb.mxu3 %v937_v14  ;;  %1478 = vmatpush.msrb.mxu1 %v673_v16  ;;  %v617_v46 = vld [vmem:[#allocation3 + $0x5d0] sm:$0xff] }
  0xae   : > { %1498 = vmatpush.msrb.mxu2 %v801_v17  ;;  %1459 = vmatpush.msrb.mxu0 %v537_v19  ;;  %v745_v47 = vld [vmem:[#allocation3 + $0x9d0] sm:$0xff]  ;;  %v554_v19 = vld [vmem:[#allocation3 + $0x3d8] sm:$0xff] }
  0xaf   : > { %1518 = vmatpush.msrb.mxu3 %v929_v18  ;;  %1479 = vmatpush.msrb.mxu1 %v665_v20  ;;  %v873_v48 = vld [vmem:[#allocation3 + $0xdd0] sm:$0xff]  ;;  %v682_v20 = vld [vmem:[#allocation3 + $0x7d8] sm:$0xff] }
  0xb0   : > { %1499 = vmatpush.msrb.mxu2 %v793_v21  ;;  %1460 = vmatpush.msrb.mxu0 %v529_v23  ;;  %v481_v49 = vld [vmem:[#allocation3 + $0x190] sm:$0xff]  ;;  %v546_v23 = vld [vmem:[#allocation3 + $0x398] sm:$0xff] }
  0xb1   : > { %1519 = vmatpush.msrb.mxu3 %v921_v22  ;;  %1480 = vmatpush.msrb.mxu1 %v657_v24  ;;  %v609_v50 = vld [vmem:[#allocation3 + $0x590] sm:$0xff]  ;;  %v674_v24 = vld [vmem:[#allocation3 + $0x798] sm:$0xff] }
  0xb2   : > { %1500 = vmatpush.msrb.mxu2 %v785_v26  ;;  %1461 = vmatpush.msrb.mxu0 %v521_v28  ;;  %v737_v51 = vld [vmem:[#allocation3 + $0x990] sm:$0xff]  ;;  %v538_v28 = vld [vmem:[#allocation3 + $0x358] sm:$0xff] }
  0xb3   : > { %1520 = vmatpush.msrb.mxu3 %v913_v27  ;;  %1433 = vmatmul.f32.vlgmr.msra.gmra.mxu2 %v3126_v25  ;;  %v865_v52 = vld [vmem:[#allocation3 + $0xd90] sm:$0xff] }
  0xb4   : > { %1481 = vmatpush.msrb.mxu1 %v649_v29  ;;  %1501 = vmatpush.msrb.mxu2 %v777_v31  ;;  %v473_v53 = vld [vmem:[#allocation3 + $0x150] sm:$0xff]  ;;  %v666_v29 = vld [vmem:[#allocation3 + $0x758] sm:$0xff] }
  0xb5   : > { %1521 = vmatpush.msrb.mxu3 %v905_v32  ;;  %1393 = vmatmul.f32.vlgmr.msra.gmra.mxu0 %v3116_v3  ;;  %v601_v54 = vld [vmem:[#allocation3 + $0x550] sm:$0xff] }
  0xb6   : > { %1453 = vmatmul.f32.vlgmr.msra.gmra.mxu3 %v3129_v30  ;;  %1462 = vmatpush.msrb.mxu0 %v513_v33  ;;  %v729_v55 = vld [vmem:[#allocation3 + $0x950] sm:$0xff]  ;;  %v530_v33 = vld [vmem:[#allocation3 + $0x318] sm:$0xff] }
  0xb7   : > { %1482 = vmatpush.msrb.mxu1 %v641_v34  ;;  %1502 = vmatpush.msrb.mxu2 %v769_v35  ;;  %v857_v56 = vld [vmem:[#allocation3 + $0xd50] sm:$0xff]  ;;  %v658_v34 = vld [vmem:[#allocation3 + $0x718] sm:$0xff] }
  0xb8   : > { %1522 = vmatpush.msrb.mxu3 %v897_v36  ;;  %1413 = vmatmul.f32.vlgmr.msra.gmra.mxu1 %v3119_v4  ;;  %v465_v57 = vld [vmem:[#allocation3 + $0x110] sm:$0xff] }
  0xb9   : > { %1463 = vmatpush.msrb.mxu0 %v505_v37  ;;  %1483 = vmatpush.msrb.mxu1 %v633_v38  ;;  %v593_v58 = vld [vmem:[#allocation3 + $0x510] sm:$0xff]  ;;  %v522_v37 = vld [vmem:[#allocation3 + $0x2d8] sm:$0xff] }
  0xba   : > { %1503 = vmatpush.msrb.mxu2 %v761_v39  ;;  %1523 = vmatpush.msrb.mxu3 %v889_v40  ;;  %v721_v59 = vld [vmem:[#allocation3 + $0x910] sm:$0xff]  ;;  %v650_v38 = vld [vmem:[#allocation3 + $0x6d8] sm:$0xff] }
  0xbb   : > { %1464 = vmatpush.msrb.mxu0 %v497_v41  ;;  %1484 = vmatpush.msrb.mxu1 %v625_v42  ;;  %v849_v60 = vld [vmem:[#allocation3 + $0xd10] sm:$0xff]  ;;  %v514_v41 = vld [vmem:[#allocation3 + $0x298] sm:$0xff] }
  0xbc   : > { %1504 = vmatpush.msrb.mxu2 %v753_v43  ;;  %1524 = vmatpush.msrb.mxu3 %v881_v44  ;;  %v457_v61 = vld [vmem:[#allocation3 + $0xd0] sm:$0xff]  ;;  %v642_v42 = vld [vmem:[#allocation3 + $0x698] sm:$0xff] }
  0xbd   : > { %1465 = vmatpush.msrb.mxu0 %v489_v45  ;;  %1485 = vmatpush.msrb.mxu1 %v617_v46  ;;  %v585_v62 = vld [vmem:[#allocation3 + $0x4d0] sm:$0xff]  ;;  %v506_v45 = vld [vmem:[#allocation3 + $0x258] sm:$0xff] }
  0xbe   : > { %1505 = vmatpush.msrb.mxu2 %v745_v47  ;;  %1525 = vmatpush.msrb.mxu3 %v873_v48  ;;  %v713_v63 = vld [vmem:[#allocation3 + $0x8d0] sm:$0xff]  ;;  %v634_v46 = vld [vmem:[#allocation3 + $0x658] sm:$0xff] }
  0xbf   : > { %1466 = vmatpush.msrb.mxu0 %v481_v49  ;;  %1486 = vmatpush.msrb.mxu1 %v609_v50  ;;  %v841_v0 = vld [vmem:[#allocation3 + $0xcd0] sm:$0xff]  ;;  %v498_v49 = vld [vmem:[#allocation3 + $0x218] sm:$0xff] }
  0xc0   : > { %1506 = vmatpush.msrb.mxu2 %v737_v51  ;;  %1526 = vmatpush.msrb.mxu3 %v865_v52  ;;  %v449_v5 = vld [vmem:[#allocation3 + $0x90] sm:$0xff]  ;;  %v626_v50 = vld [vmem:[#allocation3 + $0x618] sm:$0xff] }
  0xc1   : > { %1467 = vmatpush.msrb.mxu0 %v473_v53  ;;  %1487 = vmatpush.msrb.mxu1 %v601_v54  ;;  %v577_v6 = vld [vmem:[#allocation3 + $0x490] sm:$0xff]  ;;  %v490_v53 = vld [vmem:[#allocation3 + $0x1d8] sm:$0xff] }
  0xc2   : > { %1507 = vmatpush.msrb.mxu2 %v729_v55  ;;  %1527 = vmatpush.msrb.mxu3 %v857_v56  ;;  %v705_v7 = vld [vmem:[#allocation3 + $0x890] sm:$0xff]  ;;  %v618_v54 = vld [vmem:[#allocation3 + $0x5d8] sm:$0xff] }
  0xc3   : > { %1468 = vmatpush.msrb.mxu0 %v465_v57  ;;  %1488 = vmatpush.msrb.mxu1 %v593_v58  ;;  %v833_v8 = vld [vmem:[#allocation3 + $0xc90] sm:$0xff]  ;;  %v482_v57 = vld [vmem:[#allocation3 + $0x198] sm:$0xff] }
  0xc4   : > { %1508 = vmatpush.msrb.mxu2 %v721_v59  ;;  %1528 = vmatpush.msrb.mxu3 %v849_v60  ;;  %v441_v9 = vld [vmem:[#allocation3 + $0x50] sm:$0xff]  ;;  %v610_v58 = vld [vmem:[#allocation3 + $0x598] sm:$0xff] }
  0xc5   : > { %1469 = vmatpush.msrb.mxu0 %v457_v61  ;;  %1489 = vmatpush.msrb.mxu1 %v585_v62  ;;  %v569_v10 = vld [vmem:[#allocation3 + $0x450] sm:$0xff]  ;;  %v474_v61 = vld [vmem:[#allocation3 + $0x158] sm:$0xff] }
  0xc6   : > { %1509 = vmatpush.msrb.mxu2 %v713_v63  ;;  %1529 = vmatpush.msrb.mxu3 %v841_v0  ;;  %v697_v11 = vld [vmem:[#allocation3 + $0x850] sm:$0xff]  ;;  %v602_v62 = vld [vmem:[#allocation3 + $0x558] sm:$0xff] }
  0xc7   : > { %1470 = vmatpush.msrb.mxu0 %v449_v5  ;;  %1490 = vmatpush.msrb.mxu1 %v577_v6  ;;  %v825_v12 = vld [vmem:[#allocation3 + $0xc50] sm:$0xff]  ;;  %v466_v5 = vld [vmem:[#allocation3 + $0x118] sm:$0xff] }
  0xc8   : > { %1510 = vmatpush.msrb.mxu2 %v705_v7  ;;  %1530 = vmatpush.msrb.mxu3 %v833_v8  ;;  %v433_v13 = vld [vmem:[#allocation3 + $0x10] sm:$0xff]  ;;  %v594_v6 = vld [vmem:[#allocation3 + $0x518] sm:$0xff] }
  0xc9   : > { %v561_v14 = vld [vmem:[#allocation3 + $0x410] sm:$0xff]  ;;  %1471 = vmatpush.msrb.mxu0 %v441_v9  ;;  %1491 = vmatpush.msrb.mxu1 %v569_v10  ;;  %v458_v9 = vld [vmem:[#allocation3 + $0xd8] sm:$0xff] }
  0xca   : > { %v689_v15 = vld [vmem:[#allocation3 + $0x810] sm:$0xff]  ;;  %1511 = vmatpush.msrb.mxu2 %v697_v11  ;;  %1531 = vmatpush.msrb.mxu3 %v825_v12  ;;  %v586_v10 = vld [vmem:[#allocation3 + $0x4d8] sm:$0xff] }
  0xcb   : > { %v817_v16 = vld [vmem:[#allocation3 + $0xc10] sm:$0xff]  ;;  %1472 = vmatpush.msrb.mxu0 %v433_v13  ;;  %1492 = vmatpush.msrb.mxu1 %v561_v14  ;;  %v450_v13 = vld [vmem:[#allocation3 + $0x98] sm:$0xff] }
  0xcc   : > { %v1065_v17 = vld [vmem:[#allocation3 + $0x13d0] sm:$0xff]  ;;  %1512 = vmatpush.msrb.mxu2 %v689_v15  ;;  %1532 = vmatpush.msrb.mxu3 %v817_v16  ;;  %v578_v14 = vld [vmem:[#allocation3 + $0x498] sm:$0xff] }
  0xcd   : > { %v1193_v18 = vld [vmem:[#allocation3 + $0x17d0] sm:$0xff]  ;;  %1537 = vmatpush.msra.mxu0 %v1065_v17  ;;  %v442_v17 = vld [vmem:[#allocation3 + $0x58] sm:$0xff]  ;;  %1493 = vmatmul.f32.vlgmr.msrb.gmra.mxu1 %v3113_v2 }
  0xce   : > { %v1057_v21 = vld [vmem:[#allocation3 + $0x1390] sm:$0xff]  ;;  %1557 = vmatpush.msra.mxu1 %v1193_v18  ;;  %1577 = vmatpush.msra.mxu2 %v554_v19  ;;  %v570_v18 = vld [vmem:[#allocation3 + $0x458] sm:$0xff] }
  0xcf   : > { %v1185_v22 = vld [vmem:[#allocation3 + $0x1790] sm:$0xff]  ;;  %1597 = vmatpush.msra.mxu3 %v682_v20  ;;  %1538 = vmatpush.msra.mxu0 %v1057_v21  ;;  %v434_v21 = vld [vmem:[#allocation3 + $0x18] sm:$0xff] }
  0xd0   : > { %v1049_v26 = vld [vmem:[#allocation3 + $0x1350] sm:$0xff]  ;;  %1558 = vmatpush.msra.mxu1 %v1185_v22  ;;  %1578 = vmatpush.msra.mxu2 %v546_v23  ;;  %v562_v22 = vld [vmem:[#allocation3 + $0x418] sm:$0xff] }
  0xd1   : > { %v1177_v27 = vld [vmem:[#allocation3 + $0x1750] sm:$0xff]  ;;  %1598 = vmatpush.msra.mxu3 %v674_v24  ;;  %1539 = vmatpush.msra.mxu0 %v1049_v26  ;;  %v810_v23 = vld [vmem:[#allocation3 + $0xbd8] sm:$0xff] }
  0xd2   : > { %v1041_v31 = vld [vmem:[#allocation3 + $0x1310] sm:$0xff]  ;;  %1559 = vmatpush.msra.mxu1 %v1177_v27  ;;  %1579 = vmatpush.msra.mxu2 %v538_v28  ;;  %v938_v24 = vld [vmem:[#allocation3 + $0xfd8] sm:$0xff] }
  0xd3   : > { %v1169_v32 = vld [vmem:[#allocation3 + $0x1710] sm:$0xff]  ;;  %1599 = vmatpush.msra.mxu3 %v666_v29  ;;  %1540 = vmatpush.msra.mxu0 %v1041_v31  ;;  %v1066_v26 = vld [vmem:[#allocation3 + $0x13d8] sm:$0xff] }
  0xd4   : > { %v1033_v35 = vld [vmem:[#allocation3 + $0x12d0] sm:$0xff]  ;;  %1560 = vmatpush.msra.mxu1 %v1169_v32  ;;  %1580 = vmatpush.msra.mxu2 %v530_v33  ;;  %v1194_v27 = vld [vmem:[#allocation3 + $0x17d8] sm:$0xff] }
  0xd5   : > { %v1161_v36 = vld [vmem:[#allocation3 + $0x16d0] sm:$0xff]  ;;  %1600 = vmatpush.msra.mxu3 %v658_v34  ;;  %1541 = vmatpush.msra.mxu0 %v1033_v35  ;;  %v802_v28 = vld [vmem:[#allocation3 + $0xb98] sm:$0xff] }
  0xd6   : > { %v1025_v39 = vld [vmem:[#allocation3 + $0x1290] sm:$0xff]  ;;  %1561 = vmatpush.msra.mxu1 %v1161_v36  ;;  %1581 = vmatpush.msra.mxu2 %v522_v37  ;;  %v930_v29 = vld [vmem:[#allocation3 + $0xf98] sm:$0xff] }
  0xd7   : > { %v1153_v40 = vld [vmem:[#allocation3 + $0x1690] sm:$0xff]  ;;  %1601 = vmatpush.msra.mxu3 %v650_v38  ;;  %1542 = vmatpush.msra.mxu0 %v1025_v39  ;;  %v1058_v31 = vld [vmem:[#allocation3 + $0x1398] sm:$0xff] }
  0xd8   : > { %v1017_v43 = vld [vmem:[#allocation3 + $0x1250] sm:$0xff]  ;;  %1562 = vmatpush.msra.mxu1 %v1153_v40  ;;  %1582 = vmatpush.msra.mxu2 %v514_v41  ;;  %v1186_v32 = vld [vmem:[#allocation3 + $0x1798] sm:$0xff] }
  0xd9   : > { %v1145_v44 = vld [vmem:[#allocation3 + $0x1650] sm:$0xff]  ;;  %1602 = vmatpush.msra.mxu3 %v642_v42  ;;  %1543 = vmatpush.msra.mxu0 %v1017_v43  ;;  %v794_v33 = vld [vmem:[#allocation3 + $0xb58] sm:$0xff] }
  0xda   : > { %v1009_v47 = vld [vmem:[#allocation3 + $0x1210] sm:$0xff]  ;;  %1563 = vmatpush.msra.mxu1 %v1145_v44  ;;  %1583 = vmatpush.msra.mxu2 %v506_v45  ;;  %v922_v34 = vld [vmem:[#allocation3 + $0xf58] sm:$0xff] }
  0xdb   : > { %v1137_v48 = vld [vmem:[#allocation3 + $0x1610] sm:$0xff]  ;;  %1603 = vmatpush.msra.mxu3 %v634_v46  ;;  %1544 = vmatpush.msra.mxu0 %v1009_v47  ;;  %v1178_v2 = vld [vmem:[#allocation3 + $0x1758] sm:$0xff] }
  0xdc   : > { %v1001_v51 = vld [vmem:[#allocation3 + $0x11d0] sm:$0xff]  ;;  %1564 = vmatpush.msra.mxu1 %v1137_v48  ;;  %1584 = vmatpush.msra.mxu2 %v498_v49  ;;  %v786_v35 = vld [vmem:[#allocation3 + $0xb18] sm:$0xff] }
  0xdd   : > { %v1129_v52 = vld [vmem:[#allocation3 + $0x15d0] sm:$0xff]  ;;  %1604 = vmatpush.msra.mxu3 %v626_v50  ;;  %1545 = vmatpush.msra.mxu0 %v1001_v51  ;;  %v1170_v36 = vld [vmem:[#allocation3 + $0x1718] sm:$0xff] }
  0xde   : > { %v993_v55 = vld [vmem:[#allocation3 + $0x1190] sm:$0xff]  ;;  %1565 = vmatpush.msra.mxu1 %v1129_v52  ;;  %1585 = vmatpush.msra.mxu2 %v490_v53  ;;  %v778_v37 = vld [vmem:[#allocation3 + $0xad8] sm:$0xff] }
  0xdf   : > { %v1121_v56 = vld [vmem:[#allocation3 + $0x1590] sm:$0xff]  ;;  %1605 = vmatpush.msra.mxu3 %v618_v54  ;;  %1546 = vmatpush.msra.mxu0 %v993_v55  ;;  %v906_v38 = vld [vmem:[#allocation3 + $0xed8] sm:$0xff] }
  0xe0   : > { %v985_v59 = vld [vmem:[#allocation3 + $0x1150] sm:$0xff]  ;;  %1566 = vmatpush.msra.mxu1 %v1121_v56  ;;  %1586 = vmatpush.msra.mxu2 %v482_v57  ;;  %v1034_v39 = vld [vmem:[#allocation3 + $0x12d8] sm:$0xff] }
  0xe1   : > { %v1113_v60 = vld [vmem:[#allocation3 + $0x1550] sm:$0xff]  ;;  %1606 = vmatpush.msra.mxu3 %v610_v58  ;;  %1547 = vmatpush.msra.mxu0 %v985_v59  ;;  %v1162_v40 = vld [vmem:[#allocation3 + $0x16d8] sm:$0xff] }
  0xe2   : > { %v977_v63 = vld [vmem:[#allocation3 + $0x1110] sm:$0xff]  ;;  %1567 = vmatpush.msra.mxu1 %v1113_v60  ;;  %1587 = vmatpush.msra.mxu2 %v474_v61  ;;  %v898_v41 = vld [vmem:[#allocation3 + $0xe98] sm:$0xff] }
  0xe3   : > { %v1105_v0 = vld [vmem:[#allocation3 + $0x1510] sm:$0xff]  ;;  %1607 = vmatpush.msra.mxu3 %v602_v62  ;;  %1548 = vmatpush.msra.mxu0 %v977_v63  ;;  %v770_v42 = vld [vmem:[#allocation3 + $0xa98] sm:$0xff] }
  0xe4   : > { %v969_v7 = vld [vmem:[#allocation3 + $0x10d0] sm:$0xff]  ;;  %1568 = vmatpush.msra.mxu1 %v1105_v0  ;;  %1588 = vmatpush.msra.mxu2 %v466_v5  ;;  %v1026_v43 = vld [vmem:[#allocation3 + $0x1298] sm:$0xff] }
  0xe5   : > { %v1097_v8 = vld [vmem:[#allocation3 + $0x14d0] sm:$0xff]  ;;  %1608 = vmatpush.msra.mxu3 %v594_v6  ;;  %1549 = vmatpush.msra.mxu0 %v969_v7  ;;  %v1154_v44 = vld [vmem:[#allocation3 + $0x1698] sm:$0xff] }
  0xe6   : > { %v961_v11 = vld [vmem:[#allocation3 + $0x1090] sm:$0xff]  ;;  %1569 = vmatpush.msra.mxu1 %v1097_v8  ;;  %1589 = vmatpush.msra.mxu2 %v458_v9  ;;  %v762_v45 = vld [vmem:[#allocation3 + $0xa58] sm:$0xff] }
  0xe7   : > { %v1089_v12 = vld [vmem:[#allocation3 + $0x1490] sm:$0xff]  ;;  %1609 = vmatpush.msra.mxu3 %v586_v10  ;;  %1550 = vmatpush.msra.mxu0 %v961_v11  ;;  %v890_v46 = vld [vmem:[#allocation3 + $0xe58] sm:$0xff] }
  0xe8   : > { %v953_v15 = vld [vmem:[#allocation3 + $0x1050] sm:$0xff]  ;;  %1570 = vmatpush.msra.mxu1 %v1089_v12  ;;  %1590 = vmatpush.msra.mxu2 %v450_v13  ;;  %v1018_v47 = vld [vmem:[#allocation3 + $0x1258] sm:$0xff] }
  0xe9   : > { %v1081_v16 = vld [vmem:[#allocation3 + $0x1450] sm:$0xff]  ;;  %1610 = vmatpush.msra.mxu3 %v578_v14  ;;  %1551 = vmatpush.msra.mxu0 %v953_v15  ;;  %v1146_v48 = vld [vmem:[#allocation3 + $0x1658] sm:$0xff] }
  0xea   : > { %v945_v19 = vld [vmem:[#allocation3 + $0x1010] sm:$0xff]  ;;  %1571 = vmatpush.msra.mxu1 %v1081_v16  ;;  %1591 = vmatpush.msra.mxu2 %v442_v17  ;;  %v754_v49 = vld [vmem:[#allocation3 + $0xa18] sm:$0xff] }
  0xeb   : > { %v1073_v20 = vld [vmem:[#allocation3 + $0x1410] sm:$0xff]  ;;  %1611 = vmatpush.msra.mxu3 %v570_v18  ;;  %1552 = vmatpush.msra.mxu0 %v945_v19  ;;  %v882_v50 = vld [vmem:[#allocation3 + $0xe18] sm:$0xff] }
  0xec   : > { %1572 = vmatpush.msra.mxu1 %v1073_v20  ;;  %1592 = vmatpush.msra.mxu2 %v434_v21  ;;  %v1010_v51 = vld [vmem:[#allocation3 + $0x1218] sm:$0xff] }
  0xed   : > { %1612 = vmatpush.msra.mxu3 %v562_v22  ;;  %1473 = vmatmul.f32.vlgmr.msrb.gmra.mxu0 %v3110_v1  ;;  %v1050_v1 = vld [vmem:[#allocation3 + $0x1358] sm:$0xff] }
  0xee   : > { %1513 = vmatmul.f32.vlgmr.msrb.gmra.mxu2 %v3116_v3  ;;  %1533 = vmatmul.f32.vlgmr.msrb.gmra.mxu3 %v3119_v4  ;;  %v914_v3 = vld [vmem:[#allocation3 + $0xf18] sm:$0xff] }
  0xef   : > { %1617 = vmatpush.msrb.mxu0 %v810_v23  ;;  %1637 = vmatpush.msrb.mxu1 %v938_v24  ;;  %v1042_v4 = vld [vmem:[#allocation3 + $0x1318] sm:$0xff]  ;;  %v555_v23 = vld [vmem:[#allocation3 + $0x3e0] sm:$0xff] }
  0xf0   : > { %1657 = vmatpush.msrb.mxu2 %v1066_v26  ;;  %1677 = vmatpush.msrb.mxu3 %v1194_v27  ;;  %v1138_v52 = vld [vmem:[#allocation3 + $0x1618] sm:$0xff]  ;;  %v683_v24 = vld [vmem:[#allocation3 + $0x7e0] sm:$0xff] }
  0xf1   : > { %1618 = vmatpush.msrb.mxu0 %v802_v28  ;;  %1638 = vmatpush.msrb.mxu1 %v930_v29  ;;  %v746_v53 = vld [vmem:[#allocation3 + $0x9d8] sm:$0xff]  ;;  %v811_v26 = vld [vmem:[#allocation3 + $0xbe0] sm:$0xff] }
  0xf2   : > { %1658 = vmatpush.msrb.mxu2 %v1058_v31  ;;  %1678 = vmatpush.msrb.mxu3 %v1186_v32  ;;  %v1002_v54 = vld [vmem:[#allocation3 + $0x11d8] sm:$0xff]  ;;  %v939_v27 = vld [vmem:[#allocation3 + $0xfe0] sm:$0xff] }
  0xf3   : > { %1619 = vmatpush.msrb.mxu0 %v794_v33  ;;  %1639 = vmatpush.msrb.mxu1 %v922_v34  ;;  %v1130_v55 = vld [vmem:[#allocation3 + $0x15d8] sm:$0xff]  ;;  %v3150_v29 = vld [vmem:[%s3107_s10 + $0x8] sm:$0xff] }
  0xf4   : > { %1659 = vmatpush.msrb.mxu2 %v1050_v1  ;;  %1679 = vmatpush.msrb.mxu3 %v1178_v2  ;;  %v738_v56 = vld [vmem:[#allocation3 + $0x998] sm:$0xff]  ;;  %v547_v31 = vld [vmem:[#allocation3 + $0x3a0] sm:$0xff] }
  0xf5   : > { %1620 = vmatpush.msrb.mxu0 %v786_v35  ;;  %1640 = vmatpush.msrb.mxu1 %v914_v3  ;;  %v866_v57 = vld [vmem:[#allocation3 + $0xd98] sm:$0xff]  ;;  %v675_v32 = vld [vmem:[#allocation3 + $0x7a0] sm:$0xff] }
  0xf6   : > { %1660 = vmatpush.msrb.mxu2 %v1042_v4  ;;  %1680 = vmatpush.msrb.mxu3 %v1170_v36  ;;  %v1122_v58 = vld [vmem:[#allocation3 + $0x1598] sm:$0xff]  ;;  %v803_v33 = vld [vmem:[#allocation3 + $0xba0] sm:$0xff] }
  0xf7   : > { %1621 = vmatpush.msrb.mxu0 %v778_v37  ;;  %1641 = vmatpush.msrb.mxu1 %v906_v38  ;;  %v730_v59 = vld [vmem:[#allocation3 + $0x958] sm:$0xff]  ;;  %v931_v34 = vld [vmem:[#allocation3 + $0xfa0] sm:$0xff] }
  0xf8   : > { %1661 = vmatpush.msrb.mxu2 %v1034_v39  ;;  %1681 = vmatpush.msrb.mxu3 %v1162_v40  ;;  %v858_v60 = vld [vmem:[#allocation3 + $0xd58] sm:$0xff]  ;;  %v539_v1 = vld [vmem:[#allocation3 + $0x360] sm:$0xff] }
  0xf9   : > { %1553 = vmatmul.f32.vlgmr.msra.gmra.mxu0 %v3126_v25  ;;  %1642 = vmatpush.msrb.mxu1 %v898_v41  ;;  %v874_v25 = vld [vmem:[#allocation3 + $0xdd8] sm:$0xff]  ;;  %v667_v2 = vld [vmem:[#allocation3 + $0x760] sm:$0xff] }
  0xfa   : > { %1622 = vmatpush.msrb.mxu0 %v770_v42  ;;  %1662 = vmatpush.msrb.mxu2 %v1026_v43  ;;  %v986_v61 = vld [vmem:[#allocation3 + $0x1158] sm:$0xff]  ;;  %v795_v35 = vld [vmem:[#allocation3 + $0xb60] sm:$0xff] }
  0xfb   : > { %1682 = vmatpush.msrb.mxu3 %v1154_v44  ;;  %1573 = vmatmul.f32.vlgmr.msra.gmra.mxu1 %v3129_v30  ;;  %v994_v30 = vld [vmem:[#allocation3 + $0x1198] sm:$0xff]  ;;  %v923_v3 = vld [vmem:[#allocation3 + $0xf60] sm:$0xff] }
  0xfc   : > { %1623 = vmatpush.msrb.mxu0 %v762_v45  ;;  %1643 = vmatpush.msrb.mxu1 %v890_v46  ;;  %v1114_v62 = vld [vmem:[#allocation3 + $0x1558] sm:$0xff]  ;;  %v531_v4 = vld [vmem:[#allocation3 + $0x320] sm:$0xff] }
  0xfd   : > { %1663 = vmatpush.msrb.mxu2 %v1018_v47  ;;  %1683 = vmatpush.msrb.mxu3 %v1146_v48  ;;  %v722_v63 = vld [vmem:[#allocation3 + $0x918] sm:$0xff]  ;;  %v659_v36 = vld [vmem:[#allocation3 + $0x720] sm:$0xff]  ;;  %v3158_v47 = vld [vmem:[%s3107_s10 + $0x10] sm:$0xff] }
  0xfe   : > { %1624 = vmatpush.msrb.mxu0 %v754_v49  ;;  %1644 = vmatpush.msrb.mxu1 %v882_v50  ;;  %v850_v0 = vld [vmem:[#allocation3 + $0xd18] sm:$0xff]  ;;  %v787_v37 = vld [vmem:[#allocation3 + $0xb20] sm:$0xff] }
  0xff   : > { %1664 = vmatpush.msrb.mxu2 %v1010_v51  ;;  %1684 = vmatpush.msrb.mxu3 %v1138_v52  ;;  %v978_v5 = vld [vmem:[#allocation3 + $0x1118] sm:$0xff]  ;;  %v915_v38 = vld [vmem:[#allocation3 + $0xf20] sm:$0xff] }
 0x100   : > { %1625 = vmatpush.msrb.mxu0 %v746_v53  ;;  %1645 = vmatpush.msrb.mxu1 %v874_v25  ;;  %v1106_v6 = vld [vmem:[#allocation3 + $0x1518] sm:$0xff]  ;;  %v523_v39 = vld [vmem:[#allocation3 + $0x2e0] sm:$0xff] }
 0x101   : > { %1665 = vmatpush.msrb.mxu2 %v1002_v54  ;;  %1685 = vmatpush.msrb.mxu3 %v1130_v55  ;;  %v714_v7 = vld [vmem:[#allocation3 + $0x8d8] sm:$0xff]  ;;  %v651_v40 = vld [vmem:[#allocation3 + $0x6e0] sm:$0xff] }
 0x102   : > { %1626 = vmatpush.msrb.mxu0 %v738_v56  ;;  %1646 = vmatpush.msrb.mxu1 %v866_v57  ;;  %v842_v8 = vld [vmem:[#allocation3 + $0xcd8] sm:$0xff]  ;;  %v779_v41 = vld [vmem:[#allocation3 + $0xae0] sm:$0xff] }
 0x103   : > { %1666 = vmatpush.msrb.mxu2 %v994_v30  ;;  %1686 = vmatpush.msrb.mxu3 %v1122_v58  ;;  %v970_v9 = vld [vmem:[#allocation3 + $0x10d8] sm:$0xff]  ;;  %v907_v42 = vld [vmem:[#allocation3 + $0xee0] sm:$0xff] }
 0x104   : > { %1627 = vmatpush.msrb.mxu0 %v730_v59  ;;  %1647 = vmatpush.msrb.mxu1 %v858_v60  ;;  %v1098_v10 = vld [vmem:[#allocation3 + $0x14d8] sm:$0xff]  ;;  %v515_v44 = vld [vmem:[#allocation3 + $0x2a0] sm:$0xff] }
 0x105   : > { %1667 = vmatpush.msrb.mxu2 %v986_v61  ;;  %1687 = vmatpush.msrb.mxu3 %v1114_v62  ;;  %v706_v11 = vld [vmem:[#allocation3 + $0x898] sm:$0xff]  ;;  %v643_v45 = vld [vmem:[#allocation3 + $0x6a0] sm:$0xff] }
 0x106   : > { %1628 = vmatpush.msrb.mxu0 %v722_v63  ;;  %1648 = vmatpush.msrb.mxu1 %v850_v0  ;;  %v834_v12 = vld [vmem:[#allocation3 + $0xc98] sm:$0xff]  ;;  %v771_v46 = vld [vmem:[#allocation3 + $0xaa0] sm:$0xff] }
 0x107   : > { %1668 = vmatpush.msrb.mxu2 %v978_v5  ;;  %1688 = vmatpush.msrb.mxu3 %v1106_v6  ;;  %v962_v13 = vld [vmem:[#allocation3 + $0x1098] sm:$0xff]  ;;  %v899_v48 = vld [vmem:[#allocation3 + $0xea0] sm:$0xff] }
 0x108   : > { %1629 = vmatpush.msrb.mxu0 %v714_v7  ;;  %1649 = vmatpush.msrb.mxu1 %v842_v8  ;;  %v1090_v14 = vld [vmem:[#allocation3 + $0x1498] sm:$0xff]  ;;  %v3162_v49 = vld [vmem:[%s3107_s10 + $0x28] sm:$0xff] }
 0x109   : > { %1669 = vmatpush.msrb.mxu2 %v970_v9  ;;  %1689 = vmatpush.msrb.mxu3 %v1098_v10  ;;  %v698_v15 = vld [vmem:[#allocation3 + $0x858] sm:$0xff]  ;;  %v507_v50 = vld [vmem:[#allocation3 + $0x260] sm:$0xff] }
 0x10a   : > { %v826_v16 = vld [vmem:[#allocation3 + $0xc58] sm:$0xff]  ;;  %1630 = vmatpush.msrb.mxu0 %v706_v11  ;;  %1650 = vmatpush.msrb.mxu1 %v834_v12  ;;  %v635_v51 = vld [vmem:[#allocation3 + $0x660] sm:$0xff] }
 0x10b   : > { %v954_v17 = vld [vmem:[#allocation3 + $0x1058] sm:$0xff]  ;;  %1670 = vmatpush.msrb.mxu2 %v962_v13  ;;  %1690 = vmatpush.msrb.mxu3 %v1090_v14  ;;  %v763_v52 = vld [vmem:[#allocation3 + $0xa60] sm:$0xff] }
 0x10c   : > { %v1082_v18 = vld [vmem:[#allocation3 + $0x1458] sm:$0xff]  ;;  %1631 = vmatpush.msrb.mxu0 %v698_v15  ;;  %1651 = vmatpush.msrb.mxu1 %v826_v16  ;;  %v891_v53 = vld [vmem:[#allocation3 + $0xe60] sm:$0xff] }
 0x10d   : > { %v690_v19 = vld [vmem:[#allocation3 + $0x818] sm:$0xff]  ;;  %1671 = vmatpush.msrb.mxu2 %v954_v17  ;;  %1691 = vmatpush.msrb.mxu3 %v1082_v18  ;;  %v499_v54 = vld [vmem:[#allocation3 + $0x220] sm:$0xff] }
 0x10e   : > { %v818_v20 = vld [vmem:[#allocation3 + $0xc18] sm:$0xff]  ;;  %1632 = vmatpush.msrb.mxu0 %v690_v19  ;;  %1613 = vmatmul.f32.vlgmr.msra.gmra.mxu3 %v3150_v29  ;;  %v627_v55 = vld [vmem:[#allocation3 + $0x620] sm:$0xff] }
 0x10f   : > { %v946_v21 = vld [vmem:[#allocation3 + $0x1018] sm:$0xff]  ;;  %1652 = vmatpush.msrb.mxu1 %v818_v20  ;;  %1633 = vmatmul.f32.vlgmr.msrb.gmra.mxu0 %v3158_v47  ;;  %v755_v56 = vld [vmem:[#allocation3 + $0xa20] sm:$0xff] }
 0x110   : > { %v1074_v22 = vld [vmem:[#allocation3 + $0x1418] sm:$0xff]  ;;  %1672 = vmatpush.msrb.mxu2 %v946_v21  ;;  %1697 = vmatpush.msra.mxu0 %v555_v23  ;;  %v883_v57 = vld [vmem:[#allocation3 + $0xe20] sm:$0xff] }
 0x111   : > { %1692 = vmatpush.msrb.mxu3 %v1074_v22  ;;  %v3146_v28 = vld [vmem:[%s3107_s10] sm:$0xff]  ;;  %1717 = vmatpush.msra.mxu1 %v683_v24  ;;  %v3166_v25 = vld [vmem:[%s3107_s10 + $0x18] sm:$0xff] }
 0x112   : > { %1593 = vmatmul.f32.vlgmr.msra.gmra.mxu2 %v3146_v28  ;;  %1698 = vmatpush.msra.mxu0 %v547_v31  ;;  %v3154_v43 = vld [vmem:[%s3107_s10 + $0x20] sm:$0xff] }
 0x113   : > { %1737 = vmatpush.msra.mxu2 %v811_v26  ;;  %1757 = vmatpush.msra.mxu3 %v939_v27  ;;  %v491_v30 = vld [vmem:[#allocation3 + $0x1e0] sm:$0xff] }
 0x114   : > { %1718 = vmatpush.msra.mxu1 %v675_v32  ;;  %1699 = vmatpush.msra.mxu0 %v539_v1  ;;  %v619_v58 = vld [vmem:[#allocation3 + $0x5e0] sm:$0xff]  ;;  %v556_v1 = vld [vmem:[#allocation3 + $0x3e8] sm:$0xff] }
 0x115   : > { %1738 = vmatpush.msra.mxu2 %v803_v33  ;;  %1758 = vmatpush.msra.mxu3 %v931_v34  ;;  %v747_v59 = vld [vmem:[#allocation3 + $0x9e0] sm:$0xff] }
 0x116   : > { %1719 = vmatpush.msra.mxu1 %v667_v2  ;;  %1700 = vmatpush.msra.mxu0 %v531_v4  ;;  %v875_v60 = vld [vmem:[#allocation3 + $0xde0] sm:$0xff]  ;;  %v684_v2 = vld [vmem:[#allocation3 + $0x7e8] sm:$0xff] }
 0x117   : > { %1739 = vmatpush.msra.mxu2 %v795_v35  ;;  %1759 = vmatpush.msra.mxu3 %v923_v3  ;;  %v483_v61 = vld [vmem:[#allocation3 + $0x1a0] sm:$0xff]  ;;  %v548_v4 = vld [vmem:[#allocation3 + $0x3a8] sm:$0xff] }
 0x118   : > { %1720 = vmatpush.msra.mxu1 %v659_v36  ;;  %1701 = vmatpush.msra.mxu0 %v523_v39  ;;  %v611_v62 = vld [vmem:[#allocation3 + $0x5a0] sm:$0xff]  ;;  %v676_v36 = vld [vmem:[#allocation3 + $0x7a8] sm:$0xff] }
 0x119   : > { %1740 = vmatpush.msra.mxu2 %v787_v37  ;;  %1760 = vmatpush.msra.mxu3 %v915_v38  ;;  %v739_v63 = vld [vmem:[#allocation3 + $0x9a0] sm:$0xff]  ;;  %v540_v39 = vld [vmem:[#allocation3 + $0x368] sm:$0xff] }
 0x11a   : > { %1673 = vmatmul.f32.vlgmr.msrb.gmra.mxu2 %v3154_v43  ;;  %1721 = vmatpush.msra.mxu1 %v651_v40  ;;  %v867_v0 = vld [vmem:[#allocation3 + $0xda0] sm:$0xff]  ;;  %v668_v40 = vld [vmem:[#allocation3 + $0x768] sm:$0xff] }
 0x11b   : > { %1741 = vmatpush.msra.mxu2 %v779_v41  ;;  %1761 = vmatpush.msra.mxu3 %v907_v42  ;;  %v475_v5 = vld [vmem:[#allocation3 + $0x160] sm:$0xff] }
 0x11c   : > { %1693 = vmatmul.f32.vlgmr.msrb.gmra.mxu3 %v3162_v49  ;;  %1702 = vmatpush.msra.mxu0 %v515_v44  ;;  %v603_v6 = vld [vmem:[#allocation3 + $0x560] sm:$0xff]  ;;  %v532_v44 = vld [vmem:[#allocation3 + $0x328] sm:$0xff] }
 0x11d   : > { %1722 = vmatpush.msra.mxu1 %v643_v45  ;;  %1742 = vmatpush.msra.mxu2 %v771_v46  ;;  %v731_v7 = vld [vmem:[#allocation3 + $0x960] sm:$0xff]  ;;  %v660_v45 = vld [vmem:[#allocation3 + $0x728] sm:$0xff] }
 0x11e   : > { %1762 = vmatpush.msra.mxu3 %v899_v48  ;;  %1653 = vmatmul.f32.vlgmr.msrb.gmra.mxu1 %v3166_v25  ;;  %v859_v8 = vld [vmem:[#allocation3 + $0xd60] sm:$0xff] }
 0x11f   : > { %1703 = vmatpush.msra.mxu0 %v507_v50  ;;  %1723 = vmatpush.msra.mxu1 %v635_v51  ;;  %v467_v9 = vld [vmem:[#allocation3 + $0x120] sm:$0xff]  ;;  %v524_v50 = vld [vmem:[#allocation3 + $0x2e8] sm:$0xff] }
 0x120   : > { %1743 = vmatpush.msra.mxu2 %v763_v52  ;;  %1763 = vmatpush.msra.mxu3 %v891_v53  ;;  %v595_v10 = vld [vmem:[#allocation3 + $0x520] sm:$0xff]  ;;  %v652_v51 = vld [vmem:[#allocation3 + $0x6e8] sm:$0xff] }
 0x121   : > { %1704 = vmatpush.msra.mxu0 %v499_v54  ;;  %1724 = vmatpush.msra.mxu1 %v627_v55  ;;  %v723_v11 = vld [vmem:[#allocation3 + $0x920] sm:$0xff]  ;;  %v516_v54 = vld [vmem:[#allocation3 + $0x2a8] sm:$0xff] }
 0x122   : > { %1744 = vmatpush.msra.mxu2 %v755_v56  ;;  %1764 = vmatpush.msra.mxu3 %v883_v57  ;;  %v851_v12 = vld [vmem:[#allocation3 + $0xd20] sm:$0xff]  ;;  %v644_v55 = vld [vmem:[#allocation3 + $0x6a8] sm:$0xff] }
 0x123   : > { %1705 = vmatpush.msra.mxu0 %v491_v30  ;;  %1725 = vmatpush.msra.mxu1 %v619_v58  ;;  %v459_v13 = vld [vmem:[#allocation3 + $0xe0] sm:$0xff]  ;;  %v508_v30 = vld [vmem:[#allocation3 + $0x268] sm:$0xff] }
 0x124   : > { %1745 = vmatpush.msra.mxu2 %v747_v59  ;;  %1765 = vmatpush.msra.mxu3 %v875_v60  ;;  %v587_v14 = vld [vmem:[#allocation3 + $0x4e0] sm:$0xff]  ;;  %v636_v58 = vld [vmem:[#allocation3 + $0x668] sm:$0xff] }
 0x125   : > { %1706 = vmatpush.msra.mxu0 %v483_v61  ;;  %1726 = vmatpush.msra.mxu1 %v611_v62  ;;  %v715_v15 = vld [vmem:[#allocation3 + $0x8e0] sm:$0xff]  ;;  %v500_v61 = vld [vmem:[#allocation3 + $0x228] sm:$0xff] }
 0x126   : > { %1746 = vmatpush.msra.mxu2 %v739_v63  ;;  %1766 = vmatpush.msra.mxu3 %v867_v0  ;;  %v843_v16 = vld [vmem:[#allocation3 + $0xce0] sm:$0xff]  ;;  %v628_v62 = vld [vmem:[#allocation3 + $0x628] sm:$0xff] }
 0x127   : > { %1707 = vmatpush.msra.mxu0 %v475_v5  ;;  %1727 = vmatpush.msra.mxu1 %v603_v6  ;;  %v451_v17 = vld [vmem:[#allocation3 + $0xa0] sm:$0xff]  ;;  %v492_v5 = vld [vmem:[#allocation3 + $0x1e8] sm:$0xff] }
 0x128   : > { %1747 = vmatpush.msra.mxu2 %v731_v7  ;;  %1767 = vmatpush.msra.mxu3 %v859_v8  ;;  %v579_v18 = vld [vmem:[#allocation3 + $0x4a0] sm:$0xff]  ;;  %v620_v6 = vld [vmem:[#allocation3 + $0x5e8] sm:$0xff] }
 0x129   : > { %1708 = vmatpush.msra.mxu0 %v467_v9  ;;  %1728 = vmatpush.msra.mxu1 %v595_v10  ;;  %v707_v19 = vld [vmem:[#allocation3 + $0x8a0] sm:$0xff]  ;;  %v484_v9 = vld [vmem:[#allocation3 + $0x1a8] sm:$0xff] }
 0x12a   : > { %1748 = vmatpush.msra.mxu2 %v723_v11  ;;  %1768 = vmatpush.msra.mxu3 %v851_v12  ;;  %v835_v20 = vld [vmem:[#allocation3 + $0xca0] sm:$0xff]  ;;  %v612_v10 = vld [vmem:[#allocation3 + $0x5a8] sm:$0xff] }
 0x12b   : > { %1709 = vmatpush.msra.mxu0 %v459_v13  ;;  %1729 = vmatpush.msra.mxu1 %v587_v14  ;;  %v443_v21 = vld [vmem:[#allocation3 + $0x60] sm:$0xff]  ;;  %v476_v13 = vld [vmem:[#allocation3 + $0x168] sm:$0xff] }
 0x12c   : > { %1749 = vmatpush.msra.mxu2 %v715_v15  ;;  %1769 = vmatpush.msra.mxu3 %v843_v16  ;;  %v571_v22 = vld [vmem:[#allocation3 + $0x460] sm:$0xff]  ;;  %v604_v14 = vld [vmem:[#allocation3 + $0x568] sm:$0xff] }
 0x12d   : > { %1710 = vmatpush.msra.mxu0 %v451_v17  ;;  %1730 = vmatpush.msra.mxu1 %v579_v18  ;;  %v699_v23 = vld [vmem:[#allocation3 + $0x860] sm:$0xff]  ;;  %v468_v17 = vld [vmem:[#allocation3 + $0x128] sm:$0xff] }
 0x12e   : > { %v827_v24 = vld [vmem:[#allocation3 + $0xc60] sm:$0xff]  ;;  %1750 = vmatpush.msra.mxu2 %v707_v19  ;;  %1770 = vmatpush.msra.mxu3 %v835_v20  ;;  %v596_v18 = vld [vmem:[#allocation3 + $0x528] sm:$0xff] }
 0x12f   : > { %v435_v26 = vld [vmem:[#allocation3 + $0x20] sm:$0xff]  ;;  %1711 = vmatpush.msra.mxu0 %v443_v21  ;;  %1731 = vmatpush.msra.mxu1 %v571_v22  ;;  %v460_v21 = vld [vmem:[#allocation3 + $0xe8] sm:$0xff] }
 0x130   : > { %v563_v27 = vld [vmem:[#allocation3 + $0x420] sm:$0xff]  ;;  %1751 = vmatpush.msra.mxu2 %v699_v23  ;;  %1771 = vmatpush.msra.mxu3 %v827_v24  ;;  %v588_v22 = vld [vmem:[#allocation3 + $0x4e8] sm:$0xff] }
 0x131   : > { %v691_v31 = vld [vmem:[#allocation3 + $0x820] sm:$0xff]  ;;  %1712 = vmatpush.msra.mxu0 %v435_v26  ;;  %1732 = vmatpush.msra.mxu1 %v563_v27  ;;  %v452_v26 = vld [vmem:[#allocation3 + $0xa8] sm:$0xff] }
 0x132   : > { %v819_v32 = vld [vmem:[#allocation3 + $0xc20] sm:$0xff]  ;;  %1752 = vmatpush.msra.mxu2 %v691_v31  ;;  %v580_v27 = vld [vmem:[#allocation3 + $0x4a8] sm:$0xff]  ;;  %1713 = vmatmul.f32.vlgmr.msra.gmra.mxu0 %v3146_v28 }
 0x133   : > { %v1067_v33 = vld [vmem:[#allocation3 + $0x13e0] sm:$0xff]  ;;  %1772 = vmatpush.msra.mxu3 %v819_v32  ;;  %1733 = vmatmul.f32.vlgmr.msra.gmra.mxu1 %v3150_v29 }
 0x134   : > { %v1195_v34 = vld [vmem:[#allocation3 + $0x17e0] sm:$0xff]  ;;  %1777 = vmatpush.msrb.mxu0 %v1067_v33  ;;  %1817 = vmatpush.msrb.mxu2 %v556_v1  ;;  %v444_v33 = vld [vmem:[#allocation3 + $0x68] sm:$0xff] }
 0x135   : > { %v1059_v35 = vld [vmem:[#allocation3 + $0x13a0] sm:$0xff]  ;;  %1797 = vmatpush.msrb.mxu1 %v1195_v34  ;;  %1837 = vmatpush.msrb.mxu3 %v684_v2  ;;  %v572_v34 = vld [vmem:[#allocation3 + $0x468] sm:$0xff] }
 0x136   : > { %v1187_v3 = vld [vmem:[#allocation3 + $0x17a0] sm:$0xff]  ;;  %1778 = vmatpush.msrb.mxu0 %v1059_v35  ;;  %1818 = vmatpush.msrb.mxu2 %v548_v4  ;;  %v436_v35 = vld [vmem:[#allocation3 + $0x28] sm:$0xff] }
 0x137   : > { %v1051_v37 = vld [vmem:[#allocation3 + $0x1360] sm:$0xff]  ;;  %1798 = vmatpush.msrb.mxu1 %v1187_v3  ;;  %1838 = vmatpush.msrb.mxu3 %v676_v36  ;;  %v564_v3 = vld [vmem:[#allocation3 + $0x428] sm:$0xff] }
 0x138   : > { %v1179_v38 = vld [vmem:[#allocation3 + $0x1760] sm:$0xff]  ;;  %1779 = vmatpush.msrb.mxu0 %v1051_v37  ;;  %1819 = vmatpush.msrb.mxu2 %v540_v39  ;;  %v812_v4 = vld [vmem:[#allocation3 + $0xbe8] sm:$0xff] }
 0x139   : > { %v1043_v41 = vld [vmem:[#allocation3 + $0x1320] sm:$0xff]  ;;  %1799 = vmatpush.msrb.mxu1 %v1179_v38  ;;  %1839 = vmatpush.msrb.mxu3 %v668_v40  ;;  %v940_v36 = vld [vmem:[#allocation3 + $0xfe8] sm:$0xff] }
 0x13a   : > { %v1171_v42 = vld [vmem:[#allocation3 + $0x1720] sm:$0xff]  ;;  %1780 = vmatpush.msrb.mxu0 %v1043_v41  ;;  %1820 = vmatpush.msrb.mxu2 %v532_v44  ;;  %v1068_v37 = vld [vmem:[#allocation3 + $0x13e8] sm:$0xff] }
 0x13b   : > { %v1035_v46 = vld [vmem:[#allocation3 + $0x12e0] sm:$0xff]  ;;  %1800 = vmatpush.msrb.mxu1 %v1171_v42  ;;  %1840 = vmatpush.msrb.mxu3 %v660_v45  ;;  %v1196_v38 = vld [vmem:[#allocation3 + $0x17e8] sm:$0xff] }
 0x13c   : > { %v1163_v48 = vld [vmem:[#allocation3 + $0x16e0] sm:$0xff]  ;;  %1781 = vmatpush.msrb.mxu0 %v1035_v46  ;;  %1821 = vmatpush.msrb.mxu2 %v524_v50  ;;  %v804_v39 = vld [vmem:[#allocation3 + $0xba8] sm:$0xff] }
 0x13d   : > { %v1027_v52 = vld [vmem:[#allocation3 + $0x12a0] sm:$0xff]  ;;  %1801 = vmatpush.msrb.mxu1 %v1163_v48  ;;  %1841 = vmatpush.msrb.mxu3 %v652_v51  ;;  %v932_v40 = vld [vmem:[#allocation3 + $0xfa8] sm:$0xff] }
 0x13e   : > { %v1155_v53 = vld [vmem:[#allocation3 + $0x16a0] sm:$0xff]  ;;  %1782 = vmatpush.msrb.mxu0 %v1027_v52  ;;  %1822 = vmatpush.msrb.mxu2 %v516_v54  ;;  %v1060_v41 = vld [vmem:[#allocation3 + $0x13a8] sm:$0xff] }
 0x13f   : > { %v1019_v56 = vld [vmem:[#allocation3 + $0x1260] sm:$0xff]  ;;  %1802 = vmatpush.msrb.mxu1 %v1155_v53  ;;  %1842 = vmatpush.msrb.mxu3 %v644_v55  ;;  %v1188_v42 = vld [vmem:[#allocation3 + $0x17a8] sm:$0xff] }
 0x140   : > { %v1147_v57 = vld [vmem:[#allocation3 + $0x1660] sm:$0xff]  ;;  %1783 = vmatpush.msrb.mxu0 %v1019_v56  ;;  %1823 = vmatpush.msrb.mxu2 %v508_v30  ;;  %v796_v44 = vld [vmem:[#allocation3 + $0xb68] sm:$0xff] }
 0x141   : > { %v1011_v59 = vld [vmem:[#allocation3 + $0x1220] sm:$0xff]  ;;  %1803 = vmatpush.msrb.mxu1 %v1147_v57  ;;  %1843 = vmatpush.msrb.mxu3 %v636_v58  ;;  %v924_v45 = vld [vmem:[#allocation3 + $0xf68] sm:$0xff] }
 0x142   : > { %v1139_v60 = vld [vmem:[#allocation3 + $0x1620] sm:$0xff]  ;;  %1784 = vmatpush.msrb.mxu0 %v1011_v59  ;;  %1824 = vmatpush.msrb.mxu2 %v500_v61  ;;  %v1052_v46 = vld [vmem:[#allocation3 + $0x1368] sm:$0xff] }
 0x143   : > { %v1003_v63 = vld [vmem:[#allocation3 + $0x11e0] sm:$0xff]  ;;  %1804 = vmatpush.msrb.mxu1 %v1139_v60  ;;  %1844 = vmatpush.msrb.mxu3 %v628_v62  ;;  %v1180_v48 = vld [vmem:[#allocation3 + $0x1768] sm:$0xff] }
 0x144   : > { %v1131_v0 = vld [vmem:[#allocation3 + $0x15e0] sm:$0xff]  ;;  %1785 = vmatpush.msrb.mxu0 %v1003_v63  ;;  %1825 = vmatpush.msrb.mxu2 %v492_v5  ;;  %v788_v50 = vld [vmem:[#allocation3 + $0xb28] sm:$0xff] }
 0x145   : > { %v995_v7 = vld [vmem:[#allocation3 + $0x11a0] sm:$0xff]  ;;  %1805 = vmatpush.msrb.mxu1 %v1131_v0  ;;  %1845 = vmatpush.msrb.mxu3 %v620_v6  ;;  %v916_v51 = vld [vmem:[#allocation3 + $0xf28] sm:$0xff] }
 0x146   : > { %v1123_v8 = vld [vmem:[#allocation3 + $0x15a0] sm:$0xff]  ;;  %1786 = vmatpush.msrb.mxu0 %v995_v7  ;;  %1826 = vmatpush.msrb.mxu2 %v484_v9  ;;  %v1044_v52 = vld [vmem:[#allocation3 + $0x1328] sm:$0xff] }
 0x147   : > { %v987_v11 = vld [vmem:[#allocation3 + $0x1160] sm:$0xff]  ;;  %1806 = vmatpush.msrb.mxu1 %v1123_v8  ;;  %1846 = vmatpush.msrb.mxu3 %v612_v10  ;;  %v1172_v53 = vld [vmem:[#allocation3 + $0x1728] sm:$0xff] }
 0x148   : > { %v1115_v12 = vld [vmem:[#allocation3 + $0x1560] sm:$0xff]  ;;  %1787 = vmatpush.msrb.mxu0 %v987_v11  ;;  %1827 = vmatpush.msrb.mxu2 %v476_v13  ;;  %v780_v54 = vld [vmem:[#allocation3 + $0xae8] sm:$0xff] }
 0x149   : > { %v979_v15 = vld [vmem:[#allocation3 + $0x1120] sm:$0xff]  ;;  %1807 = vmatpush.msrb.mxu1 %v1115_v12  ;;  %1847 = vmatpush.msrb.mxu3 %v604_v14  ;;  %v908_v55 = vld [vmem:[#allocation3 + $0xee8] sm:$0xff] }
 0x14a   : > { %v1107_v16 = vld [vmem:[#allocation3 + $0x1520] sm:$0xff]  ;;  %1788 = vmatpush.msrb.mxu0 %v979_v15  ;;  %1828 = vmatpush.msrb.mxu2 %v468_v17  ;;  %v1036_v56 = vld [vmem:[#allocation3 + $0x12e8] sm:$0xff] }
 0x14b   : > { %v971_v19 = vld [vmem:[#allocation3 + $0x10e0] sm:$0xff]  ;;  %1808 = vmatpush.msrb.mxu1 %v1107_v16  ;;  %1848 = vmatpush.msrb.mxu3 %v596_v18  ;;  %v1164_v57 = vld [vmem:[#allocation3 + $0x16e8] sm:$0xff] }
 0x14c   : > { %v1099_v20 = vld [vmem:[#allocation3 + $0x14e0] sm:$0xff]  ;;  %1789 = vmatpush.msrb.mxu0 %v971_v19  ;;  %1829 = vmatpush.msrb.mxu2 %v460_v21  ;;  %v900_v30 = vld [vmem:[#allocation3 + $0xea8] sm:$0xff] }
 0x14d   : > { %v963_v23 = vld [vmem:[#allocation3 + $0x10a0] sm:$0xff]  ;;  %1809 = vmatpush.msrb.mxu1 %v1099_v20  ;;  %1849 = vmatpush.msrb.mxu3 %v588_v22  ;;  %v772_v58 = vld [vmem:[#allocation3 + $0xaa8] sm:$0xff] }
 0x14e   : > { %v1091_v24 = vld [vmem:[#allocation3 + $0x14a0] sm:$0xff]  ;;  %1790 = vmatpush.msrb.mxu0 %v963_v23  ;;  %1830 = vmatpush.msrb.mxu2 %v452_v26  ;;  %v1028_v59 = vld [vmem:[#allocation3 + $0x12a8] sm:$0xff] }
 0x14f   : > { %v955_v31 = vld [vmem:[#allocation3 + $0x1060] sm:$0xff]  ;;  %1810 = vmatpush.msrb.mxu1 %v1091_v24  ;;  %1850 = vmatpush.msrb.mxu3 %v580_v27  ;;  %v1156_v60 = vld [vmem:[#allocation3 + $0x16a8] sm:$0xff] }
 0x150   : > { %v1083_v32 = vld [vmem:[#allocation3 + $0x1460] sm:$0xff]  ;;  %1791 = vmatpush.msrb.mxu0 %v955_v31  ;;  %1831 = vmatpush.msrb.mxu2 %v444_v33  ;;  %v764_v61 = vld [vmem:[#allocation3 + $0xa68] sm:$0xff] }
 0x151   : > { %v947_v1 = vld [vmem:[#allocation3 + $0x1020] sm:$0xff]  ;;  %1811 = vmatpush.msrb.mxu1 %v1083_v32  ;;  %1851 = vmatpush.msrb.mxu3 %v572_v34  ;;  %v892_v62 = vld [vmem:[#allocation3 + $0xe68] sm:$0xff] }
 0x152   : > { %v1075_v2 = vld [vmem:[#allocation3 + $0x1420] sm:$0xff]  ;;  %1792 = vmatpush.msrb.mxu0 %v947_v1  ;;  %1832 = vmatpush.msrb.mxu2 %v436_v35  ;;  %v1020_v63 = vld [vmem:[#allocation3 + $0x1268] sm:$0xff] }
 0x153   : > { %1812 = vmatpush.msrb.mxu1 %v1075_v2  ;;  %1852 = vmatpush.msrb.mxu3 %v564_v3  ;;  %v1148_v0 = vld [vmem:[#allocation3 + $0x1668] sm:$0xff] }
 0x154   : > { %1753 = vmatmul.f32.vlgmr.msra.gmra.mxu2 %v3158_v47  ;;  %1773 = vmatmul.f32.vlgmr.msra.gmra.mxu3 %v3166_v25  ;;  %v756_v5 = vld [vmem:[#allocation3 + $0xa28] sm:$0xff] }
 0x155   : > { %1857 = vmatpush.msra.mxu0 %v812_v4  ;;  %1877 = vmatpush.msra.mxu1 %v940_v36  ;;  %v884_v6 = vld [vmem:[#allocation3 + $0xe28] sm:$0xff] }
 0x156   : > { %1897 = vmatpush.msra.mxu2 %v1068_v37  ;;  %1917 = vmatpush.msra.mxu3 %v1196_v38  ;;  %v1012_v7 = vld [vmem:[#allocation3 + $0x1228] sm:$0xff] }
 0x157   : > { %1858 = vmatpush.msra.mxu0 %v804_v39  ;;  %1878 = vmatpush.msra.mxu1 %v932_v40  ;;  %v1140_v8 = vld [vmem:[#allocation3 + $0x1628] sm:$0xff] }
 0x158   : > { %1898 = vmatpush.msra.mxu2 %v1060_v41  ;;  %1918 = vmatpush.msra.mxu3 %v1188_v42  ;;  %v748_v9 = vld [vmem:[#allocation3 + $0x9e8] sm:$0xff]  ;;  %v557_v41 = vld [vmem:[#allocation3 + $0x3f0] sm:$0xff] }
 0x159   : > { %1859 = vmatpush.msra.mxu0 %v796_v44  ;;  %1879 = vmatpush.msra.mxu1 %v924_v45  ;;  %v876_v10 = vld [vmem:[#allocation3 + $0xde8] sm:$0xff]  ;;  %v685_v42 = vld [vmem:[#allocation3 + $0x7f0] sm:$0xff] }
 0x15a   : > { %1899 = vmatpush.msra.mxu2 %v1052_v46  ;;  %1919 = vmatpush.msra.mxu3 %v1180_v48  ;;  %v1004_v11 = vld [vmem:[#allocation3 + $0x11e8] sm:$0xff]  ;;  %v813_v44 = vld [vmem:[#allocation3 + $0xbf0] sm:$0xff] }
 0x15b   : > { %1860 = vmatpush.msra.mxu0 %v788_v50  ;;  %1880 = vmatpush.msra.mxu1 %v916_v51  ;;  %v1132_v12 = vld [vmem:[#allocation3 + $0x15e8] sm:$0xff]  ;;  %v941_v45 = vld [vmem:[#allocation3 + $0xff0] sm:$0xff] }
 0x15c   : > { %1900 = vmatpush.msra.mxu2 %v1044_v52  ;;  %1920 = vmatpush.msra.mxu3 %v1172_v53  ;;  %v740_v13 = vld [vmem:[#allocation3 + $0x9a8] sm:$0xff]  ;;  %v549_v46 = vld [vmem:[#allocation3 + $0x3b0] sm:$0xff] }
 0x15d   : > { %1861 = vmatpush.msra.mxu0 %v780_v54  ;;  %1881 = vmatpush.msra.mxu1 %v908_v55  ;;  %v868_v14 = vld [vmem:[#allocation3 + $0xda8] sm:$0xff]  ;;  %v677_v48 = vld [vmem:[#allocation3 + $0x7b0] sm:$0xff] }
 0x15e   : > { %1901 = vmatpush.msra.mxu2 %v1036_v56  ;;  %1921 = vmatpush.msra.mxu3 %v1164_v57  ;;  %v996_v15 = vld [vmem:[#allocation3 + $0x11a8] sm:$0xff]  ;;  %v805_v50 = vld [vmem:[#allocation3 + $0xbb0] sm:$0xff] }
 0x15f   : > { %1793 = vmatmul.f32.vlgmr.msrb.gmra.mxu0 %v3154_v43  ;;  %1882 = vmatpush.msra.mxu1 %v900_v30  ;;  %v1124_v16 = vld [vmem:[#allocation3 + $0x15a8] sm:$0xff]  ;;  %v933_v51 = vld [vmem:[#allocation3 + $0xfb0] sm:$0xff] }
 0x160   : > { %1862 = vmatpush.msra.mxu0 %v772_v58  ;;  %1902 = vmatpush.msra.mxu2 %v1028_v59  ;;  %v732_v17 = vld [vmem:[#allocation3 + $0x968] sm:$0xff]  ;;  %v541_v52 = vld [vmem:[#allocation3 + $0x370] sm:$0xff] }
 0x161   : > { %1922 = vmatpush.msra.mxu3 %v1156_v60  ;;  %1813 = vmatmul.f32.vlgmr.msrb.gmra.mxu1 %v3162_v49  ;;  %v860_v18 = vld [vmem:[#allocation3 + $0xd68] sm:$0xff]  ;;  %v669_v53 = vld [vmem:[#allocation3 + $0x770] sm:$0xff] }
 0x162   : > { %1863 = vmatpush.msra.mxu0 %v764_v61  ;;  %1883 = vmatpush.msra.mxu1 %v892_v62  ;;  %v988_v19 = vld [vmem:[#allocation3 + $0x1168] sm:$0xff]  ;;  %v797_v54 = vld [vmem:[#allocation3 + $0xb70] sm:$0xff] }
 0x163   : > { %1903 = vmatpush.msra.mxu2 %v1020_v63  ;;  %1923 = vmatpush.msra.mxu3 %v1148_v0  ;;  %v1116_v20 = vld [vmem:[#allocation3 + $0x1568] sm:$0xff]  ;;  %v925_v55 = vld [vmem:[#allocation3 + $0xf70] sm:$0xff] }
 0x164   : > { %1864 = vmatpush.msra.mxu0 %v756_v5  ;;  %1884 = vmatpush.msra.mxu1 %v884_v6  ;;  %v724_v21 = vld [vmem:[#allocation3 + $0x928] sm:$0xff]  ;;  %v533_v56 = vld [vmem:[#allocation3 + $0x330] sm:$0xff] }
 0x165   : > { %1904 = vmatpush.msra.mxu2 %v1012_v7  ;;  %1924 = vmatpush.msra.mxu3 %v1140_v8  ;;  %v852_v22 = vld [vmem:[#allocation3 + $0xd28] sm:$0xff]  ;;  %v917_v57 = vld [vmem:[#allocation3 + $0xf30] sm:$0xff] }
 0x166   : > { %1865 = vmatpush.msra.mxu0 %v748_v9  ;;  %1885 = vmatpush.msra.mxu1 %v876_v10  ;;  %v980_v23 = vld [vmem:[#allocation3 + $0x1128] sm:$0xff]  ;;  %v525_v30 = vld [vmem:[#allocation3 + $0x2f0] sm:$0xff] }
 0x167   : > { %1905 = vmatpush.msra.mxu2 %v1004_v11  ;;  %1925 = vmatpush.msra.mxu3 %v1132_v12  ;;  %v1108_v24 = vld [vmem:[#allocation3 + $0x1528] sm:$0xff]  ;;  %v653_v58 = vld [vmem:[#allocation3 + $0x6f0] sm:$0xff] }
 0x168   : > { %1866 = vmatpush.msra.mxu0 %v740_v13  ;;  %1886 = vmatpush.msra.mxu1 %v868_v14  ;;  %v716_v26 = vld [vmem:[#allocation3 + $0x8e8] sm:$0xff]  ;;  %v781_v59 = vld [vmem:[#allocation3 + $0xaf0] sm:$0xff] }
 0x169   : > { %1906 = vmatpush.msra.mxu2 %v996_v15  ;;  %1926 = vmatpush.msra.mxu3 %v1124_v16  ;;  %v844_v27 = vld [vmem:[#allocation3 + $0xce8] sm:$0xff]  ;;  %v909_v60 = vld [vmem:[#allocation3 + $0xef0] sm:$0xff] }
 0x16a   : > { %1867 = vmatpush.msra.mxu0 %v732_v17  ;;  %1887 = vmatpush.msra.mxu1 %v860_v18  ;;  %v972_v31 = vld [vmem:[#allocation3 + $0x10e8] sm:$0xff]  ;;  %v517_v61 = vld [vmem:[#allocation3 + $0x2b0] sm:$0xff] }
 0x16b   : > { %1907 = vmatpush.msra.mxu2 %v988_v19  ;;  %1927 = vmatpush.msra.mxu3 %v1116_v20  ;;  %v1100_v32 = vld [vmem:[#allocation3 + $0x14e8] sm:$0xff]  ;;  %v645_v62 = vld [vmem:[#allocation3 + $0x6b0] sm:$0xff] }
 0x16c   : > { %1868 = vmatpush.msra.mxu0 %v724_v21  ;;  %1888 = vmatpush.msra.mxu1 %v852_v22  ;;  %v708_v33 = vld [vmem:[#allocation3 + $0x8a8] sm:$0xff]  ;;  %v773_v63 = vld [vmem:[#allocation3 + $0xab0] sm:$0xff] }
 0x16d   : > { %1908 = vmatpush.msra.mxu2 %v980_v23  ;;  %1928 = vmatpush.msra.mxu3 %v1108_v24  ;;  %v836_v34 = vld [vmem:[#allocation3 + $0xca8] sm:$0xff]  ;;  %v901_v0 = vld [vmem:[#allocation3 + $0xeb0] sm:$0xff] }
 0x16e   : > { %1869 = vmatpush.msra.mxu0 %v716_v26  ;;  %1889 = vmatpush.msra.mxu1 %v844_v27  ;;  %v964_v1 = vld [vmem:[#allocation3 + $0x10a8] sm:$0xff]  ;;  %v509_v5 = vld [vmem:[#allocation3 + $0x270] sm:$0xff] }
 0x16f   : > { %v1092_v2 = vld [vmem:[#allocation3 + $0x14a8] sm:$0xff]  ;;  %1909 = vmatpush.msra.mxu2 %v972_v31  ;;  %1929 = vmatpush.msra.mxu3 %v1100_v32  ;;  %v637_v6 = vld [vmem:[#allocation3 + $0x670] sm:$0xff] }
 0x170   : > { %v700_v35 = vld [vmem:[#allocation3 + $0x868] sm:$0xff]  ;;  %1870 = vmatpush.msra.mxu0 %v708_v33  ;;  %1890 = vmatpush.msra.mxu1 %v836_v34  ;;  %v765_v7 = vld [vmem:[#allocation3 + $0xa70] sm:$0xff] }
 0x171   : > { %v828_v3 = vld [vmem:[#allocation3 + $0xc68] sm:$0xff]  ;;  %1910 = vmatpush.msra.mxu2 %v964_v1  ;;  %1930 = vmatpush.msra.mxu3 %v1092_v2  ;;  %v893_v8 = vld [vmem:[#allocation3 + $0xe70] sm:$0xff] }
 0x172   : > { %v956_v4 = vld [vmem:[#allocation3 + $0x1068] sm:$0xff]  ;;  %1871 = vmatpush.msra.mxu0 %v700_v35  ;;  %1891 = vmatpush.msra.mxu1 %v828_v3  ;;  %v629_v9 = vld [vmem:[#allocation3 + $0x630] sm:$0xff] }
 0x173   : > { %v1084_v36 = vld [vmem:[#allocation3 + $0x1468] sm:$0xff]  ;;  %1911 = vmatpush.msra.mxu2 %v956_v4  ;;  %1853 = vmatmul.f32.vlgmr.msrb.gmra.mxu3 %v3150_v29  ;;  %v789_v29 = vld [vmem:[#allocation3 + $0xb30] sm:$0xff] }
 0x174   : > { %v692_v37 = vld [vmem:[#allocation3 + $0x828] sm:$0xff]  ;;  %1931 = vmatpush.msra.mxu3 %v1084_v36  ;;  %1833 = vmatmul.f32.vlgmr.msrb.gmra.mxu2 %v3146_v28  ;;  %v661_v28 = vld [vmem:[#allocation3 + $0x730] sm:$0xff] }
 0x175   : > { %v820_v38 = vld [vmem:[#allocation3 + $0xc28] sm:$0xff]  ;;  %1872 = vmatpush.msra.mxu0 %v692_v37  ;;  %v757_v10 = vld [vmem:[#allocation3 + $0xa30] sm:$0xff] }
 0x176   : > { %v948_v39 = vld [vmem:[#allocation3 + $0x1028] sm:$0xff]  ;;  %1892 = vmatpush.msra.mxu1 %v820_v38  ;;  %1873 = vmatmul.f32.vlgmr.msra.gmra.mxu0 %v3158_v47  ;;  %v885_v11 = vld [vmem:[#allocation3 + $0xe30] sm:$0xff] }
 0x177   : > { %v1076_v40 = vld [vmem:[#allocation3 + $0x1428] sm:$0xff]  ;;  %1912 = vmatpush.msra.mxu2 %v948_v39  ;;  %1937 = vmatpush.msrb.mxu0 %v557_v41  ;;  %v493_v47 = vld [vmem:[#allocation3 + $0x1f0] sm:$0xff] }
 0x178   : > { %1932 = vmatpush.msra.mxu3 %v1076_v40  ;;  %1957 = vmatpush.msrb.mxu1 %v685_v42  ;;  %v749_v12 = vld [vmem:[#allocation3 + $0x9f0] sm:$0xff] }
 0x179   : > { %1977 = vmatpush.msrb.mxu2 %v813_v44  ;;  %1938 = vmatpush.msrb.mxu0 %v549_v46  ;;  %v877_v13 = vld [vmem:[#allocation3 + $0xdf0] sm:$0xff]  ;;  %v558_v44 = vld [vmem:[#allocation3 + $0x3f8] sm:$0xff] }
 0x17a   : > { %1997 = vmatpush.msrb.mxu3 %v941_v45  ;;  %1958 = vmatpush.msrb.mxu1 %v677_v48  ;;  %v485_v14 = vld [vmem:[#allocation3 + $0x1b0] sm:$0xff]  ;;  %v686_v45 = vld [vmem:[#allocation3 + $0x7f8] sm:$0xff] }
 0x17b   : > { %1978 = vmatpush.msrb.mxu2 %v805_v50  ;;  %1939 = vmatpush.msrb.mxu0 %v541_v52  ;;  %v613_v15 = vld [vmem:[#allocation3 + $0x5b0] sm:$0xff]  ;;  %v550_v50 = vld [vmem:[#allocation3 + $0x3b8] sm:$0xff] }
 0x17c   : > { %1998 = vmatpush.msrb.mxu3 %v933_v51  ;;  %1959 = vmatpush.msrb.mxu1 %v669_v53  ;;  %v869_v16 = vld [vmem:[#allocation3 + $0xdb0] sm:$0xff]  ;;  %v678_v51 = vld [vmem:[#allocation3 + $0x7b8] sm:$0xff] }
 0x17d   : > { %1979 = vmatpush.msrb.mxu2 %v797_v54  ;;  %1940 = vmatpush.msrb.mxu0 %v533_v56  ;;  %v477_v17 = vld [vmem:[#allocation3 + $0x170] sm:$0xff]  ;;  %v542_v54 = vld [vmem:[#allocation3 + $0x378] sm:$0xff] }
 0x17e   : > { %1999 = vmatpush.msrb.mxu3 %v925_v55  ;;  %1960 = vmatpush.msrb.mxu1 %v661_v28  ;;  %v605_v18 = vld [vmem:[#allocation3 + $0x570] sm:$0xff]  ;;  %v670_v55 = vld [vmem:[#allocation3 + $0x778] sm:$0xff] }
 0x17f   : > { %1980 = vmatpush.msrb.mxu2 %v789_v29  ;;  %1941 = vmatpush.msrb.mxu0 %v525_v30  ;;  %v733_v19 = vld [vmem:[#allocation3 + $0x970] sm:$0xff]  ;;  %v534_v29 = vld [vmem:[#allocation3 + $0x338] sm:$0xff] }
 0x180   : > { %2000 = vmatpush.msrb.mxu3 %v917_v57  ;;  %1913 = vmatmul.f32.vlgmr.msra.gmra.mxu2 %v3154_v43  ;;  %v501_v43 = vld [vmem:[#allocation3 + $0x230] sm:$0xff]  ;;  %v662_v57 = vld [vmem:[#allocation3 + $0x738] sm:$0xff] }
 0x181   : > { %1961 = vmatpush.msrb.mxu1 %v653_v58  ;;  %1981 = vmatpush.msrb.mxu2 %v781_v59  ;;  %v861_v20 = vld [vmem:[#allocation3 + $0xd70] sm:$0xff]  ;;  %v526_v59 = vld [vmem:[#allocation3 + $0x2f8] sm:$0xff] }
 0x182   : > { %2001 = vmatpush.msrb.mxu3 %v909_v60  ;;  %1942 = vmatpush.msrb.mxu0 %v517_v61  ;;  %v469_v21 = vld [vmem:[#allocation3 + $0x130] sm:$0xff]  ;;  %v654_v60 = vld [vmem:[#allocation3 + $0x6f8] sm:$0xff] }
 0x183   : > { %1933 = vmatmul.f32.vlgmr.msra.gmra.mxu3 %v3162_v49  ;;  %1962 = vmatpush.msrb.mxu1 %v645_v62  ;;  %v621_v49 = vld [vmem:[#allocation3 + $0x5f0] sm:$0xff] }
 0x184   : > { %1982 = vmatpush.msrb.mxu2 %v773_v63  ;;  %2002 = vmatpush.msrb.mxu3 %v901_v0  ;;  %v597_v22 = vld [vmem:[#allocation3 + $0x530] sm:$0xff]  ;;  %v518_v63 = vld [vmem:[#allocation3 + $0x2b8] sm:$0xff] }
 0x185   : > { %1893 = vmatmul.f32.vlgmr.msra.gmra.mxu1 %v3166_v25  ;;  %1943 = vmatpush.msrb.mxu0 %v509_v5  ;;  %v741_v25 = vld [vmem:[#allocation3 + $0x9b0] sm:$0xff]  ;;  %v646_v0 = vld [vmem:[#allocation3 + $0x6b8] sm:$0xff] }
 0x186   : > { %1963 = vmatpush.msrb.mxu1 %v637_v6  ;;  %1983 = vmatpush.msrb.mxu2 %v765_v7  ;;  %v725_v23 = vld [vmem:[#allocation3 + $0x930] sm:$0xff]  ;;  %v510_v7 = vld [vmem:[#allocation3 + $0x278] sm:$0xff] }
 0x187   : > { %2003 = vmatpush.msrb.mxu3 %v893_v8  ;;  %1944 = vmatpush.msrb.mxu0 %v501_v43  ;;  %v853_v24 = vld [vmem:[#allocation3 + $0xd30] sm:$0xff]  ;;  %v638_v8 = vld [vmem:[#allocation3 + $0x678] sm:$0xff] }
 0x188   : > { %1964 = vmatpush.msrb.mxu1 %v629_v9  ;;  %1984 = vmatpush.msrb.mxu2 %v757_v10  ;;  %v461_v26 = vld [vmem:[#allocation3 + $0xf0] sm:$0xff]  ;;  %v502_v10 = vld [vmem:[#allocation3 + $0x238] sm:$0xff] }
 0x189   : > { %2004 = vmatpush.msrb.mxu3 %v885_v11  ;;  %1945 = vmatpush.msrb.mxu0 %v493_v47  ;;  %v589_v27 = vld [vmem:[#allocation3 + $0x4f0] sm:$0xff]  ;;  %v630_v11 = vld [vmem:[#allocation3 + $0x638] sm:$0xff] }
 0x18a   : > { %1965 = vmatpush.msrb.mxu1 %v621_v49  ;;  %1985 = vmatpush.msrb.mxu2 %v749_v12  ;;  %v717_v31 = vld [vmem:[#allocation3 + $0x8f0] sm:$0xff]  ;;  %v494_v12 = vld [vmem:[#allocation3 + $0x1f8] sm:$0xff] }
 0x18b   : > { %2005 = vmatpush.msrb.mxu3 %v877_v13  ;;  %1946 = vmatpush.msrb.mxu0 %v485_v14  ;;  %v845_v32 = vld [vmem:[#allocation3 + $0xcf0] sm:$0xff]  ;;  %v622_v13 = vld [vmem:[#allocation3 + $0x5f8] sm:$0xff] }
 0x18c   : > { %1966 = vmatpush.msrb.mxu1 %v613_v15  ;;  %1986 = vmatpush.msrb.mxu2 %v741_v25  ;;  %v453_v33 = vld [vmem:[#allocation3 + $0xb0] sm:$0xff]  ;;  %v486_v25 = vld [vmem:[#allocation3 + $0x1b8] sm:$0xff] }
 0x18d   : > { %2006 = vmatpush.msrb.mxu3 %v869_v16  ;;  %1947 = vmatpush.msrb.mxu0 %v477_v17  ;;  %v581_v34 = vld [vmem:[#allocation3 + $0x4b0] sm:$0xff]  ;;  %v614_v16 = vld [vmem:[#allocation3 + $0x5b8] sm:$0xff] }
 0x18e   : > { %1967 = vmatpush.msrb.mxu1 %v605_v18  ;;  %1987 = vmatpush.msrb.mxu2 %v733_v19  ;;  %v709_v1 = vld [vmem:[#allocation3 + $0x8b0] sm:$0xff]  ;;  %v478_v19 = vld [vmem:[#allocation3 + $0x178] sm:$0xff] }
 0x18f   : > { %2007 = vmatpush.msrb.mxu3 %v861_v20  ;;  %1948 = vmatpush.msrb.mxu0 %v469_v21  ;;  %v837_v2 = vld [vmem:[#allocation3 + $0xcb0] sm:$0xff]  ;;  %v606_v20 = vld [vmem:[#allocation3 + $0x578] sm:$0xff] }
 0x190   : > { %1968 = vmatpush.msrb.mxu1 %v597_v22  ;;  %1988 = vmatpush.msrb.mxu2 %v725_v23  ;;  %v445_v35 = vld [vmem:[#allocation3 + $0x70] sm:$0xff]  ;;  %v470_v23 = vld [vmem:[#allocation3 + $0x138] sm:$0xff] }
 0x191   : > { %2008 = vmatpush.msrb.mxu3 %v853_v24  ;;  %1949 = vmatpush.msrb.mxu0 %v461_v26  ;;  %v573_v3 = vld [vmem:[#allocation3 + $0x470] sm:$0xff]  ;;  %v598_v24 = vld [vmem:[#allocation3 + $0x538] sm:$0xff] }
 0x192   : > { %1969 = vmatpush.msrb.mxu1 %v589_v27  ;;  %1989 = vmatpush.msrb.mxu2 %v717_v31  ;;  %v701_v4 = vld [vmem:[#allocation3 + $0x870] sm:$0xff] }
 0x193   : > { %2009 = vmatpush.msrb.mxu3 %v845_v32  ;;  %1950 = vmatpush.msrb.mxu0 %v453_v33  ;;  %v829_v36 = vld [vmem:[#allocation3 + $0xc70] sm:$0xff]  ;;  %v462_v32 = vld [vmem:[#allocation3 + $0xf8] sm:$0xff] }
 0x194   : > { %1970 = vmatpush.msrb.mxu1 %v581_v34  ;;  %1990 = vmatpush.msrb.mxu2 %v709_v1  ;;  %v437_v37 = vld [vmem:[#allocation3 + $0x30] sm:$0xff]  ;;  %v3186_v33 = vld [vmem:[%s3107_s10] sm:$0xff] }
 0x195   : > { %2010 = vmatpush.msrb.mxu3 %v837_v2  ;;  %v565_v38 = vld [vmem:[#allocation3 + $0x430] sm:$0xff]  ;;  %1951 = vmatpush.msrb.mxu0 %v445_v35  ;;  %v590_v34 = vld [vmem:[#allocation3 + $0x4f8] sm:$0xff] }
 0x196   : > { %1971 = vmatpush.msrb.mxu1 %v573_v3  ;;  %v693_v39 = vld [vmem:[#allocation3 + $0x830] sm:$0xff]  ;;  %1991 = vmatpush.msrb.mxu2 %v701_v4  ;;  %v454_v3 = vld [vmem:[#allocation3 + $0xb8] sm:$0xff] }
 0x197   : > { %v821_v40 = vld [vmem:[#allocation3 + $0xc30] sm:$0xff]  ;;  %2011 = vmatpush.msrb.mxu3 %v829_v36  ;;  %1952 = vmatpush.msrb.mxu0 %v437_v37  ;;  %v582_v4 = vld [vmem:[#allocation3 + $0x4b8] sm:$0xff]  ;;  %v3194_v36 = vld [vmem:[%s3107_s10 + $0x8] sm:$0xff] }
 0x198   : > { %v1069_v41 = vld [vmem:[#allocation3 + $0x13f0] sm:$0xff]  ;;  %1972 = vmatpush.msrb.mxu1 %v565_v38  ;;  %1992 = vmatpush.msrb.mxu2 %v693_v39  ;;  %v446_v39 = vld [vmem:[#allocation3 + $0x78] sm:$0xff] }
 0x199   : > { %v1197_v42 = vld [vmem:[#allocation3 + $0x17f0] sm:$0xff]  ;;  %2012 = vmatpush.msrb.mxu3 %v821_v40  ;;  %2017 = vmatpush.msra.mxu0 %v1069_v41  ;;  %v574_v40 = vld [vmem:[#allocation3 + $0x478] sm:$0xff] }
 0x19a   : > { %v1061_v46 = vld [vmem:[#allocation3 + $0x13b0] sm:$0xff]  ;;  %2037 = vmatpush.msra.mxu1 %v1197_v42  ;;  %2057 = vmatpush.msra.mxu2 %v558_v44  ;;  %v438_v44 = vld [vmem:[#allocation3 + $0x38] sm:$0xff] }
 0x19b   : > { %v1189_v48 = vld [vmem:[#allocation3 + $0x17b0] sm:$0xff]  ;;  %2077 = vmatpush.msra.mxu3 %v686_v45  ;;  %2018 = vmatpush.msra.mxu0 %v1061_v46  ;;  %v566_v45 = vld [vmem:[#allocation3 + $0x438] sm:$0xff] }
 0x19c   : > { %v1053_v52 = vld [vmem:[#allocation3 + $0x1370] sm:$0xff]  ;;  %2038 = vmatpush.msra.mxu1 %v1189_v48  ;;  %2058 = vmatpush.msra.mxu2 %v550_v50  ;;  %v942_v46 = vld [vmem:[#allocation3 + $0xff8] sm:$0xff] }
 0x19d   : > { %v1181_v53 = vld [vmem:[#allocation3 + $0x1770] sm:$0xff]  ;;  %2078 = vmatpush.msra.mxu3 %v678_v51  ;;  %2019 = vmatpush.msra.mxu0 %v1053_v52  ;;  %v814_v48 = vld [vmem:[#allocation3 + $0xbf8] sm:$0xff] }
 0x19e   : > { %v1045_v56 = vld [vmem:[#allocation3 + $0x1330] sm:$0xff]  ;;  %2039 = vmatpush.msra.mxu1 %v1181_v53  ;;  %2059 = vmatpush.msra.mxu2 %v542_v54  ;;  %v1070_v50 = vld [vmem:[#allocation3 + $0x13f8] sm:$0xff] }
 0x19f   : > { %v1173_v28 = vld [vmem:[#allocation3 + $0x1730] sm:$0xff]  ;;  %2079 = vmatpush.msra.mxu3 %v670_v55  ;;  %2020 = vmatpush.msra.mxu0 %v1045_v56  ;;  %v1198_v51 = vld [vmem:[#allocation3 + $0x17f8] sm:$0xff] }
 0x1a0   : > { %v1037_v30 = vld [vmem:[#allocation3 + $0x12f0] sm:$0xff]  ;;  %2040 = vmatpush.msra.mxu1 %v1173_v28  ;;  %2060 = vmatpush.msra.mxu2 %v534_v29  ;;  %v3198_v52 = vld [vmem:[%s3107_s10 + $0x20] sm:$0xff]  ;;  %v3202_v28 = vld [vmem:[%s3107_s10 + $0x28] sm:$0xff] }
 0x1a1   : > { %v1165_v58 = vld [vmem:[#allocation3 + $0x16f0] sm:$0xff]  ;;  %2080 = vmatpush.msra.mxu3 %v662_v57  ;;  %2021 = vmatpush.msra.mxu0 %v1037_v30  ;;  %v806_v53 = vld [vmem:[#allocation3 + $0xbb8] sm:$0xff] }
 0x1a2   : > { %v1029_v61 = vld [vmem:[#allocation3 + $0x12b0] sm:$0xff]  ;;  %2041 = vmatpush.msra.mxu1 %v1165_v58  ;;  %2061 = vmatpush.msra.mxu2 %v526_v59  ;;  %v934_v54 = vld [vmem:[#allocation3 + $0xfb8] sm:$0xff]  ;;  %v3205_v59 = vpop.f32.mrf.mxu0 }
 0x1a3   : > { %v1157_v62 = vld [vmem:[#allocation3 + $0x16b0] sm:$0xff]  ;;  %2081 = vmatpush.msra.mxu3 %v654_v60  ;;  %2022 = vmatpush.msra.mxu0 %v1029_v61  ;;  %v1062_v55 = vld [vmem:[#allocation3 + $0x13b8] sm:$0xff] }
 0x1a4   : > { %v1021_v5 = vld [vmem:[#allocation3 + $0x1270] sm:$0xff]  ;;  %2042 = vmatpush.msra.mxu1 %v1157_v62  ;;  %2062 = vmatpush.msra.mxu2 %v518_v63  ;;  %v1190_v56 = vld [vmem:[#allocation3 + $0x17b8] sm:$0xff] }
 0x1a5   : > { %v1149_v6 = vld [vmem:[#allocation3 + $0x1670] sm:$0xff]  ;;  %2082 = vmatpush.msra.mxu3 %v646_v0  ;;  %2023 = vmatpush.msra.mxu0 %v1021_v5  ;;  %v798_v29 = vld [vmem:[#allocation3 + $0xb78] sm:$0xff]  ;;  %v3207_v0 = vpop.f32.mrf.mxu2 }
 0x1a6   : > { %v1013_v43 = vld [vmem:[#allocation3 + $0x1230] sm:$0xff]  ;;  %2043 = vmatpush.msra.mxu1 %v1149_v6  ;;  %2063 = vmatpush.msra.mxu2 %v510_v7  ;;  %v926_v57 = vld [vmem:[#allocation3 + $0xf78] sm:$0xff] }
 0x1a7   : > { %v1141_v9 = vld [vmem:[#allocation3 + $0x1630] sm:$0xff]  ;;  %2083 = vmatpush.msra.mxu3 %v638_v8  ;;  %2024 = vmatpush.msra.mxu0 %v1013_v43  ;;  %v1054_v30 = vld [vmem:[#allocation3 + $0x1378] sm:$0xff]  ;;  %v3209_v43 = vpop.f32.mrf.mxu1 }
 0x1a8   : > { %v1005_v47 = vld [vmem:[#allocation3 + $0x11f0] sm:$0xff]  ;;  %2044 = vmatpush.msra.mxu1 %v1141_v9  ;;  %2064 = vmatpush.msra.mxu2 %v502_v10  ;;  %v1182_v58 = vld [vmem:[#allocation3 + $0x1778] sm:$0xff] }
 0x1a9   : > { %v1133_v49 = vld [vmem:[#allocation3 + $0x15f0] sm:$0xff]  ;;  %2084 = vmatpush.msra.mxu3 %v630_v11  ;;  %2025 = vmatpush.msra.mxu0 %v1005_v47  ;;  %v790_v60 = vld [vmem:[#allocation3 + $0xb38] sm:$0xff] }
 0x1aa   : > { %v997_v14 = vld [vmem:[#allocation3 + $0x11b0] sm:$0xff]  ;;  %2045 = vmatpush.msra.mxu1 %v1133_v49  ;;  %2065 = vmatpush.msra.mxu2 %v494_v12  ;;  %v918_v61 = vld [vmem:[#allocation3 + $0xf38] sm:$0xff]  ;;  %v3211_v49 = vpop.f32.mrf.mxu3 }
 0x1ab   : > { %v1125_v15 = vld [vmem:[#allocation3 + $0x15b0] sm:$0xff]  ;;  %2085 = vmatpush.msra.mxu3 %v622_v13  ;;  %2026 = vmatpush.msra.mxu0 %v997_v14  ;;  %v1046_v62 = vld [vmem:[#allocation3 + $0x1338] sm:$0xff] }
 0x1ac   : > { %v989_v17 = vld [vmem:[#allocation3 + $0x1170] sm:$0xff]  ;;  %2046 = vmatpush.msra.mxu1 %v1125_v15  ;;  %2066 = vmatpush.msra.mxu2 %v486_v25  ;;  %v1174_v63 = vld [vmem:[#allocation3 + $0x1738] sm:$0xff] }
 0x1ad   : > { %v1117_v18 = vld [vmem:[#allocation3 + $0x1570] sm:$0xff]  ;;  %2086 = vmatpush.msra.mxu3 %v614_v16  ;;  %2027 = vmatpush.msra.mxu0 %v989_v17  ;;  %v782_v5 = vld [vmem:[#allocation3 + $0xaf8] sm:$0xff] }
 0x1ae   : > { %v981_v21 = vld [vmem:[#allocation3 + $0x1130] sm:$0xff]  ;;  %2047 = vmatpush.msra.mxu1 %v1117_v18  ;;  %2067 = vmatpush.msra.mxu2 %v478_v19  ;;  %v910_v6 = vld [vmem:[#allocation3 + $0xef8] sm:$0xff]  ;;  %v3213_v19 = vpop.f32.mrf.mxu0 }
 0x1af   : > { %v1109_v22 = vld [vmem:[#allocation3 + $0x1530] sm:$0xff]  ;;  %2087 = vmatpush.msra.mxu3 %v606_v20  ;;  %2028 = vmatpush.msra.mxu0 %v981_v21  ;;  %v1038_v7 = vld [vmem:[#allocation3 + $0x12f8] sm:$0xff]  ;;  %v3215_v20 = vpop.f32.mrf.mxu2 }
 0x1b0   : > { %v3182_v26 = vld [vmem:[%s3107_s10 + $0x10] sm:$0xff]  ;;  %2048 = vmatpush.msra.mxu1 %v1109_v22  ;;  %2068 = vmatpush.msra.mxu2 %v470_v23  ;;  %v3190_v1 = vld [vmem:[%s3107_s10 + $0x18] sm:$0xff] }
 0x1b1   : > { %1993 = vmatmul.f32.vlgmr.msrb.gmra.mxu2 %v3182_v26  ;;  %v973_v27 = vld [vmem:[#allocation3 + $0x10f0] sm:$0xff]  ;;  %2088 = vmatpush.msra.mxu3 %v598_v24  ;;  %v1166_v8 = vld [vmem:[#allocation3 + $0x16f8] sm:$0xff] }
 0x1b2   : > { %v1101_v31 = vld [vmem:[#allocation3 + $0x14f0] sm:$0xff]  ;;  %1953 = vmatmul.f32.vlgmr.msrb.gmra.mxu0 %v3186_v33  ;;  %2013 = vmatmul.f32.vlgmr.msrb.gmra.mxu3 %v3190_v1  ;;  %v774_v9 = vld [vmem:[#allocation3 + $0xab8] sm:$0xff] }
 0x1b3   : > { %2029 = vmatpush.msra.mxu0 %v973_v27  ;;  %v965_v2 = vld [vmem:[#allocation3 + $0x10b0] sm:$0xff]  ;;  %2049 = vmatpush.msra.mxu1 %v1101_v31  ;;  %v902_v10 = vld [vmem:[#allocation3 + $0xeb8] sm:$0xff] }
 0x1b4   : > { %v1093_v35 = vld [vmem:[#allocation3 + $0x14b0] sm:$0xff]  ;;  %2069 = vmatpush.msra.mxu2 %v462_v32  ;;  %2089 = vmatpush.msra.mxu3 %v590_v34  ;;  %v1030_v11 = vld [vmem:[#allocation3 + $0x12b8] sm:$0xff] }
 0x1b5   : > { %1973 = vmatmul.f32.vlgmr.msrb.gmra.mxu1 %v3194_v36  ;;  %v957_v37 = vld [vmem:[#allocation3 + $0x1070] sm:$0xff]  ;;  %2030 = vmatpush.msra.mxu0 %v965_v2  ;;  %v1158_v47 = vld [vmem:[#allocation3 + $0x16b8] sm:$0xff]  ;;  %v3217_v2 = vpop.f32.mrf.mxu1 }
 0x1b6   : > { %v1085_v38 = vld [vmem:[#allocation3 + $0x1470] sm:$0xff]  ;;  %2050 = vmatpush.msra.mxu1 %v1093_v35  ;;  %2070 = vmatpush.msra.mxu2 %v454_v3  ;;  %v766_v12 = vld [vmem:[#allocation3 + $0xa78] sm:$0xff]  ;;  %v3219_v35 = vpop.f32.mrf.mxu3 }
 0x1b7   : > { %2090 = vmatpush.msra.mxu3 %v582_v4  ;;  %v949_v41 = vld [vmem:[#allocation3 + $0x1030] sm:$0xff]  ;;  %2031 = vmatpush.msra.mxu0 %v957_v37  ;;  %v894_v13 = vld [vmem:[#allocation3 + $0xe78] sm:$0xff] }
 0x1b8   : > { %v1077_v42 = vld [vmem:[#allocation3 + $0x1430] sm:$0xff]  ;;  %2051 = vmatpush.msra.mxu1 %v1085_v38  ;;  %2071 = vmatpush.msra.mxu2 %v446_v39  ;;  %v1022_v14 = vld [vmem:[#allocation3 + $0x1278] sm:$0xff] }
 0x1b9   : > { %2091 = vmatpush.msra.mxu3 %v574_v40  ;;  %2032 = vmatpush.msra.mxu0 %v949_v41  ;;  %v1150_v15 = vld [vmem:[#allocation3 + $0x1678] sm:$0xff] }
 0x1ba   : > { %2052 = vmatpush.msra.mxu1 %v1077_v42  ;;  %2072 = vmatpush.msra.mxu2 %v438_v44  ;;  %v758_v25 = vld [vmem:[#allocation3 + $0xa38] sm:$0xff]  ;;  %v3221_v44 = vpop.f32.mrf.mxu0 }
 0x1bb   : > { %2092 = vmatpush.msra.mxu3 %v566_v45  ;;  %2033 = vmatmul.f32.vlgmr.msra.gmra.mxu0 %v3198_v52  ;;  %v886_v16 = vld [vmem:[#allocation3 + $0xe38] sm:$0xff] }
 0x1bc   : > { %2117 = vmatpush.msrb.mxu1 %v942_v46  ;;  %2097 = vmatpush.msrb.mxu0 %v814_v48  ;;  %v1014_v17 = vld [vmem:[#allocation3 + $0x1238] sm:$0xff] }
 0x1bd   : > { %2137 = vmatpush.msrb.mxu2 %v1070_v50  ;;  %2157 = vmatpush.msrb.mxu3 %v1198_v51  ;;  %v1142_v18 = vld [vmem:[#allocation3 + $0x1638] sm:$0xff]  ;;  %v3223_v50 = vpop.f32.mrf.mxu2 }
 0x1be   : > { %2053 = vmatmul.f32.vlgmr.msra.gmra.mxu1 %v3202_v28  ;;  %2098 = vmatpush.msrb.mxu0 %v806_v53  ;;  %v750_v21 = vld [vmem:[#allocation3 + $0x9f8] sm:$0xff] }
 0x1bf   : > { %2118 = vmatpush.msrb.mxu1 %v934_v54  ;;  %2138 = vmatpush.msrb.mxu2 %v1062_v55  ;;  %v878_v22 = vld [vmem:[#allocation3 + $0xdf8] sm:$0xff]  ;;  %v3226_v55 = vpop.f32.mrf.mxu1 }
 0x1c0   : > { %2158 = vmatpush.msrb.mxu3 %v1190_v56  ;;  %2099 = vmatpush.msrb.mxu0 %v798_v29  ;;  %v1006_v23 = vld [vmem:[#allocation3 + $0x11f8] sm:$0xff] }
 0x1c1   : > { %2119 = vmatpush.msrb.mxu1 %v926_v57  ;;  %2139 = vmatpush.msrb.mxu2 %v1054_v30  ;;  %v1134_v24 = vld [vmem:[#allocation3 + $0x15f8] sm:$0xff] }
 0x1c2   : > { %2159 = vmatpush.msrb.mxu3 %v1182_v58  ;;  %2100 = vmatpush.msrb.mxu0 %v790_v60  ;;  %v742_v27 = vld [vmem:[#allocation3 + $0x9b8] sm:$0xff]  ;;  %v3228_v58 = vpop.f32.mrf.mxu3 }
 0x1c3   : > { %2120 = vmatpush.msrb.mxu1 %v918_v61  ;;  %2140 = vmatpush.msrb.mxu2 %v1046_v62  ;;  %v870_v31 = vld [vmem:[#allocation3 + $0xdb8] sm:$0xff] }
 0x1c4   : > { %2160 = vmatpush.msrb.mxu3 %v1174_v63  ;;  %2101 = vmatpush.msrb.mxu0 %v782_v5  ;;  %v998_v32 = vld [vmem:[#allocation3 + $0x11b8] sm:$0xff]  ;;  %v1474_v63 = vpop.f32.mrf.mxu0 }
 0x1c5   : > { %2121 = vmatpush.msrb.mxu1 %v910_v6  ;;  %2141 = vmatpush.msrb.mxu2 %v1038_v7  ;;  %v1126_v34 = vld [vmem:[#allocation3 + $0x15b8] sm:$0xff]  ;;  %v2200_v7 = vld [vmem:[#allocation7 + $0x78] sm:$0xff] }
 0x1c6   : > { %2161 = vmatpush.msrb.mxu3 %v1166_v8  ;;  %2102 = vmatpush.msrb.mxu0 %v774_v9  ;;  %v734_v3 = vld [vmem:[#allocation3 + $0x978] sm:$0xff]  ;;  %v3231_v8 = vpop.f32.mrf.mxu2  ;;  %v2232_v9 = vld [vmem:[#allocation7 + $0x178] sm:$0xff] }
 0x1c7   : > { %2122 = vmatpush.msrb.mxu1 %v902_v10  ;;  %2142 = vmatpush.msrb.mxu2 %v1030_v11  ;;  %v862_v4 = vld [vmem:[#allocation3 + $0xd78] sm:$0xff]  ;;  %v2248_v10 = vld [vmem:[#allocation7 + $0x1f8] sm:$0xff]  ;;  %v3233_v11 = vpop.f32.mrf.mxu1 }
 0x1c8   : > { %2162 = vmatpush.msrb.mxu3 %v1158_v47  ;;  %2103 = vmatpush.msrb.mxu0 %v766_v12  ;;  %v990_v37 = vld [vmem:[#allocation3 + $0x1178] sm:$0xff]  ;;  %v3236_v12 = vld [vmem:[#allocation5] sm:$0xff] }
 0x1c9   : > { %2123 = vmatpush.msrb.mxu1 %v894_v13  ;;  %2143 = vmatpush.msrb.mxu2 %v1022_v14  ;;  %v1118_v38 = vld [vmem:[#allocation3 + $0x1578] sm:$0xff] }
 0x1ca   : > { %2163 = vmatpush.msrb.mxu3 %v1150_v15  ;;  %2104 = vmatpush.msrb.mxu0 %v758_v25  ;;  %v726_v39 = vld [vmem:[#allocation3 + $0x938] sm:$0xff]  ;;  %v3238_v15 = vpop.f32.mrf.mxu3 }
 0x1cb   : > { %2124 = vmatpush.msrb.mxu1 %v886_v16  ;;  %2144 = vmatpush.msrb.mxu2 %v1014_v17  ;;  %v854_v40 = vld [vmem:[#allocation3 + $0xd38] sm:$0xff]  ;;  %v2198_v16 = vld [vmem:[#allocation7 + $0x68] sm:$0xff] }
 0x1cc   : > { %2164 = vmatpush.msrb.mxu3 %v1142_v18  ;;  %2105 = vmatpush.msrb.mxu0 %v750_v21  ;;  %v982_v41 = vld [vmem:[#allocation3 + $0x1138] sm:$0xff]  ;;  %v2214_v17 = vld [vmem:[#allocation7 + $0xe8] sm:$0xff]  ;;  %v1202_v18 = vperm.slane %v3236_v12, 1 }
 0x1cd   : > { %2125 = vmatpush.msrb.mxu1 %v878_v22  ;;  %2145 = vmatpush.msrb.mxu2 %v1006_v23  ;;  %v1110_v42 = vld [vmem:[#allocation3 + $0x1538] sm:$0xff]  ;;  %v2230_v21 = vld [vmem:[#allocation7 + $0x168] sm:$0xff]  ;;  %v1203_v23 = vperm.slane %v3236_v12, 2 }
 0x1ce   : > { %2165 = vmatpush.msrb.mxu3 %v1134_v24  ;;  %2106 = vmatpush.msrb.mxu0 %v742_v27  ;;  %v718_v45 = vld [vmem:[#allocation3 + $0x8f8] sm:$0xff]  ;;  %v2246_v22 = vld [vmem:[#allocation7 + $0x1e8] sm:$0xff]  ;;  %v1204_v24 = vperm.slane %v3236_v12, 3  ;;  %v3247_v27 = vpop.f32.mrf.mxu0 }
 0x1cf   : > { %2126 = vmatpush.msrb.mxu1 %v870_v31  ;;  %2146 = vmatpush.msrb.mxu2 %v998_v32  ;;  %v846_v46 = vld [vmem:[#allocation3 + $0xcf8] sm:$0xff]  ;;  %v1594_v31 = vpop.f32.mrf.mxu2  ;;  %v2229_v32 = vld [vmem:[#allocation7 + $0x160] sm:$0xff] }
 0x1d0   : > { %2166 = vmatpush.msrb.mxu3 %v1126_v34  ;;  %2107 = vmatpush.msrb.mxu0 %v734_v3  ;;  %v974_v48 = vld [vmem:[#allocation3 + $0x10f8] sm:$0xff]  ;;  %v2245_v34 = vld [vmem:[#allocation7 + $0x1e0] sm:$0xff]  ;;  %v2196_v3 = vld [vmem:[#allocation7 + $0x58] sm:$0xff] }
 0x1d1   : > { %2127 = vmatpush.msrb.mxu1 %v862_v4  ;;  %2147 = vmatpush.msrb.mxu2 %v990_v37  ;;  %v1102_v51 = vld [vmem:[#allocation3 + $0x14f8] sm:$0xff]  ;;  %v2212_v4 = vld [vmem:[#allocation7 + $0xd8] sm:$0xff] }
 0x1d2   : > { %2167 = vmatpush.msrb.mxu3 %v1118_v38  ;;  %2108 = vmatpush.msrb.mxu0 %v726_v39  ;;  %v710_v53 = vld [vmem:[#allocation3 + $0x8b8] sm:$0xff]  ;;  %v1355_v38 = vadd.f32 %v3215_v20, %v1202_v18  ;;  %v2244_v39 = vld [vmem:[#allocation7 + $0x1d8] sm:$0xff]  ;;  %v2210_v20 = vld [vmem:[#allocation7 + $0xc8] sm:$0xff] }
 0x1d3   : > { %2128 = vmatpush.msrb.mxu1 %v854_v40  ;;  %2148 = vmatpush.msrb.mxu2 %v982_v41  ;;  %v838_v54 = vld [vmem:[#allocation3 + $0xcb8] sm:$0xff]  ;;  %v1475_v40 = vadd.f32 %v1474_v63, %v1203_v23  ;;  %v1595_v41 = vadd.f32 %v1594_v31, %v1204_v24  ;;  %v2225_v63 = vld [vmem:[#allocation7 + $0x140] sm:$0xff]  ;;  %v2238_v18 = vld [vmem:[#allocation7 + $0x1a8] sm:$0xff] }
 0x1d4   : > { %2168 = vmatpush.msrb.mxu3 %v1110_v42  ;;  %2073 = vmatmul.f32.vlgmr.msra.gmra.mxu2 %v3186_v33  ;;  %v966_v56 = vld [vmem:[#allocation3 + $0x10b8] sm:$0xff]  ;;  %v2189_v23 = vld [vmem:[#allocation7 + $0x20] sm:$0xff] }
 0x1d5   : > { %2109 = vmatpush.msrb.mxu0 %v718_v45  ;;  %2129 = vmatpush.msrb.mxu1 %v846_v46  ;;  %v1094_v29 = vld [vmem:[#allocation3 + $0x14b8] sm:$0xff]  ;;  %v3251_v46 = vpop.f32.mrf.mxu1  ;;  %v2205_v24 = vld [vmem:[#allocation7 + $0xa0] sm:$0xff] }
 0x1d6   : > { %2149 = vmatpush.msrb.mxu2 %v974_v48  ;;  %2169 = vmatpush.msrb.mxu3 %v1102_v51  ;;  %v702_v57 = vld [vmem:[#allocation3 + $0x878] sm:$0xff]  ;;  %v1614_v48 = vpop.f32.mrf.mxu3  ;;  %v2237_v31 = vld [vmem:[#allocation7 + $0x1a0] sm:$0xff] }
 0x1d7   : > { %2110 = vmatpush.msrb.mxu0 %v710_v53  ;;  %v830_v30 = vld [vmem:[#allocation3 + $0xc78] sm:$0xff]  ;;  %2093 = vmatmul.f32.vlgmr.msra.gmra.mxu3 %v3194_v36  ;;  %v2216_v36 = vld [vmem:[#allocation7 + $0xf8] sm:$0xff] }
 0x1d8   : > { %2130 = vmatpush.msrb.mxu1 %v838_v54  ;;  %v958_v60 = vld [vmem:[#allocation3 + $0x1078] sm:$0xff]  ;;  %2150 = vmatpush.msrb.mxu2 %v966_v56  ;;  %v1375_v56 = vadd.f32 %v3219_v35, %v1355_v38  ;;  %v2208_v35 = vld [vmem:[#allocation7 + $0xb8] sm:$0xff] }
 0x1d9   : > { %v1086_v61 = vld [vmem:[#allocation3 + $0x1478] sm:$0xff]  ;;  %2170 = vmatpush.msrb.mxu3 %v1094_v29  ;;  %2111 = vmatpush.msrb.mxu0 %v702_v57  ;;  %v2226_v29 = vld [vmem:[#allocation7 + $0x148] sm:$0xff] }
 0x1da   : > { %v694_v33 = vld [vmem:[#allocation3 + $0x838] sm:$0xff]  ;;  %2131 = vmatpush.msrb.mxu1 %v830_v30  ;;  %2151 = vmatpush.msrb.mxu2 %v958_v60  ;;  %v2242_v57 = vld [vmem:[#allocation7 + $0x1c8] sm:$0xff]  ;;  %v1495_v30 = vadd.f32 %v3233_v11, %v1475_v40  ;;  %v1615_v60 = vadd.f32 %v1614_v48, %v1595_v41 }
 0x1db   : > { %v822_v62 = vld [vmem:[#allocation3 + $0xc38] sm:$0xff]  ;;  %2171 = vmatpush.msrb.mxu3 %v1086_v61  ;;  %2112 = vmatpush.msrb.mxu0 %v694_v33  ;;  %v2193_v61 = vld [vmem:[#allocation7 + $0x40] sm:$0xff] }
 0x1dc   : > { %v950_v5 = vld [vmem:[#allocation3 + $0x1038] sm:$0xff]  ;;  %2132 = vmatpush.msrb.mxu1 %v822_v62  ;;  %2113 = vmatmul.f32.vlgmr.msrb.gmra.mxu0 %v3182_v26  ;;  %v2197_v26 = vld [vmem:[#allocation7 + $0x60] sm:$0xff]  ;;  %v1634_v62 = vpop.f32.mrf.mxu0 }
 0x1dd   : > { %v1078_v6 = vld [vmem:[#allocation3 + $0x1438] sm:$0xff]  ;;  %2152 = vmatpush.msrb.mxu2 %v950_v5  ;;  %2317 = vmatpush.msra.mxu0 %v2200_v7  ;;  %v2209_v33 = vld [vmem:[#allocation7 + $0xc0] sm:$0xff]  ;;  %v1395_v7 = vadd.f32 %v3221_v44, %v1375_v56  ;;  %v1635_v11 = vadd.f32 %v1634_v62, %v1615_v60  ;;  %v2206_v44 = vld [vmem:[#allocation7 + $0xa8] sm:$0xff] }
 0x1de   : > { %2172 = vmatpush.msrb.mxu3 %v1078_v6  ;;  %2153 = vmatmul.f32.vlgmr.msrb.gmra.mxu2 %v3198_v52  ;;  %v2199_v47 = vld [vmem:[#allocation7 + $0x70] sm:$0xff]  ;;  %v1201_v52 = vperm.slane %v3236_v12, 0  ;;  %v2241_v5 = vld [vmem:[#allocation7 + $0x1c0] sm:$0xff] }
 0x1df   : > { %2337 = vmatpush.msra.mxu1 %v2216_v36  ;;  %2357 = vmatpush.msra.mxu2 %v2232_v9  ;;  %v2215_v13 = vld [vmem:[#allocation7 + $0xf0] sm:$0xff]  ;;  %v2224_v36 = vld [vmem:[#allocation7 + $0x138] sm:$0xff] }
 0x1e0   : > { %v2231_v14 = vld [vmem:[#allocation7 + $0x170] sm:$0xff]  ;;  %2377 = vmatpush.msra.mxu3 %v2248_v10  ;;  %2318 = vmatpush.msra.mxu0 %v2199_v47  ;;  %v1235_v37 = vadd.f32 %v3205_v59, %v1201_v52  ;;  %v2194_v59 = vld [vmem:[#allocation7 + $0x48] sm:$0xff]  ;;  %v2240_v9 = vld [vmem:[#allocation7 + $0x1b8] sm:$0xff]  ;;  %v1515_v10 = vadd.f32 %v3231_v8, %v1495_v30  ;;  %v1415_v52 = vadd.f32 %v3226_v55, %v1395_v7 }
 0x1e1   : > { %v2247_v25 = vld [vmem:[#allocation7 + $0x1f0] sm:$0xff]  ;;  %2173 = vmatmul.f32.vlgmr.msrb.gmra.mxu3 %v3202_v28  ;;  %2338 = vmatpush.msra.mxu1 %v2215_v13  ;;  %v2213_v28 = vld [vmem:[#allocation7 + $0xe0] sm:$0xff]  ;;  %v2222_v8 = vld [vmem:[#allocation7 + $0x128] sm:$0xff] }
 0x1e2   : > { %2358 = vmatpush.msra.mxu2 %v2231_v14  ;;  %2378 = vmatpush.msra.mxu3 %v2247_v25  ;;  %v2195_v42 = vld [vmem:[#allocation7 + $0x50] sm:$0xff]  ;;  %v1255_v54 = vadd.f32 %v3209_v43, %v1235_v37  ;;  %v2192_v43 = vld [vmem:[#allocation7 + $0x38] sm:$0xff]  ;;  %v1654_v14 = vpop.f32.mrf.mxu1  ;;  %v2262_v7 = vld [vmem:[#allocation7 + $0x268] sm:$0xff] }
 0x1e3   : > { %2133 = vmatmul.f32.vlgmr.msrb.gmra.mxu1 %v3190_v1  ;;  %2319 = vmatpush.msra.mxu0 %v2198_v16  ;;  %v2228_v1 = vld [vmem:[#allocation7 + $0x158] sm:$0xff]  ;;  %v2211_v45 = vld [vmem:[#allocation7 + $0xd0] sm:$0xff] }
 0x1e4   : > { %2339 = vmatpush.msra.mxu1 %v2214_v17  ;;  %2359 = vmatpush.msra.mxu2 %v2230_v21  ;;  %v2227_v51 = vld [vmem:[#allocation7 + $0x150] sm:$0xff]  ;;  %v1275_v6 = vadd.f32 %v3207_v0, %v1255_v54  ;;  %v2190_v0 = vld [vmem:[#allocation7 + $0x28] sm:$0xff]  ;;  %v1535_v21 = vadd.f32 %v3238_v15, %v1515_v10  ;;  %v2204_v55 = vld [vmem:[#allocation7 + $0x98] sm:$0xff]  ;;  %v1714_v48 = vpop.f32.mrf.mxu0 }
 0x1e5   : > { %2379 = vmatpush.msra.mxu3 %v2246_v22  ;;  %2320 = vmatpush.msra.mxu0 %v2197_v26  ;;  %v2243_v53 = vld [vmem:[#allocation7 + $0x1d0] sm:$0xff]  ;;  %v1655_v22 = vadd.f32 %v1654_v14, %v1635_v11  ;;  %v1674_v26 = vpop.f32.mrf.mxu2  ;;  %v2220_v15 = vld [vmem:[#allocation7 + $0x118] sm:$0xff]  ;;  %v2201_v54 = vld [vmem:[#allocation7 + $0x80] sm:$0xff] }
 0x1e6   : > { %2340 = vmatpush.msra.mxu1 %v2213_v28  ;;  %2360 = vmatpush.msra.mxu2 %v2229_v32  ;;  %v2191_v47 = vld [vmem:[#allocation7 + $0x30] sm:$0xff]  ;;  %v1295_v17 = vadd.f32 %v3211_v49, %v1275_v6  ;;  %v2221_v28 = vld [vmem:[#allocation7 + $0x120] sm:$0xff]  ;;  %v2188_v49 = vld [vmem:[#allocation7 + $0x18] sm:$0xff]  ;;  %v1205_v6 = vperm.slane %v3236_v12, 4 }
 0x1e7   : > { %2380 = vmatpush.msra.mxu3 %v2245_v34  ;;  %2321 = vmatpush.msra.mxu0 %v2196_v3  ;;  %v2207_v13 = vld [vmem:[#allocation7 + $0xb0] sm:$0xff]  ;;  %v1435_v34 = vadd.f32 %v3223_v50, %v1415_v52  ;;  %v2236_v3 = vld [vmem:[#allocation7 + $0x198] sm:$0xff]  ;;  %v1675_v37 = vadd.f32 %v1674_v26, %v1655_v22  ;;  %v2202_v50 = vld [vmem:[#allocation7 + $0x88] sm:$0xff] }
 0x1e8   : > { %2341 = vmatpush.msra.mxu1 %v2212_v4  ;;  %2361 = vmatpush.msra.mxu2 %v2228_v1  ;;  %v2223_v25 = vld [vmem:[#allocation7 + $0x130] sm:$0xff]  ;;  %v1315_v32 = vadd.f32 %v3213_v19, %v1295_v17  ;;  %v1555_v4 = vadd.f32 %v3247_v27, %v1535_v21  ;;  %v2186_v19 = vld [vmem:[#allocation7 + $0x8] sm:$0xff]  ;;  %v2277_v14 = vld [vmem:[#allocation7 + $0x2e0] sm:$0xff] }
 0x1e9   : > { %2381 = vmatpush.msra.mxu3 %v2244_v39  ;;  %2322 = vmatpush.msra.mxu0 %v2195_v42  ;;  %v2239_v16 = vld [vmem:[#allocation7 + $0x1b0] sm:$0xff]  ;;  %v1694_v39 = vpop.f32.mrf.mxu3  ;;  %v2218_v27 = vld [vmem:[#allocation7 + $0x108] sm:$0xff]  ;;  %v2276_v17 = vld [vmem:[#allocation7 + $0x2d8] sm:$0xff] }
 0x1ea   : > { %2342 = vmatpush.msra.mxu1 %v2211_v45  ;;  %2362 = vmatpush.msra.mxu2 %v2227_v51  ;;  %v2187_v38 = vld [vmem:[#allocation7 + $0x10] sm:$0xff]  ;;  %v1335_v42 = vadd.f32 %v3217_v2, %v1315_v32  ;;  %v1455_v45 = vadd.f32 %v3228_v58, %v1435_v34  ;;  %v2234_v51 = vld [vmem:[#allocation7 + $0x188] sm:$0xff]  ;;  %v2233_v2 = vld [vmem:[#allocation7 + $0x180] sm:$0xff]  ;;  %v1734_v30 = vpop.f32.mrf.mxu1 }
 0x1eb   : > { %2382 = vmatpush.msra.mxu3 %v2243_v53  ;;  %2323 = vmatpush.msra.mxu0 %v2194_v59  ;;  %v2203_v1 = vld [vmem:[#allocation7 + $0x90] sm:$0xff]  ;;  %v1575_v53 = vadd.f32 %v3251_v46, %v1555_v4  ;;  %v1695_v59 = vadd.f32 %v1694_v39, %v1675_v37  ;;  %v2257_v32 = vld [vmem:[#allocation7 + $0x240] sm:$0xff]  ;;  %v2256_v37 = vld [vmem:[#allocation7 + $0x238] sm:$0xff] }
 0x1ec   : > { %2343 = vmatpush.msra.mxu1 %v2210_v20  ;;  %2363 = vmatpush.msra.mxu2 %v2226_v29  ;;  %v2219_v40 = vld [vmem:[#allocation7 + $0x110] sm:$0xff]  ;;  %v2185_v20 = vld [vmem:[#allocation7] sm:$0xff]  ;;  %v2177_v58 = vmax.f32 %v1335_v42, 0.0  ;;  %v3274_v10 = vpop.f32.mrf.mxu0  ;;  %v2288_v39 = vld [vmem:[#allocation7 + $0x338] sm:$0xff] }
 0x1ed   : > { %2383 = vmatpush.msra.mxu3 %v2242_v57  ;;  %2324 = vmatpush.msra.mxu0 %v2193_v61  ;;  %v2235_v41 = vld [vmem:[#allocation7 + $0x190] sm:$0xff]  ;;  %v3268_v56 = vpop.f32.mrf.mxu2  ;;  %v2217_v29 = vld [vmem:[#allocation7 + $0x100] sm:$0xff]  ;;  %v2178_v57 = vmax.f32 %v1455_v45, 0.0  ;;  %v2179_v60 = vmax.f32 %v1575_v53, 0.0  ;;  %v2180_v46 = vmax.f32 %v1695_v59, 0.0  ;;  %v2264_v61 = vld [vmem:[#allocation7 + $0x278] sm:$0xff] }
 0x1ee   : > { %2344 = vmatpush.msra.mxu1 %v2209_v33  ;;  %2364 = vmatpush.msra.mxu2 %v2225_v63  ;;  %v2280_v33 = vld [vmem:[#allocation7 + $0x2f8] sm:$0xff]  ;;  %v2263_v63 = vld [vmem:[#allocation7 + $0x270] sm:$0xff]  ;;  %v2273_v34 = vld [vmem:[#allocation7 + $0x2c0] sm:$0xff] }
 0x1ef   : > { %2384 = vmatpush.msra.mxu3 %v2241_v5  ;;  %2325 = vmatpush.msra.mxu0 %v2192_v43  ;;  %v2279_v5 = vld [vmem:[#allocation7 + $0x2f0] sm:$0xff]  ;;  %v2296_v43 = vld [vmem:[#allocation7 + $0x378] sm:$0xff]  ;;  %v2254_v42 = vld [vmem:[#allocation7 + $0x228] sm:$0xff] }
 0x1f0   : > { %2345 = vmatpush.msra.mxu1 %v2208_v35  ;;  %2365 = vmatpush.msra.mxu2 %v2224_v36  ;;  %v2295_v35 = vld [vmem:[#allocation7 + $0x370] sm:$0xff]  ;;  %v2278_v36 = vld [vmem:[#allocation7 + $0x2e8] sm:$0xff]  ;;  %v2269_v53 = vld [vmem:[#allocation7 + $0x2a0] sm:$0xff] }
 0x1f1   : > { %2385 = vmatpush.msra.mxu3 %v2240_v9  ;;  %2326 = vmatpush.msra.mxu0 %v2191_v47  ;;  %v3270_v62 = vpop.f32.mrf.mxu3  ;;  %v1206_v9 = vperm.slane %v3236_v12, 5  ;;  %v2294_v47 = vld [vmem:[#allocation7 + $0x368] sm:$0xff]  ;;  %v2259_v21 = vld [vmem:[#allocation7 + $0x250] sm:$0xff] }
 0x1f2   : > { %2346 = vmatpush.msra.mxu1 %v2207_v13  ;;  %2366 = vmatpush.msra.mxu2 %v2223_v25  ;;  %v2261_v13 = vld [vmem:[#allocation7 + $0x260] sm:$0xff]  ;;  %v3276_v52 = vpop.f32.mrf.mxu1  ;;  %v2275_v22 = vld [vmem:[#allocation7 + $0x2d0] sm:$0xff]  ;;  %v2270_v45 = vld [vmem:[#allocation7 + $0x2a8] sm:$0xff] }
 0x1f3   : > { %2386 = vmatpush.msra.mxu3 %v2239_v16  ;;  %2327 = vmatpush.msra.mxu0 %v2190_v0  ;;  %v2293_v25 = vld [vmem:[#allocation7 + $0x360] sm:$0xff]  ;;  %v1715_v16 = vadd.f32 %v1714_v48, %v1205_v6  ;;  %v2287_v48 = vld [vmem:[#allocation7 + $0x330] sm:$0xff]  ;;  %v2286_v59 = vld [vmem:[#allocation7 + $0x328] sm:$0xff] }
 0x1f4   : > { %2347 = vmatpush.msra.mxu1 %v2206_v44  ;;  %2367 = vmatpush.msra.mxu2 %v2222_v8  ;;  %v2260_v44 = vld [vmem:[#allocation7 + $0x258] sm:$0xff] }
 0x1f5   : > { %2387 = vmatpush.msra.mxu3 %v2238_v18  ;;  %2328 = vmatpush.msra.mxu0 %v2189_v23  ;;  %v2292_v18 = vld [vmem:[#allocation7 + $0x358] sm:$0xff]  ;;  %v2291_v23 = vld [vmem:[#allocation7 + $0x350] sm:$0xff] }
 0x1f6   : > { %2348 = vmatpush.msra.mxu1 %v2205_v24  ;;  %2368 = vmatpush.msra.mxu2 %v2221_v28  ;;  %v1735_v24 = vadd.f32 %v1734_v30, %v1715_v16  ;;  %v2258_v28 = vld [vmem:[#allocation7 + $0x248] sm:$0xff]  ;;  %v2267_v30 = vld [vmem:[#allocation7 + $0x290] sm:$0xff]  ;;  %v1207_v16 = vperm.slane %v3236_v12, 6 }
 0x1f7   : > { %2388 = vmatpush.msra.mxu3 %v2237_v31  ;;  %2329 = vmatpush.msra.mxu0 %v2188_v49  ;;  %v1834_v11 = vpop.f32.mrf.mxu2  ;;  %v2274_v31 = vld [vmem:[#allocation7 + $0x2c8] sm:$0xff]  ;;  %v1874_v49 = vpop.f32.mrf.mxu0 }
 0x1f8   : > { %2349 = vmatpush.msra.mxu1 %v2204_v55  ;;  %2369 = vmatpush.msra.mxu2 %v2220_v15  ;;  %v1835_v0 = vadd.f32 %v1834_v11, %v1206_v9  ;;  %v2290_v55 = vld [vmem:[#allocation7 + $0x348] sm:$0xff]  ;;  %v2289_v15 = vld [vmem:[#allocation7 + $0x340] sm:$0xff] }
 0x1f9   : > { %2389 = vmatpush.msra.mxu3 %v2236_v3  ;;  %2330 = vmatpush.msra.mxu0 %v2187_v38  ;;  %v1854_v8 = vpop.f32.mrf.mxu3  ;;  %v1755_v3 = vadd.f32 %v3268_v56, %v1735_v24  ;;  %v2272_v38 = vld [vmem:[#allocation7 + $0x2b8] sm:$0xff]  ;;  %v2281_v9 = vld [vmem:[#allocation7 + $0x300] sm:$0xff]  ;;  %v2310_v11 = vld [vmem:[#allocation7 + $0x3e8] sm:$0xff] }
 0x1fa   : > { %2350 = vmatpush.msra.mxu1 %v2203_v1  ;;  %2370 = vmatpush.msra.mxu2 %v2219_v40  ;;  %v1855_v26 = vadd.f32 %v1854_v8, %v1835_v0  ;;  %v2255_v40 = vld [vmem:[#allocation7 + $0x230] sm:$0xff]  ;;  %v2252_v56 = vld [vmem:[#allocation7 + $0x218] sm:$0xff]  ;;  %v2305_v0 = vld [vmem:[#allocation7 + $0x3c0] sm:$0xff] }
 0x1fb   : > { %2390 = vmatpush.msra.mxu3 %v2235_v41  ;;  %2331 = vmatpush.msra.mxu0 %v2186_v19  ;;  %v2271_v41 = vld [vmem:[#allocation7 + $0x2b0] sm:$0xff]  ;;  %v1775_v19 = vadd.f32 %v3270_v62, %v1755_v3  ;;  %v2266_v62 = vld [vmem:[#allocation7 + $0x288] sm:$0xff]  ;;  %v2300_v3 = vld [vmem:[#allocation7 + $0x398] sm:$0xff] }
 0x1fc   : > { %2351 = vmatpush.msra.mxu1 %v2202_v50  ;;  %2371 = vmatpush.msra.mxu2 %v2218_v27  ;;  %v1875_v4 = vadd.f32 %v1874_v49, %v1855_v26  ;;  %v2304_v26 = vld [vmem:[#allocation7 + $0x3b8] sm:$0xff] }
 0x1fd   : > { %2391 = vmatpush.msra.mxu3 %v2234_v51  ;;  %2332 = vmatpush.msra.mxu0 %v2185_v20  ;;  %v2253_v51 = vld [vmem:[#allocation7 + $0x220] sm:$0xff]  ;;  %v1795_v20 = vadd.f32 %v3274_v10, %v1775_v19  ;;  %v2311_v10 = vld [vmem:[#allocation7 + $0x3f0] sm:$0xff] }
 0x1fe   : > { %2352 = vmatpush.msra.mxu1 %v2201_v54  ;;  %2372 = vmatpush.msra.mxu2 %v2217_v29  ;;  %v2268_v29 = vld [vmem:[#allocation7 + $0x298] sm:$0xff] }
 0x1ff   : > { %2392 = vmatpush.msra.mxu3 %v2233_v2  ;;  %2333 = vmatmul.f32.vlgmr.msra.gmra.mxu0 %v2177_v58  ;;  %v2285_v2 = vld [vmem:[#allocation7 + $0x320] sm:$0xff] }
 0x200   : > { %2353 = vmatmul.f32.vlgmr.msra.gmra.mxu1 %v2178_v57  ;;  %2373 = vmatmul.f32.vlgmr.msra.gmra.mxu2 %v2179_v60  ;;  %v2251_v57 = vld [vmem:[#allocation7 + $0x210] sm:$0xff]  ;;  %v2284_v60 = vld [vmem:[#allocation7 + $0x318] sm:$0xff] }
 0x201   : > { %2393 = vmatmul.f32.vlgmr.msra.gmra.mxu3 %v2180_v46  ;;  %2397 = vmatpush.msrb.mxu0 %v2264_v61  ;;  %v1815_v46 = vadd.f32 %v3276_v52, %v1795_v20 }
 0x202   : > { %2417 = vmatpush.msrb.mxu1 %v2280_v33  ;;  %2437 = vmatpush.msrb.mxu2 %v2296_v43  ;;  %v1894_v1 = vpop.f32.mrf.mxu1  ;;  %v2250_v33 = vld [vmem:[#allocation7 + $0x208] sm:$0xff]  ;;  %v2283_v43 = vld [vmem:[#allocation7 + $0x310] sm:$0xff] }
 0x203   : > { %2398 = vmatpush.msrb.mxu0 %v2263_v63  ;;  %v1895_v50 = vadd.f32 %v1894_v1, %v1875_v4  ;;  %v1914_v27 = vpop.f32.mrf.mxu2  ;;  %v2249_v63 = vld [vmem:[#allocation7 + $0x200] sm:$0xff]  ;;  %v2299_v4 = vld [vmem:[#allocation7 + $0x390] sm:$0xff]  ;;  %v1208_v1 = vperm.slane %v3236_v12, 7 }
 0x204   : > { %2418 = vmatpush.msrb.mxu1 %v2279_v5  ;;  %2438 = vmatpush.msrb.mxu2 %v2295_v35  ;;  %v2265_v5 = vld [vmem:[#allocation7 + $0x280] sm:$0xff]  ;;  %v2181_v35 = vmax.f32 %v1815_v46, 0.0 }
 0x205   : > { %2399 = vmatpush.msrb.mxu0 %v2262_v7  ;;  %v1915_v54 = vadd.f32 %v1914_v27, %v1895_v50  ;;  %v2282_v7 = vld [vmem:[#allocation7 + $0x308] sm:$0xff] }
 0x206   : > { %2419 = vmatpush.msrb.mxu1 %v2278_v36  ;;  %2439 = vmatpush.msrb.mxu2 %v2294_v47  ;;  %v1934_v58 = vpop.f32.mrf.mxu3  ;;  %v2312_v36 = vld [vmem:[#allocation7 + $0x3f8] sm:$0xff]  ;;  %v2309_v47 = vld [vmem:[#allocation7 + $0x3e0] sm:$0xff] }
 0x207   : > { %2400 = vmatpush.msrb.mxu0 %v2261_v13  ;;  %v1935_v61 = vadd.f32 %v1934_v58, %v1915_v54  ;;  %2457 = vmatpush.msrb.mxu3 %v2312_v36  ;;  %v2308_v13 = vld [vmem:[#allocation7 + $0x3d8] sm:$0xff]  ;;  %v2493_v54 = vld [vmem:[%s3344_s5 + $0x78] sm:$0xff]  ;;  %v2492_v12 = vld [vmem:[%s3344_s5 + $0x70] sm:$0xff] }
 0x208   : > { %2420 = vmatpush.msrb.mxu1 %v2277_v14  ;;  %2440 = vmatpush.msrb.mxu2 %v2293_v25  ;;  %v2307_v14 = vld [vmem:[#allocation7 + $0x3d0] sm:$0xff]  ;;  %v2306_v25 = vld [vmem:[#allocation7 + $0x3c8] sm:$0xff] }
 0x209   : > { %2401 = vmatpush.msrb.mxu0 %v2260_v44  ;;  %v2182_v6 = vmax.f32 %v1935_v61, 0.0  ;;  %2458 = vmatpush.msrb.mxu3 %v2311_v10  ;;  %v2488_v58 = vld [vmem:[%s3344_s5 + $0x50] sm:$0xff]  ;;  %v2483_v61 = vld [vmem:[%s3344_s5 + $0x28] sm:$0xff] }
 0x20a   : > { %2421 = vmatpush.msrb.mxu1 %v2276_v17  ;;  %2441 = vmatpush.msrb.mxu2 %v2292_v18  ;;  %v2484_v46 = vld [vmem:[%s3344_s5 + $0x30] sm:$0xff] }
 0x20b   : > { %2402 = vmatpush.msrb.mxu0 %v2259_v21  ;;  %2459 = vmatpush.msrb.mxu3 %v2310_v11 }
 0x20c   : > { %2422 = vmatpush.msrb.mxu1 %v2275_v22  ;;  %2442 = vmatpush.msrb.mxu2 %v2291_v23 }
 0x20d   : > { %2403 = vmatpush.msrb.mxu0 %v2258_v28  ;;  %2460 = vmatpush.msrb.mxu3 %v2309_v47 }
 0x20e   : > { %2423 = vmatpush.msrb.mxu1 %v2274_v31  ;;  %2443 = vmatpush.msrb.mxu2 %v2290_v55  ;;  %v2303_v55 = vld [vmem:[#allocation7 + $0x3b0] sm:$0xff] }
 0x20f   : > { %2404 = vmatpush.msrb.mxu0 %v2257_v32  ;;  %2461 = vmatpush.msrb.mxu3 %v2308_v13 }
 0x210   : > { %2424 = vmatpush.msrb.mxu1 %v2273_v34  ;;  %2444 = vmatpush.msrb.mxu2 %v2289_v15  ;;  %v2302_v34 = vld [vmem:[#allocation7 + $0x3a8] sm:$0xff]  ;;  %v2301_v15 = vld [vmem:[#allocation7 + $0x3a0] sm:$0xff] }
 0x211   : > { %2405 = vmatpush.msrb.mxu0 %v2256_v37  ;;  %2462 = vmatpush.msrb.mxu3 %v2307_v14  ;;  %v2298_v37 = vld [vmem:[#allocation7 + $0x388] sm:$0xff] }
 0x212   : > { %2425 = vmatpush.msrb.mxu1 %v2272_v38  ;;  %2445 = vmatpush.msrb.mxu2 %v2288_v39  ;;  %v2297_v38 = vld [vmem:[#allocation7 + $0x380] sm:$0xff] }
 0x213   : > { %2406 = vmatpush.msrb.mxu0 %v2255_v40  ;;  %2463 = vmatpush.msrb.mxu3 %v2306_v25 }
 0x214   : > { %2426 = vmatpush.msrb.mxu1 %v2271_v41  ;;  %2446 = vmatpush.msrb.mxu2 %v2287_v48 }
 0x215   : > { %2407 = vmatpush.msrb.mxu0 %v2254_v42  ;;  %2464 = vmatpush.msrb.mxu3 %v2305_v0 }
 0x216   : > { %2427 = vmatpush.msrb.mxu1 %v2270_v45  ;;  %2447 = vmatpush.msrb.mxu2 %v2286_v59 }
 0x217   : > { %2408 = vmatpush.msrb.mxu0 %v2253_v51  ;;  %2465 = vmatpush.msrb.mxu3 %v2304_v26 }
 0x218   : > { %2428 = vmatpush.msrb.mxu1 %v2269_v53  ;;  %2448 = vmatpush.msrb.mxu2 %v2285_v2  ;;  %v2489_v2 = vld [vmem:[%s3344_s5 + $0x58] sm:$0xff] }
 0x219   : > { %2409 = vmatpush.msrb.mxu0 %v2252_v56  ;;  %2466 = vmatpush.msrb.mxu3 %v2303_v55  ;;  %v2491_v56 = vld [vmem:[%s3344_s5 + $0x68] sm:$0xff] }
 0x21a   : > { %2429 = vmatpush.msrb.mxu1 %v2268_v29  ;;  %2449 = vmatpush.msrb.mxu2 %v2284_v60  ;;  %v2490_v29 = vld [vmem:[%s3344_s5 + $0x60] sm:$0xff]  ;;  %v2485_v60 = vld [vmem:[%s3344_s5 + $0x38] sm:$0xff] }
 0x21b   : > { %2410 = vmatpush.msrb.mxu0 %v2251_v57  ;;  %2467 = vmatpush.msrb.mxu3 %v2302_v34  ;;  %v2487_v57 = vld [vmem:[%s3344_s5 + $0x48] sm:$0xff] }
 0x21c   : > { %2430 = vmatpush.msrb.mxu1 %v2267_v30  ;;  %2450 = vmatpush.msrb.mxu2 %v2283_v43  ;;  %v2486_v30 = vld [vmem:[%s3344_s5 + $0x40] sm:$0xff] }
 0x21d   : > { %2411 = vmatpush.msrb.mxu0 %v2250_v33  ;;  %2468 = vmatpush.msrb.mxu3 %v2301_v15  ;;  %v2482_v33 = vld [vmem:[%s3344_s5 + $0x20] sm:$0xff] }
 0x21e   : > { %2431 = vmatpush.msrb.mxu1 %v2266_v62  ;;  %2451 = vmatpush.msrb.mxu2 %v2282_v7  ;;  %v2481_v62 = vld [vmem:[%s3344_s5 + $0x18] sm:$0xff]  ;;  %v2478_v43 = vld [vmem:[%s3344_s5] sm:$0xff] }
 0x21f   : > { %2412 = vmatpush.msrb.mxu0 %v2249_v63  ;;  %2469 = vmatpush.msrb.mxu3 %v2300_v3  ;;  %v2480_v63 = vld [vmem:[%s3344_s5 + $0x10] sm:$0xff] }
 0x220   : > { %2432 = vmatpush.msrb.mxu1 %v2265_v5  ;;  %2413 = vmatmul.f32.vlgmr.msrb.gmra.mxu0 %v2181_v35  ;;  %v2479_v5 = vld [vmem:[%s3344_s5 + $0x8] sm:$0xff] }
 0x221   : > { %2433 = vmatmul.f32.vlgmr.msrb.gmra.mxu1 %v2182_v6  ;;  %2452 = vmatpush.msrb.mxu2 %v2281_v9  ;;  %v2743_v35 = vld [vmem:[#allocation8] ss:$0 sm:$0xff] }
 0x222   : > { %2470 = vmatpush.msrb.mxu3 %v2299_v4  ;;  %2498 = vmatpush.msra.mxu0 %v2493_v54 }
 0x224   : > { %2471 = vmatpush.msrb.mxu3 %v2298_v37  ;;  %2499 = vmatpush.msra.mxu0 %v2492_v12 }
 0x226   : > { %2472 = vmatpush.msrb.mxu3 %v2297_v38  ;;  %2500 = vmatpush.msra.mxu0 %v2491_v56 }
 0x228   : > { %2501 = vmatpush.msra.mxu0 %v2490_v29 }
 0x22a   : > { %2502 = vmatpush.msra.mxu0 %v2489_v2 }
 0x22c   : > { %2503 = vmatpush.msra.mxu0 %v2488_v58 }
 0x22e   : > { %2504 = vmatpush.msra.mxu0 %v2487_v57 }
 0x22f   : > { %v1954_v44 = vpop.f32.mrf.mxu0 }
 0x230   : > { %v1955_v17 = vadd.f32 %v1954_v44, %v1207_v16  ;;  %2505 = vmatpush.msra.mxu0 %v2486_v30 }
 0x232   : > { %v1974_v52 = vpop.f32.mrf.mxu1  ;;  %2506 = vmatpush.msra.mxu0 %v2485_v60 }
 0x233   : > { %v1975_v8 = vadd.f32 %v1974_v52, %v1955_v17 }
 0x234   : > { %v1994_v18 = vpop.f32.mrf.mxu2  ;;  %2507 = vmatpush.msra.mxu0 %v2484_v46 }
 0x235   : > { %v1995_v21 = vadd.f32 %v1994_v18, %v1975_v8  ;;  %v2014_v22 = vpop.f32.mrf.mxu3 }
 0x236   : > { %2508 = vmatpush.msra.mxu0 %v2483_v61 }
 0x237   : > { %v2015_v23 = vadd.f32 %v2014_v22, %v1995_v21  ;;  %v2744_v21 = vld [vmem:[#allocation10] ss:$0 sm:$0xff] }
 0x238   : > { %v2034_v24 = vpop.f32.mrf.mxu0  ;;  %2509 = vmatpush.msra.mxu0 %v2482_v33 }
 0x239   : > { %v2035_v28 = vadd.f32 %v2034_v24, %v2015_v23  ;;  %v2745_v24 = vld [vmem:[#allocation11] ss:$0 sm:$0xff] }
 0x23a   : > { %2510 = vmatpush.msra.mxu0 %v2481_v62 }
 0x23b   : > { %v2054_v31 = vpop.f32.mrf.mxu1 }
 0x23c   : > { %v2055_v49 = vadd.f32 %v2054_v31, %v2035_v28  ;;  %2511 = vmatpush.msra.mxu0 %v2480_v63 }
 0x23e   : > { %v2183_v32 = vmax.f32 %v2055_v49, 0.0  ;;  %2512 = vmatpush.msra.mxu0 %v2479_v5  ;;  %v2746_v49 = vld [vmem:[#allocation2] ss:$0 sm:$0xff] }
 0x240   : > { %2453 = vmatmul.f32.vlgmr.msrb.gmra.mxu2 %v2183_v32  ;;  %2513 = vmatpush.msra.mxu0 %v2478_v43 }
 0x257   : > { %v2074_v39 = vpop.f32.mrf.mxu2 }
 0x258   : > { %v2075_v40 = vadd.f32 %v2074_v39, %v1208_v1 }
 0x259   : > { %v2114_v50 = vpop.f32.mrf.mxu0 }
 0x25a   : > { %v2094_v41 = vpop.f32.mrf.mxu3 }
 0x25b   : > { %v2095_v19 = vadd.f32 %v2094_v41, %v2075_v40 }
 0x25d   : > { %v2115_v42 = vadd.f32 %v2114_v50, %v2095_v19 }
 0x260   : > { %v2134_v45 = vpop.f32.mrf.mxu1 }
 0x261   : > { %v2135_v48 = vadd.f32 %v2134_v45, %v2115_v42  ;;  %v2154_v27 = vpop.f32.mrf.mxu2 }
 0x263   : > { %v2155_v51 = vadd.f32 %v2154_v27, %v2135_v48 }
 0x264   : > { %v2174_v53 = vpop.f32.mrf.mxu3 }
 0x265   : > { %v2175_v59 = vadd.f32 %v2174_v53, %v2155_v51 }
 0x267   : > { %v2184_v20 = vmax.f32 %v2175_v59, 0.0 }
 0x269   : > { %2473 = vmatmul.f32.vlgmr.msrb.gmra.mxu3 %v2184_v20 }
 0x27c   : > { %v2334_v6 = vpop.f32.mrf.mxu0 }
 0x27d   : > { %v2335_v7 = vadd.f32 %v2743_v35, %v2334_v6  ;;  %v2354_v36 = vpop.f32.mrf.mxu1 }
 0x27f   : > { %v2355_v10 = vadd.f32 %v2354_v36, %v2335_v7 }
 0x283   : > { %v2374_v9 = vpop.f32.mrf.mxu2 }
 0x284   : > { %v2375_v11 = vadd.f32 %v2374_v9, %v2355_v10  ;;  %v2394_v47 = vpop.f32.mrf.mxu3 }
 0x286   : > { %v2395_v14 = vadd.f32 %v2394_v47, %v2375_v11 }
 0x29d   : > { %v2414_v13 = vpop.f32.mrf.mxu0 }
 0x29e   : > { %v2415_v25 = vadd.f32 %v2414_v13, %v2395_v14  ;;  %v2434_v16 = vpop.f32.mrf.mxu1 }
 0x2a0   : > { %v2435_v44 = vadd.f32 %v2434_v16, %v2415_v25 }
 0x2c3   : > { %v2454_v0 = vpop.f32.mrf.mxu2 }
 0x2c4   : > { %v2455_v17 = vadd.f32 %v2454_v0, %v2435_v44 }
 0x2ec   : > { %v2474_v52 = vpop.f32.mrf.mxu3 }
 0x2ed   : > { %v2475_v8 = vadd.f32 %v2474_v52, %v2455_v17 }
 0x2ef   : > { %v2477_v18 = vmax.f32 %v2475_v8, 0.0 }
 0x2f1   : > { %2514 = vmatmul.f32.vlgmr.msra.gmra.mxu0 %v2477_v18 }
 0x36e   : > { %v2515_v22 = vpop.f32.mrf.mxu0 }
 0x36f   : > { %v2516_v23 = vadd.f32 %v2744_v21, %v2515_v22 }
 0x371   : > { %v2518_v26 = vmax.f32 %v2516_v23, 0.0 }
 0x373   : > { %v2523_v28 = vmul.f32 %v2745_v24, %v2518_v26 }
 0x375   : > { %v2525_v31 = vsel %vm2524_vm0, %v2523_v28, 0.0 }
 0x376   : > { %2526 = vadd.xlane.f32.xlu0 %v2525_v31 }
 0x3e9   : > { %v2527_v55 = vpop.xlane.xlu0 %2526 }
 0x3ea   : > { %v2532_v32 = vadd.f32 %v2746_v49, %v2527_v55 }
 0x3ec   : > { %2534 = vst.msk [vmem:[%s424_s29] sm:$0xff] %vm2533_vm1, %v2532_v32 }
 0x3ed PF: > { %s25_s11 = sadd.s32 1, %s2961_s11  }
 0x3ee   : > { %p22_p7 = scmp.ge.s32.totalorder %s25_s11, 5  }
 0x3f0   :  { %24 = sbr.rel (!%p22_p7) target bundleno = 7 (0x7), region = 111 }
 0x3f5   :  { %2554 = vsyncpa [#allocation4], 1 }
 0x3f6   :  { %2556 = vsyncpa [#allocation4 + $0x1], 1 }
 0x3f7   :  { %2557 = vsyncpa [#allocation6], 1 }
 0x3f8   :  { %2558 = vsyncpa [#allocation9], 1 }
 0x3f9   :  { %2559 = vsyncpa [#allocation12], 1 }

</bundles_post_ra>
